<compile_context>
chip_gen: v6e
topology: v6e:2x2x1
jax: 0.10.0
libtpu: 0.0.40
codegen_flags: <defaults>
</compile_context>

<pallas_src>
import functools

import jax
import jax.numpy as jnp
from jax.experimental import pallas as pl
from jax.experimental.pallas import tpu as pltpu


C_PAD = 128  # lane width: all channel dims are zero-padded to this.
_BN_EPS = 1e-5


def _round_up(x, m):
    return (x + m - 1) // m * m


# ----------------------------------------------------------------------------
# Derived per-branch sizes (conv 'same' padding, pooling lengths, etc.)
# ----------------------------------------------------------------------------
def _branch_dims(T, K0, stride0, poolk_a, pools_a, K3, poolk_b, pools_b):
    # Conv2dSamePadding pad for kernel (K, 1): top = K//2 + K%2 - 1, bottom = K//2
    pad0_l = K0 // 2 + (K0 % 2) - 1
    pad0_r = K0 // 2
    Hp = T + pad0_l + pad0_r                      # == T + K0 - 1
    L0 = (Hp - K0) // stride0 + 1                 # conv0 output length
    Ks0 = -(-K0 // stride0)                       # ceil(K0 / stride0)
    W_cols = L0 + Ks0 - 1                         # columns of the (cols, stride) reshape
    L1 = (L0 - poolk_a) // pools_a + 1            # after pool #1
    pad3 = K3 // 2 + (K3 % 2) - 1                 # 'same' left pad for stride-1 convs
    Lp1 = L1 + K3 - 1                             # padded buffer length for those convs
    L2 = (L1 - poolk_b) // pools_b + 1            # after pool #2
    return dict(K0=K0, stride0=stride0, pad0_l=pad0_l, pad0_r=pad0_r,
                L0=L0, Ks0=Ks0, W_cols=W_cols,
                poolk_a=poolk_a, pools_a=pools_a, L1=L1,
                K3=K3, pad3=pad3, Lp1=Lp1,
                poolk_b=poolk_b, pools_b=pools_b, L2=L2)


def _dims_from_cfg(cfg):
    d1 = _branch_dims(cfg["n_timepoints"], cfg["filter_size_1"], cfg["filter_stride_1"],
                      cfg["pool_size_11"], cfg["pool_stride_11"],
                      cfg["filter_size_1x3"], cfg["pool_size_12"], cfg["pool_stride_12"])
    d2 = _branch_dims(cfg["n_timepoints"], cfg["filter_size_2"], cfg["filter_stride_2"],
                      cfg["pool_size_21"], cfg["pool_stride_21"],
                      cfg["filter_size_2x3"], cfg["pool_size_22"], cfg["pool_stride_22"])
    return d1, d2


# ----------------------------------------------------------------------------
# Fused kernel: BOTH branches per grid step; one grid step == one batch element.
# Each branch: conv0(stride)+BN+ReLU -> pool -> 3x(conv+BN+ReLU) -> pool.
# Layout: activations are (time, channel) with channel padded to 128 lanes.
# ----------------------------------------------------------------------------
def _fused_kernel(xr1_ref, xr2_ref,
                  w01_ref, wmid1_ref, bias1_ref,
                  w02_ref, wmid2_ref, bias2_ref,
                  o_ref, buf0, buf1, buf2, *, d1, d2):
    f32 = jnp.float32

    def run_branch(xr_ref, w0_ref, wmid_ref, bias_ref, d, row_off):
        L0, Ks0 = d["L0"], d["Ks0"]
        poolk_a, pools_a, L1 = d["poolk_a"], d["pools_a"], d["L1"]
        K3, pad3 = d["K3"], d["pad3"]
        poolk_b, pools_b, L2 = d["poolk_b"], d["pools_b"], d["L2"]

        # Zero the 'same'-padding buffers; only interior rows are written below,
        # so pad rows stay zero for all three stride-1 convs (and no stale data
        # leaks between the two branches).
        buf1[...] = jnp.zeros_like(buf1)
        buf2[...] = jnp.zeros_like(buf2)

        # ---- layer 0: strided conv over the raw signal (C_in == 1) ----------
        # Host side reshaped the padded signal to xr[m, r] = x_pad[m*stride + r],
        # so the strided conv is Ks0 shifted (L0, s) @ (s, C_PAD) matmuls.
        acc = jnp.dot(xr_ref[0, pl.ds(0, L0), :], w0_ref[0],
                      preferred_element_type=f32)
        for ks in range(1, Ks0):
            acc = acc + jnp.dot(xr_ref[0, pl.ds(ks, L0), :], w0_ref[ks],
                                preferred_element_type=f32)
        acc = jnp.maximum(acc + bias_ref[pl.ds(0, 1), :], 0.0)
        buf0[pl.ds(0, L0), :] = acc

        # ---- maxpool #1 (kernel poolk_a, stride pools_a) ---------------------
        pooled = buf0[pl.ds(0, L1, stride=pools_a), :]
        for r in range(1, poolk_a):
            pooled = jnp.maximum(pooled, buf0[pl.ds(r, L1, stride=pools_a), :])
        buf1[pl.ds(pad3, L1), :] = pooled
        # Dropout here is identity (eval mode).  # TODO(synk): train-mode dropout not modeled.

        # ---- three stride-1 'same' convs + BN(folded) + ReLU -----------------
        def conv_same(src_ref, layer):
            a = jnp.dot(src_ref[pl.ds(0, L1), :], wmid_ref[layer, 0],
                        preferred_element_type=f32)
            for k in range(1, K3):
                a = a + jnp.dot(src_ref[pl.ds(k, L1), :], wmid_ref[layer, k],
                                preferred_element_type=f32)
            return jnp.maximum(a + bias_ref[pl.ds(layer + 1, 1), :], 0.0)

        buf2[pl.ds(pad3, L1), :] = conv_same(buf1, 0)
        buf1[pl.ds(pad3, L1), :] = conv_same(buf2, 1)
        buf0[pl.ds(0, L1), :] = conv_same(buf1, 2)

        # ---- maxpool #2 ------------------------------------------------------
        out = buf0[pl.ds(0, L2, stride=pools_b), :]
        for r in range(1, poolk_b):
            out = jnp.maximum(out, buf0[pl.ds(r, L2, stride=pools_b), :])
        o_ref[0, pl.ds(row_off, L2), :] = out

    run_branch(xr1_ref, w01_ref, wmid1_ref, bias1_ref, d1, 0)
    run_branch(xr2_ref, w02_ref, wmid2_ref, bias2_ref, d2, d1["L2"])


def _layer0_relayout(x1d, d):
    """(B, T) signal -> (B, W_cols, stride) relayout for the strided conv."""
    B = x1d.shape[0]
    xp = jnp.pad(x1d.astype(jnp.float32), ((0, 0), (d["pad0_l"], d["pad0_r"])))
    need = d["W_cols"] * d["stride0"]
    cur = xp.shape[1]
    if need > cur:
        xp = jnp.pad(xp, ((0, 0), (0, need - cur)))
    else:
        # Trailing elements dropped here are never touched by a non-zero tap.
        xp = xp[:, :need]
    return xp.reshape(B, d["W_cols"], d["stride0"])


def _fused_branches(x1d, packed, d1, d2):
    """x1d: (B, T) single-channel signal -> (B, L2_1 + L2_2, C_PAD) features."""
    B = x1d.shape[0]
    xr1 = _layer0_relayout(x1d, d1)
    xr2 = _layer0_relayout(x1d, d2)
    b1, b2 = packed["b1"], packed["b2"]
    L2_sum = d1["L2"] + d2["L2"]
    rows0 = _round_up(max(d1["L0"], d2["L0"]), 8)
    rows1 = _round_up(max(d1["Lp1"], d2["Lp1"]), 8)

    kern = functools.partial(_fused_kernel, d1=d1, d2=d2)

    return pl.pallas_call(
        kern,
        out_shape=jax.ShapeDtypeStruct((B, L2_sum, C_PAD), jnp.float32),
        grid=(B,),
        in_specs=[
            pl.BlockSpec((1, d1["W_cols"], d1["stride0"]), lambda b: (b, 0, 0)),
            pl.BlockSpec((1, d2["W_cols"], d2["stride0"]), lambda b: (b, 0, 0)),
            pl.BlockSpec((d1["Ks0"], d1["stride0"], C_PAD), lambda b: (0, 0, 0)),
            pl.BlockSpec((3, d1["K3"], C_PAD, C_PAD), lambda b: (0, 0, 0, 0)),
            pl.BlockSpec((4, C_PAD), lambda b: (0, 0)),
            pl.BlockSpec((d2["Ks0"], d2["stride0"], C_PAD), lambda b: (0, 0, 0)),
            pl.BlockSpec((3, d2["K3"], C_PAD, C_PAD), lambda b: (0, 0, 0, 0)),
            pl.BlockSpec((4, C_PAD), lambda b: (0, 0)),
        ],
        out_specs=pl.BlockSpec((1, L2_sum, C_PAD), lambda b: (b, 0, 0)),
        scratch_shapes=[
            pltpu.VMEM((rows0, C_PAD), jnp.float32),
            pltpu.VMEM((rows1, C_PAD), jnp.float32),
            pltpu.VMEM((rows1, C_PAD), jnp.float32),
        ],
        compiler_params=pltpu.CompilerParams(
            dimension_semantics=("parallel",)),   # B grid steps -> both v7x TCs
    )(xr1, xr2, b1["w0r"], b1["wmid"], b1["biases"],
      b2["w0r"], b2["wmid"], b2["biases"])


# ----------------------------------------------------------------------------
# Parameter init (mirrors _reset_parameters) and host-side packing
# ----------------------------------------------------------------------------
def _kaiming_conv(key, c_out, c_in, k):
    fan_out = c_out * k * 1  # kernel is (k, 1)
    std = (2.0 / fan_out) ** 0.5
    return jax.random.normal(key, (c_out, c_in, k), jnp.float32) * std


def _bn_scale_bias(c_out):
    # gamma=1, beta=0, running_mean=0, running_var=1  ->  scale, bias
    scale = jnp.ones((c_out,), jnp.float32) / jnp.sqrt(1.0 + _BN_EPS)
    bias = jnp.zeros((c_out,), jnp.float32)
    return scale, bias


def init_params(key, cfg):
    keys = jax.random.split(key, 10)
    p = {"conv1": {}, "conv2": {}}

    def make_branch(dst, ks, nf_first, fs_first, nf_small, fs_small):
        chans = [(1, nf_first, fs_first),
                 (nf_first, nf_small, fs_small),
                 (nf_small, nf_small, fs_small),
                 (nf_small, nf_small, fs_small)]
        for li, (cin, cout, k) in enumerate(chans):
            dst[f"w{li}"] = _kaiming_conv(ks[li], cout, cin, k)
            s, b = _bn_scale_bias(cout)
            dst[f"s{li}"], dst[f"b{li}"] = s, b

    make_branch(p["conv1"], keys[0:4], cfg["n_filters_1"], cfg["filter_size_1"],
                cfg["n_filters_1x3"], cfg["filter_size_1x3"])
    make_branch(p["conv2"], keys[4:8], cfg["n_filters_2"], cfg["filter_size_2"],
                cfg["n_filters_2x3"], cfg["filter_size_2x3"])

    d1, d2 = _dims_from_cfg(cfg)
    feat = d1["L2"] * cfg["n_filters_1x3"] + d2["L2"] * cfg["n_filters_2x3"]
    bound = 1.0 / (feat ** 0.5)
    p["cls_w"] = jax.random.uniform(keys[8], (cfg["n_classes"], feat),
                                    jnp.float32, -bound, bound)
    p["cls_b"] = jax.random.uniform(keys[9], (cfg["n_classes"],),
                                    jnp.float32, -bound, bound)
    return p


def _pack_branch(bp, d):
    """Fold BN scale into conv weights, pad channels to C_PAD, and lay layer-0
    weights out for the stride decomposition k = ks*stride + r."""
    # ---- layer 0 ----
    w0 = bp["w0"] * bp["s0"][:, None, None]            # (C0, 1, K0)
    C0 = w0.shape[0]
    K0p = d["Ks0"] * d["stride0"]
    w0p = jnp.pad(w0[:, 0, :], ((0, 0), (0, K0p - d["K0"])))          # (C0, K0p)
    w0r = w0p.reshape(C0, d["Ks0"], d["stride0"]).transpose(1, 2, 0)  # (Ks0, s, C0)
    w0r = jnp.pad(w0r, ((0, 0), (0, 0), (0, C_PAD - C0)))             # (Ks0, s, C_PAD)
    biases = [jnp.pad(bp["b0"], (0, C_PAD - C0))]
    # ---- layers 1..3 ----
    wmids = []
    for li in range(1, 4):
        w = bp[f"w{li}"] * bp[f"s{li}"][:, None, None]  # (Cout, Cin, K3)
        c_out, c_in, _ = w.shape
        wk = jnp.transpose(w, (2, 1, 0))                # (K3, Cin, Cout)
        wk = jnp.pad(wk, ((0, 0), (0, C_PAD - c_in), (0, C_PAD - c_out)))
        wmids.append(wk)
        biases.append(jnp.pad(bp[f"b{li}"], (0, C_PAD - c_out)))
    return {"w0r": w0r,
            "wmid": jnp.stack(wmids, axis=0),           # (3, K3, C_PAD, C_PAD)
            "biases": jnp.stack(biases, axis=0)}        # (4, C_PAD)


def pack_params(params, cfg):
    d1, d2 = _dims_from_cfg(cfg)
    C1, C2 = cfg["n_filters_1x3"], cfg["n_filters_2x3"]
    L2_1, L2_2 = d1["L2"], d2["L2"]
    n_classes = params["cls_w"].shape[0]

    # Permute+pad the classifier so it consumes the kernel's (time, chan_pad)
    # packed feature map directly: no activation transpose/concat in XLA.
    # torch .view(B,-1) flattens (C, H) channel-major -> feat index c*L2 + h.
    W = params["cls_w"]                                             # (n_cls, feat)
    W1 = W[:, :C1 * L2_1].reshape(n_classes, C1, L2_1)
    W1 = jnp.transpose(W1, (2, 1, 0))                               # (L2_1, C1, n_cls)
    W1 = jnp.pad(W1, ((0, 0), (0, C_PAD - C1), (0, 0)))
    W2 = W[:, C1 * L2_1:].reshape(n_classes, C2, L2_2)
    W2 = jnp.transpose(W2, (2, 1, 0))                               # (L2_2, C2, n_cls)
    W2 = jnp.pad(W2, ((0, 0), (0, C_PAD - C2), (0, 0)))
    w_perm = jnp.concatenate([W1, W2], axis=0).reshape(
        (L2_1 + L2_2) * C_PAD, n_classes)

    return {"b1": _pack_branch(params["conv1"], d1),
            "b2": _pack_branch(params["conv2"], d2),
            "cls_wperm": w_perm, "cls_b": params["cls_b"]}


# ----------------------------------------------------------------------------
# Full forward pass
# ----------------------------------------------------------------------------
def deepsleepnet_forward(packed, x, cfg):
    B = x.shape[0]
    d1, d2 = _dims_from_cfg(cfg)
    xs = x[:, 0, :, 0]                                   # (B, T): NCHW, C=1, W=1

    feat_map = _fused_branches(xs, packed, d1, d2)       # (B, L2_1 + L2_2, C_PAD)

    # drop1 -> identity (eval mode).  Classifier: free reshape + one tiny GEMM
    # against the host-permuted weight matrix (a dedicated pallas_call here is
    # pure launch/DMA overhead with a 5-wide masked store).
    feat = feat_map.reshape(B, -1)
    logits = feat @ packed["cls_wperm"] + packed["cls_b"]
    return logits


if __name__ == "__main__":
    # Small but architecture-consistent hyperparameters.
    cfg = dict(
        n_classes=5,
        n_timepoints=128,
        n_filters_1=8, filter_size_1=8, filter_stride_1=2,
        n_filters_2=8, filter_size_2=16, filter_stride_2=4,
        pool_size_11=2, pool_stride_11=2,
        pool_size_21=2, pool_stride_21=2,
        n_filters_1x3=16, filter_size_1x3=4,
        n_filters_2x3=16, filter_size_2x3=4,
        pool_size_12=2, pool_stride_12=2,
        pool_size_22=2, pool_stride_22=2,
    )
    key = jax.random.PRNGKey(0)
    kx, kp = jax.random.split(key)
    B = 2
    x = jax.random.normal(kx, (B, 1, cfg["n_timepoints"], 1), jnp.float32)
    params = init_params(kp, cfg)
    packed = pack_params(params, cfg)

    fwd = jax.jit(lambda p, xin: deepsleepnet_forward(p, xin, cfg))
    out = jax.block_until_ready(fwd(packed, x))
    assert out.shape == (B, cfg["n_classes"]), out.shape
    assert bool(jnp.all(jnp.isfinite(out)))
    print("KERNEL_OK")
</pallas_src>

<mosaic_0001>
module attributes {stable_mosaic.version = 11 : i64} {
  func.func @_fused_kernel(%arg0: i32, %arg1: memref<1x67x2xf32, #tpu.memory_space<vmem>>, %arg2: memref<1x35x4xf32, #tpu.memory_space<vmem>>, %arg3: memref<4x2x128xf32, #tpu.memory_space<vmem>>, %arg4: memref<3x4x128x128xf32, #tpu.memory_space<vmem>>, %arg5: memref<4x128xf32, #tpu.memory_space<vmem>>, %arg6: memref<4x4x128xf32, #tpu.memory_space<vmem>>, %arg7: memref<3x4x128x128xf32, #tpu.memory_space<vmem>>, %arg8: memref<4x128xf32, #tpu.memory_space<vmem>>, %arg9: memref<1x24x128xf32, #tpu.memory_space<vmem>>, %arg10: memref<64x128xf32, #tpu.memory_space<vmem>>, %arg11: memref<40x128xf32, #tpu.memory_space<vmem>>, %arg12: memref<40x128xf32, #tpu.memory_space<vmem>>) attributes {dimension_semantics = [#tpu.dimension_semantics<parallel>], iteration_bounds = array<i64: 2>, scalar_prefetch = 0 : i64, scratch_operands = 3 : i64, tpu.core_type = #tpu.core_type<tc>, window_params = [{transform_indices = @transform_0, window_bounds = array<i64: 1, 67, 2>}, {transform_indices = @transform_1, window_bounds = array<i64: 1, 35, 4>}, {pipeline_mode = #tpu.pipeline_mode<synchronous>, transform_indices = @transform_2, window_bounds = array<i64: 4, 2, 128>}, {pipeline_mode = #tpu.pipeline_mode<synchronous>, transform_indices = @transform_3, window_bounds = array<i64: 3, 4, 128, 128>}, {pipeline_mode = #tpu.pipeline_mode<synchronous>, transform_indices = @transform_4, window_bounds = array<i64: 4, 128>}, {pipeline_mode = #tpu.pipeline_mode<synchronous>, transform_indices = @transform_5, window_bounds = array<i64: 4, 4, 128>}, {pipeline_mode = #tpu.pipeline_mode<synchronous>, transform_indices = @transform_6, window_bounds = array<i64: 3, 4, 128, 128>}, {pipeline_mode = #tpu.pipeline_mode<synchronous>, transform_indices = @transform_7, window_bounds = array<i64: 4, 128>}, {transform_indices = @transform_8, window_bounds = array<i64: 1, 24, 128>}]} {
    %cst = arith.constant 0.000000e+00 : f32
    %0 = vector.broadcast %cst : f32 to vector<40x128xf32>
    %c0 = arith.constant 0 : index
    %c0_0 = arith.constant 0 : index
    %1 = vector.load %arg11[%c0, %c0_0] : memref<40x128xf32, #tpu.memory_space<vmem>>, vector<40x128xf32>
    tpu.vector_store %arg11[%c0, %c0_0], %0 {strides = array<i32>} : memref<40x128xf32, #tpu.memory_space<vmem>>, vector<40x128xf32>,
    %cst_1 = arith.constant 0.000000e+00 : f32
    %2 = vector.broadcast %cst_1 : f32 to vector<40x128xf32>
    %c0_2 = arith.constant 0 : index
    %c0_3 = arith.constant 0 : index
    %3 = vector.load %arg12[%c0_2, %c0_3] : memref<40x128xf32, #tpu.memory_space<vmem>>, vector<40x128xf32>
    tpu.vector_store %arg12[%c0_2, %c0_3], %2 {strides = array<i32>} : memref<40x128xf32, #tpu.memory_space<vmem>>, vector<40x128xf32>,
    %c0_4 = arith.constant 0 : index
    %c0_5 = arith.constant 0 : index
    %c0_6 = arith.constant 0 : index
    %4 = vector.load %arg1[%c0_4, %c0_5, %c0_6] : memref<1x67x2xf32, #tpu.memory_space<vmem>>, vector<1x64x2xf32>
    %5 = vector.shape_cast %4 : vector<1x64x2xf32> to vector<64x2xf32>
    %c0_7 = arith.constant 0 : index
    %c0_8 = arith.constant 0 : index
    %c0_9 = arith.constant 0 : index
    %6 = vector.load %arg3[%c0_7, %c0_8, %c0_9] : memref<4x2x128xf32, #tpu.memory_space<vmem>>, vector<1x2x128xf32>
    %7 = vector.shape_cast %6 : vector<1x2x128xf32> to vector<2x128xf32>
    %cst_10 = arith.constant dense<0.000000e+00> : vector<64x128xf32>
    %8 = tpu.matmul %5, %7, %cst_10 {dimension_numbers = #tpu.dot_dimension_numbers<[1], [0], [0], [1], [0, 0, 1, 1], [], []>} : vector<64x2xf32>, vector<2x128xf32>, vector<64x128xf32> -> vector<64x128xf32>
    %c0_11 = arith.constant 0 : index
    %c1 = arith.constant 1 : index
    %c0_12 = arith.constant 0 : index
    %9 = vector.load %arg1[%c0_11, %c1, %c0_12] : memref<1x67x2xf32, #tpu.memory_space<vmem>>, vector<1x64x2xf32>
    %10 = vector.shape_cast %9 : vector<1x64x2xf32> to vector<64x2xf32>
    %c1_13 = arith.constant 1 : index
    %c0_14 = arith.constant 0 : index
    %c0_15 = arith.constant 0 : index
    %11 = vector.load %arg3[%c1_13, %c0_14, %c0_15] : memref<4x2x128xf32, #tpu.memory_space<vmem>>, vector<1x2x128xf32>
    %12 = vector.shape_cast %11 : vector<1x2x128xf32> to vector<2x128xf32>
    %cst_16 = arith.constant dense<0.000000e+00> : vector<64x128xf32>
    %13 = tpu.matmul %10, %12, %cst_16 {dimension_numbers = #tpu.dot_dimension_numbers<[1], [0], [0], [1], [0, 0, 1, 1], [], []>} : vector<64x2xf32>, vector<2x128xf32>, vector<64x128xf32> -> vector<64x128xf32>
    %14 = arith.addf %8, %13 : vector<64x128xf32>
    %c0_17 = arith.constant 0 : index
    %c2 = arith.constant 2 : index
    %c0_18 = arith.constant 0 : index
    %15 = vector.load %arg1[%c0_17, %c2, %c0_18] : memref<1x67x2xf32, #tpu.memory_space<vmem>>, vector<1x64x2xf32>
    %16 = vector.shape_cast %15 : vector<1x64x2xf32> to vector<64x2xf32>
    %c2_19 = arith.constant 2 : index
    %c0_20 = arith.constant 0 : index
    %c0_21 = arith.constant 0 : index
    %17 = vector.load %arg3[%c2_19, %c0_20, %c0_21] : memref<4x2x128xf32, #tpu.memory_space<vmem>>, vector<1x2x128xf32>
    %18 = vector.shape_cast %17 : vector<1x2x128xf32> to vector<2x128xf32>
    %cst_22 = arith.constant dense<0.000000e+00> : vector<64x128xf32>
    %19 = tpu.matmul %16, %18, %cst_22 {dimension_numbers = #tpu.dot_dimension_numbers<[1], [0], [0], [1], [0, 0, 1, 1], [], []>} : vector<64x2xf32>, vector<2x128xf32>, vector<64x128xf32> -> vector<64x128xf32>
    %20 = arith.addf %14, %19 : vector<64x128xf32>
    %c0_23 = arith.constant 0 : index
    %c3 = arith.constant 3 : index
    %c0_24 = arith.constant 0 : index
    %21 = vector.load %arg1[%c0_23, %c3, %c0_24] : memref<1x67x2xf32, #tpu.memory_space<vmem>>, vector<1x64x2xf32>
    %22 = vector.shape_cast %21 : vector<1x64x2xf32> to vector<64x2xf32>
    %c3_25 = arith.constant 3 : index
    %c0_26 = arith.constant 0 : index
    %c0_27 = arith.constant 0 : index
    %23 = vector.load %arg3[%c3_25, %c0_26, %c0_27] : memref<4x2x128xf32, #tpu.memory_space<vmem>>, vector<1x2x128xf32>
    %24 = vector.shape_cast %23 : vector<1x2x128xf32> to vector<2x128xf32>
    %cst_28 = arith.constant dense<0.000000e+00> : vector<64x128xf32>
    %25 = tpu.matmul %22, %24, %cst_28 {dimension_numbers = #tpu.dot_dimension_numbers<[1], [0], [0], [1], [0, 0, 1, 1], [], []>} : vector<64x2xf32>, vector<2x128xf32>, vector<64x128xf32> -> vector<64x128xf32>
    %26 = arith.addf %20, %25 : vector<64x128xf32>
    %c0_29 = arith.constant 0 : index
    %c0_30 = arith.constant 0 : index
    %27 = vector.load %arg5[%c0_29, %c0_30] : memref<4x128xf32, #tpu.memory_space<vmem>>, vector<1x128xf32>
    %28 = vector.broadcast %27 : vector<1x128xf32> to vector<64x128xf32>
    %29 = arith.addf %26, %28 : vector<64x128xf32>
    %cst_31 = arith.constant 0.000000e+00 : f32
    %30 = vector.broadcast %cst_31 : f32 to vector<64x128xf32>
    %31 = arith.maximumf %29, %30 : vector<64x128xf32>
    %c0_32 = arith.constant 0 : index
    %c0_33 = arith.constant 0 : index
    %32 = vector.load %arg10[%c0_32, %c0_33] : memref<64x128xf32, #tpu.memory_space<vmem>>, vector<64x128xf32>
    tpu.vector_store %arg10[%c0_32, %c0_33], %31 {strides = array<i32>} : memref<64x128xf32, #tpu.memory_space<vmem>>, vector<64x128xf32>,
    %c0_34 = arith.constant 0 : index
    %c0_35 = arith.constant 0 : index
    %33 = tpu.strided_load %arg10[%c0_34, %c0_35] {strides = array<i32: 2, 1>} : memref<64x128xf32, #tpu.memory_space<vmem>>, vector<32x128xf32>
    %c1_36 = arith.constant 1 : index
    %c0_37 = arith.constant 0 : index
    %34 = tpu.strided_load %arg10[%c1_36, %c0_37] {strides = array<i32: 2, 1>} : memref<64x128xf32, #tpu.memory_space<vmem>>, vector<32x128xf32>
    %35 = arith.maximumf %33, %34 : vector<32x128xf32>
    %c1_38 = arith.constant 1 : index
    %c0_39 = arith.constant 0 : index
    %36 = vector.load %arg11[%c1_38, %c0_39] : memref<40x128xf32, #tpu.memory_space<vmem>>, vector<32x128xf32>
    tpu.vector_store %arg11[%c1_38, %c0_39], %35 {strides = array<i32>} : memref<40x128xf32, #tpu.memory_space<vmem>>, vector<32x128xf32>,
    %c0_40 = arith.constant 0 : index
    %c0_41 = arith.constant 0 : index
    %37 = vector.load %arg11[%c0_40, %c0_41] : memref<40x128xf32, #tpu.memory_space<vmem>>, vector<32x128xf32>
    %c0_42 = arith.constant 0 : index
    %c0_43 = arith.constant 0 : index
    %c0_44 = arith.constant 0 : index
    %c0_45 = arith.constant 0 : index
    %38 = vector.load %arg4[%c0_42, %c0_43, %c0_44, %c0_45] : memref<3x4x128x128xf32, #tpu.memory_space<vmem>>, vector<1x1x128x128xf32>
    %39 = vector.shape_cast %38 : vector<1x1x128x128xf32> to vector<128x128xf32>
    %cst_46 = arith.constant dense<0.000000e+00> : vector<32x128xf32>
    %40 = tpu.matmul %37, %39, %cst_46 {dimension_numbers = #tpu.dot_dimension_numbers<[1], [0], [0], [1], [0, 0, 1, 1], [], []>} : vector<32x128xf32>, vector<128x128xf32>, vector<32x128xf32> -> vector<32x128xf32>
    %c1_47 = arith.constant 1 : index
    %c0_48 = arith.constant 0 : index
    %41 = vector.load %arg11[%c1_47, %c0_48] : memref<40x128xf32, #tpu.memory_space<vmem>>, vector<32x128xf32>
    %c0_49 = arith.constant 0 : index
    %c1_50 = arith.constant 1 : index
    %c0_51 = arith.constant 0 : index
    %c0_52 = arith.constant 0 : index
    %42 = vector.load %arg4[%c0_49, %c1_50, %c0_51, %c0_52] : memref<3x4x128x128xf32, #tpu.memory_space<vmem>>, vector<1x1x128x128xf32>
    %43 = vector.shape_cast %42 : vector<1x1x128x128xf32> to vector<128x128xf32>
    %cst_53 = arith.constant dense<0.000000e+00> : vector<32x128xf32>
    %44 = tpu.matmul %41, %43, %cst_53 {dimension_numbers = #tpu.dot_dimension_numbers<[1], [0], [0], [1], [0, 0, 1, 1], [], []>} : vector<32x128xf32>, vector<128x128xf32>, vector<32x128xf32> -> vector<32x128xf32>
    %45 = arith.addf %40, %44 : vector<32x128xf32>
    %c2_54 = arith.constant 2 : index
    %c0_55 = arith.constant 0 : index
    %46 = vector.load %arg11[%c2_54, %c0_55] : memref<40x128xf32, #tpu.memory_space<vmem>>, vector<32x128xf32>
    %c0_56 = arith.constant 0 : index
    %c2_57 = arith.constant 2 : index
    %c0_58 = arith.constant 0 : index
    %c0_59 = arith.constant 0 : index
    %47 = vector.load %arg4[%c0_56, %c2_57, %c0_58, %c0_59] : memref<3x4x128x128xf32, #tpu.memory_space<vmem>>, vector<1x1x128x128xf32>
    %48 = vector.shape_cast %47 : vector<1x1x128x128xf32> to vector<128x128xf32>
    %cst_60 = arith.constant dense<0.000000e+00> : vector<32x128xf32>
    %49 = tpu.matmul %46, %48, %cst_60 {dimension_numbers = #tpu.dot_dimension_numbers<[1], [0], [0], [1], [0, 0, 1, 1], [], []>} : vector<32x128xf32>, vector<128x128xf32>, vector<32x128xf32> -> vector<32x128xf32>
    %50 = arith.addf %45, %49 : vector<32x128xf32>
    %c3_61 = arith.constant 3 : index
    %c0_62 = arith.constant 0 : index
    %51 = vector.load %arg11[%c3_61, %c0_62] : memref<40x128xf32, #tpu.memory_space<vmem>>, vector<32x128xf32>
    %c0_63 = arith.constant 0 : index
    %c3_64 = arith.constant 3 : index
    %c0_65 = arith.constant 0 : index
    %c0_66 = arith.constant 0 : index
    %52 = vector.load %arg4[%c0_63, %c3_64, %c0_65, %c0_66] : memref<3x4x128x128xf32, #tpu.memory_space<vmem>>, vector<1x1x128x128xf32>
    %53 = vector.shape_cast %52 : vector<1x1x128x128xf32> to vector<128x128xf32>
    %cst_67 = arith.constant dense<0.000000e+00> : vector<32x128xf32>
    %54 = tpu.matmul %51, %53, %cst_67 {dimension_numbers = #tpu.dot_dimension_numbers<[1], [0], [0], [1], [0, 0, 1, 1], [], []>} : vector<32x128xf32>, vector<128x128xf32>, vector<32x128xf32> -> vector<32x128xf32>
    %55 = arith.addf %50, %54 : vector<32x128xf32>
    %c1_68 = arith.constant 1 : index
    %c0_69 = arith.constant 0 : index
    %56 = vector.load %arg5[%c1_68, %c0_69] : memref<4x128xf32, #tpu.memory_space<vmem>>, vector<1x128xf32>
    %57 = vector.broadcast %56 : vector<1x128xf32> to vector<32x128xf32>
    %58 = arith.addf %55, %57 : vector<32x128xf32>
    %cst_70 = arith.constant 0.000000e+00 : f32
    %59 = vector.broadcast %cst_70 : f32 to vector<32x128xf32>
    %60 = arith.maximumf %58, %59 : vector<32x128xf32>
    %c1_71 = arith.constant 1 : index
    %c0_72 = arith.constant 0 : index
    %61 = vector.load %arg12[%c1_71, %c0_72] : memref<40x128xf32, #tpu.memory_space<vmem>>, vector<32x128xf32>
    tpu.vector_store %arg12[%c1_71, %c0_72], %60 {strides = array<i32>} : memref<40x128xf32, #tpu.memory_space<vmem>>, vector<32x128xf32>,
    %c0_73 = arith.constant 0 : index
    %c0_74 = arith.constant 0 : index
    %62 = vector.load %arg12[%c0_73, %c0_74] : memref<40x128xf32, #tpu.memory_space<vmem>>, vector<32x128xf32>
    %c1_75 = arith.constant 1 : index
    %c0_76 = arith.constant 0 : index
    %c0_77 = arith.constant 0 : index
    %c0_78 = arith.constant 0 : index
    %63 = vector.load %arg4[%c1_75, %c0_76, %c0_77, %c0_78] : memref<3x4x128x128xf32, #tpu.memory_space<vmem>>, vector<1x1x128x128xf32>
    %64 = vector.shape_cast %63 : vector<1x1x128x128xf32> to vector<128x128xf32>
    %cst_79 = arith.constant dense<0.000000e+00> : vector<32x128xf32>
    %65 = tpu.matmul %62, %64, %cst_79 {dimension_numbers = #tpu.dot_dimension_numbers<[1], [0], [0], [1], [0, 0, 1, 1], [], []>} : vector<32x128xf32>, vector<128x128xf32>, vector<32x128xf32> -> vector<32x128xf32>
    %c1_80 = arith.constant 1 : index
    %c0_81 = arith.constant 0 : index
    %66 = vector.load %arg12[%c1_80, %c0_81] : memref<40x128xf32, #tpu.memory_space<vmem>>, vector<32x128xf32>
    %c1_82 = arith.constant 1 : index
    %c1_83 = arith.constant 1 : index
    %c0_84 = arith.constant 0 : index
    %c0_85 = arith.constant 0 : index
    %67 = vector.load %arg4[%c1_82, %c1_83, %c0_84, %c0_85] : memref<3x4x128x128xf32, #tpu.memory_space<vmem>>, vector<1x1x128x128xf32>
    %68 = vector.shape_cast %67 : vector<1x1x128x128xf32> to vector<128x128xf32>
    %cst_86 = arith.constant dense<0.000000e+00> : vector<32x128xf32>
    %69 = tpu.matmul %66, %68, %cst_86 {dimension_numbers = #tpu.dot_dimension_numbers<[1], [0], [0], [1], [0, 0, 1, 1], [], []>} : vector<32x128xf32>, vector<128x128xf32>, vector<32x128xf32> -> vector<32x128xf32>
    %70 = arith.addf %65, %69 : vector<32x128xf32>
    %c2_87 = arith.constant 2 : index
    %c0_88 = arith.constant 0 : index
    %71 = vector.load %arg12[%c2_87, %c0_88] : memref<40x128xf32, #tpu.memory_space<vmem>>, vector<32x128xf32>
    %c1_89 = arith.constant 1 : index
    %c2_90 = arith.constant 2 : index
    %c0_91 = arith.constant 0 : index
    %c0_92 = arith.constant 0 : index
    %72 = vector.load %arg4[%c1_89, %c2_90, %c0_91, %c0_92] : memref<3x4x128x128xf32, #tpu.memory_space<vmem>>, vector<1x1x128x128xf32>
    %73 = vector.shape_cast %72 : vector<1x1x128x128xf32> to vector<128x128xf32>
    %cst_93 = arith.constant dense<0.000000e+00> : vector<32x128xf32>
    %74 = tpu.matmul %71, %73, %cst_93 {dimension_numbers = #tpu.dot_dimension_numbers<[1], [0], [0], [1], [0, 0, 1, 1], [], []>} : vector<32x128xf32>, vector<128x128xf32>, vector<32x128xf32> -> vector<32x128xf32>
    %75 = arith.addf %70, %74 : vector<32x128xf32>
    %c3_94 = arith.constant 3 : index
    %c0_95 = arith.constant 0 : index
    %76 = vector.load %arg12[%c3_94, %c0_95] : memref<40x128xf32, #tpu.memory_space<vmem>>, vector<32x128xf32>
    %c1_96 = arith.constant 1 : index
    %c3_97 = arith.constant 3 : index
    %c0_98 = arith.constant 0 : index
    %c0_99 = arith.constant 0 : index
    %77 = vector.load %arg4[%c1_96, %c3_97, %c0_98, %c0_99] : memref<3x4x128x128xf32, #tpu.memory_space<vmem>>, vector<1x1x128x128xf32>
    %78 = vector.shape_cast %77 : vector<1x1x128x128xf32> to vector<128x128xf32>
    %cst_100 = arith.constant dense<0.000000e+00> : vector<32x128xf32>
    %79 = tpu.matmul %76, %78, %cst_100 {dimension_numbers = #tpu.dot_dimension_numbers<[1], [0], [0], [1], [0, 0, 1, 1], [], []>} : vector<32x128xf32>, vector<128x128xf32>, vector<32x128xf32> -> vector<32x128xf32>
    %80 = arith.addf %75, %79 : vector<32x128xf32>
    %c2_101 = arith.constant 2 : index
    %c0_102 = arith.constant 0 : index
    %81 = vector.load %arg5[%c2_101, %c0_102] : memref<4x128xf32, #tpu.memory_space<vmem>>, vector<1x128xf32>
    %82 = vector.broadcast %81 : vector<1x128xf32> to vector<32x128xf32>
    %83 = arith.addf %80, %82 : vector<32x128xf32>
    %cst_103 = arith.constant 0.000000e+00 : f32
    %84 = vector.broadcast %cst_103 : f32 to vector<32x128xf32>
    %85 = arith.maximumf %83, %84 : vector<32x128xf32>
    %c1_104 = arith.constant 1 : index
    %c0_105 = arith.constant 0 : index
    %86 = vector.load %arg11[%c1_104, %c0_105] : memref<40x128xf32, #tpu.memory_space<vmem>>, vector<32x128xf32>
    tpu.vector_store %arg11[%c1_104, %c0_105], %85 {strides = array<i32>} : memref<40x128xf32, #tpu.memory_space<vmem>>, vector<32x128xf32>,
    %c0_106 = arith.constant 0 : index
    %c0_107 = arith.constant 0 : index
    %87 = vector.load %arg11[%c0_106, %c0_107] : memref<40x128xf32, #tpu.memory_space<vmem>>, vector<32x128xf32>
    %c2_108 = arith.constant 2 : index
    %c0_109 = arith.constant 0 : index
    %c0_110 = arith.constant 0 : index
    %c0_111 = arith.constant 0 : index
    %88 = vector.load %arg4[%c2_108, %c0_109, %c0_110, %c0_111] : memref<3x4x128x128xf32, #tpu.memory_space<vmem>>, vector<1x1x128x128xf32>
    %89 = vector.shape_cast %88 : vector<1x1x128x128xf32> to vector<128x128xf32>
    %cst_112 = arith.constant dense<0.000000e+00> : vector<32x128xf32>
    %90 = tpu.matmul %87, %89, %cst_112 {dimension_numbers = #tpu.dot_dimension_numbers<[1], [0], [0], [1], [0, 0, 1, 1], [], []>} : vector<32x128xf32>, vector<128x128xf32>, vector<32x128xf32> -> vector<32x128xf32>
    %c1_113 = arith.constant 1 : index
    %c0_114 = arith.constant 0 : index
    %91 = vector.load %arg11[%c1_113, %c0_114] : memref<40x128xf32, #tpu.memory_space<vmem>>, vector<32x128xf32>
    %c2_115 = arith.constant 2 : index
    %c1_116 = arith.constant 1 : index
    %c0_117 = arith.constant 0 : index
    %c0_118 = arith.constant 0 : index
    %92 = vector.load %arg4[%c2_115, %c1_116, %c0_117, %c0_118] : memref<3x4x128x128xf32, #tpu.memory_space<vmem>>, vector<1x1x128x128xf32>
    %93 = vector.shape_cast %92 : vector<1x1x128x128xf32> to vector<128x128xf32>
    %cst_119 = arith.constant dense<0.000000e+00> : vector<32x128xf32>
    %94 = tpu.matmul %91, %93, %cst_119 {dimension_numbers = #tpu.dot_dimension_numbers<[1], [0], [0], [1], [0, 0, 1, 1], [], []>} : vector<32x128xf32>, vector<128x128xf32>, vector<32x128xf32> -> vector<32x128xf32>
    %95 = arith.addf %90, %94 : vector<32x128xf32>
    %c2_120 = arith.constant 2 : index
    %c0_121 = arith.constant 0 : index
    %96 = vector.load %arg11[%c2_120, %c0_121] : memref<40x128xf32, #tpu.memory_space<vmem>>, vector<32x128xf32>
    %c2_122 = arith.constant 2 : index
    %c2_123 = arith.constant 2 : index
    %c0_124 = arith.constant 0 : index
    %c0_125 = arith.constant 0 : index
    %97 = vector.load %arg4[%c2_122, %c2_123, %c0_124, %c0_125] : memref<3x4x128x128xf32, #tpu.memory_space<vmem>>, vector<1x1x128x128xf32>
    %98 = vector.shape_cast %97 : vector<1x1x128x128xf32> to vector<128x128xf32>
    %cst_126 = arith.constant dense<0.000000e+00> : vector<32x128xf32>
    %99 = tpu.matmul %96, %98, %cst_126 {dimension_numbers = #tpu.dot_dimension_numbers<[1], [0], [0], [1], [0, 0, 1, 1], [], []>} : vector<32x128xf32>, vector<128x128xf32>, vector<32x128xf32> -> vector<32x128xf32>
    %100 = arith.addf %95, %99 : vector<32x128xf32>
    %c3_127 = arith.constant 3 : index
    %c0_128 = arith.constant 0 : index
    %101 = vector.load %arg11[%c3_127, %c0_128] : memref<40x128xf32, #tpu.memory_space<vmem>>, vector<32x128xf32>
    %c2_129 = arith.constant 2 : index
    %c3_130 = arith.constant 3 : index
    %c0_131 = arith.constant 0 : index
    %c0_132 = arith.constant 0 : index
    %102 = vector.load %arg4[%c2_129, %c3_130, %c0_131, %c0_132] : memref<3x4x128x128xf32, #tpu.memory_space<vmem>>, vector<1x1x128x128xf32>
    %103 = vector.shape_cast %102 : vector<1x1x128x128xf32> to vector<128x128xf32>
    %cst_133 = arith.constant dense<0.000000e+00> : vector<32x128xf32>
    %104 = tpu.matmul %101, %103, %cst_133 {dimension_numbers = #tpu.dot_dimension_numbers<[1], [0], [0], [1], [0, 0, 1, 1], [], []>} : vector<32x128xf32>, vector<128x128xf32>, vector<32x128xf32> -> vector<32x128xf32>
    %105 = arith.addf %100, %104 : vector<32x128xf32>
    %c3_134 = arith.constant 3 : index
    %c0_135 = arith.constant 0 : index
    %106 = vector.load %arg5[%c3_134, %c0_135] : memref<4x128xf32, #tpu.memory_space<vmem>>, vector<1x128xf32>
    %107 = vector.broadcast %106 : vector<1x128xf32> to vector<32x128xf32>
    %108 = arith.addf %105, %107 : vector<32x128xf32>
    %cst_136 = arith.constant 0.000000e+00 : f32
    %109 = vector.broadcast %cst_136 : f32 to vector<32x128xf32>
    %110 = arith.maximumf %108, %109 : vector<32x128xf32>
    %c0_137 = arith.constant 0 : index
    %c0_138 = arith.constant 0 : index
    %111 = vector.load %arg10[%c0_137, %c0_138] : memref<64x128xf32, #tpu.memory_space<vmem>>, vector<32x128xf32>
    tpu.vector_store %arg10[%c0_137, %c0_138], %110 {strides = array<i32>} : memref<64x128xf32, #tpu.memory_space<vmem>>, vector<32x128xf32>,
    %c0_139 = arith.constant 0 : index
    %c0_140 = arith.constant 0 : index
    %112 = tpu.strided_load %arg10[%c0_139, %c0_140] {strides = array<i32: 2, 1>} : memref<64x128xf32, #tpu.memory_space<vmem>>, vector<16x128xf32>
    %c1_141 = arith.constant 1 : index
    %c0_142 = arith.constant 0 : index
    %113 = tpu.strided_load %arg10[%c1_141, %c0_142] {strides = array<i32: 2, 1>} : memref<64x128xf32, #tpu.memory_space<vmem>>, vector<16x128xf32>
    %114 = arith.maximumf %112, %113 : vector<16x128xf32>
    %c0_143 = arith.constant 0 : index
    %c0_144 = arith.constant 0 : index
    %c0_145 = arith.constant 0 : index
    %115 = vector.load %arg9[%c0_143, %c0_144, %c0_145] : memref<1x24x128xf32, #tpu.memory_space<vmem>>, vector<1x16x128xf32>
    %116 = vector.shape_cast %115 : vector<1x16x128xf32> to vector<16x128xf32>
    %117 = vector.shape_cast %114 : vector<16x128xf32> to vector<1x16x128xf32>
    tpu.vector_store %arg9[%c0_143, %c0_144, %c0_145], %117 {strides = array<i32>} : memref<1x24x128xf32, #tpu.memory_space<vmem>>, vector<1x16x128xf32>,
    %cst_146 = arith.constant 0.000000e+00 : f32
    %118 = vector.broadcast %cst_146 : f32 to vector<40x128xf32>
    %c0_147 = arith.constant 0 : index
    %c0_148 = arith.constant 0 : index
    %119 = vector.load %arg11[%c0_147, %c0_148] : memref<40x128xf32, #tpu.memory_space<vmem>>, vector<40x128xf32>
    tpu.vector_store %arg11[%c0_147, %c0_148], %118 {strides = array<i32>} : memref<40x128xf32, #tpu.memory_space<vmem>>, vector<40x128xf32>,
    %cst_149 = arith.constant 0.000000e+00 : f32
    %120 = vector.broadcast %cst_149 : f32 to vector<40x128xf32>
    %c0_150 = arith.constant 0 : index
    %c0_151 = arith.constant 0 : index
    %121 = vector.load %arg12[%c0_150, %c0_151] : memref<40x128xf32, #tpu.memory_space<vmem>>, vector<40x128xf32>
    tpu.vector_store %arg12[%c0_150, %c0_151], %120 {strides = array<i32>} : memref<40x128xf32, #tpu.memory_space<vmem>>, vector<40x128xf32>,
    %c0_152 = arith.constant 0 : index
    %c0_153 = arith.constant 0 : index
    %c0_154 = arith.constant 0 : index
    %122 = vector.load %arg2[%c0_152, %c0_153, %c0_154] : memref<1x35x4xf32, #tpu.memory_space<vmem>>, vector<1x32x4xf32>
    %123 = vector.shape_cast %122 : vector<1x32x4xf32> to vector<32x4xf32>
    %c0_155 = arith.constant 0 : index
    %c0_156 = arith.constant 0 : index
    %c0_157 = arith.constant 0 : index
    %124 = vector.load %arg6[%c0_155, %c0_156, %c0_157] : memref<4x4x128xf32, #tpu.memory_space<vmem>>, vector<1x4x128xf32>
    %125 = vector.shape_cast %124 : vector<1x4x128xf32> to vector<4x128xf32>
    %cst_158 = arith.constant dense<0.000000e+00> : vector<32x128xf32>
    %126 = tpu.matmul %123, %125, %cst_158 {dimension_numbers = #tpu.dot_dimension_numbers<[1], [0], [0], [1], [0, 0, 1, 1], [], []>} : vector<32x4xf32>, vector<4x128xf32>, vector<32x128xf32> -> vector<32x128xf32>
    %c0_159 = arith.constant 0 : index
    %c1_160 = arith.constant 1 : index
    %c0_161 = arith.constant 0 : index
    %127 = vector.load %arg2[%c0_159, %c1_160, %c0_161] : memref<1x35x4xf32, #tpu.memory_space<vmem>>, vector<1x32x4xf32>
    %128 = vector.shape_cast %127 : vector<1x32x4xf32> to vector<32x4xf32>
    %c1_162 = arith.constant 1 : index
    %c0_163 = arith.constant 0 : index
    %c0_164 = arith.constant 0 : index
    %129 = vector.load %arg6[%c1_162, %c0_163, %c0_164] : memref<4x4x128xf32, #tpu.memory_space<vmem>>, vector<1x4x128xf32>
    %130 = vector.shape_cast %129 : vector<1x4x128xf32> to vector<4x128xf32>
    %cst_165 = arith.constant dense<0.000000e+00> : vector<32x128xf32>
    %131 = tpu.matmul %128, %130, %cst_165 {dimension_numbers = #tpu.dot_dimension_numbers<[1], [0], [0], [1], [0, 0, 1, 1], [], []>} : vector<32x4xf32>, vector<4x128xf32>, vector<32x128xf32> -> vector<32x128xf32>
    %132 = arith.addf %126, %131 : vector<32x128xf32>
    %c0_166 = arith.constant 0 : index
    %c2_167 = arith.constant 2 : index
    %c0_168 = arith.constant 0 : index
    %133 = vector.load %arg2[%c0_166, %c2_167, %c0_168] : memref<1x35x4xf32, #tpu.memory_space<vmem>>, vector<1x32x4xf32>
    %134 = vector.shape_cast %133 : vector<1x32x4xf32> to vector<32x4xf32>
    %c2_169 = arith.constant 2 : index
    %c0_170 = arith.constant 0 : index
    %c0_171 = arith.constant 0 : index
    %135 = vector.load %arg6[%c2_169, %c0_170, %c0_171] : memref<4x4x128xf32, #tpu.memory_space<vmem>>, vector<1x4x128xf32>
    %136 = vector.shape_cast %135 : vector<1x4x128xf32> to vector<4x128xf32>
    %cst_172 = arith.constant dense<0.000000e+00> : vector<32x128xf32>
    %137 = tpu.matmul %134, %136, %cst_172 {dimension_numbers = #tpu.dot_dimension_numbers<[1], [0], [0], [1], [0, 0, 1, 1], [], []>} : vector<32x4xf32>, vector<4x128xf32>, vector<32x128xf32> -> vector<32x128xf32>
    %138 = arith.addf %132, %137 : vector<32x128xf32>
    %c0_173 = arith.constant 0 : index
    %c3_174 = arith.constant 3 : index
    %c0_175 = arith.constant 0 : index
    %139 = vector.load %arg2[%c0_173, %c3_174, %c0_175] : memref<1x35x4xf32, #tpu.memory_space<vmem>>, vector<1x32x4xf32>
    %140 = vector.shape_cast %139 : vector<1x32x4xf32> to vector<32x4xf32>
    %c3_176 = arith.constant 3 : index
    %c0_177 = arith.constant 0 : index
    %c0_178 = arith.constant 0 : index
    %141 = vector.load %arg6[%c3_176, %c0_177, %c0_178] : memref<4x4x128xf32, #tpu.memory_space<vmem>>, vector<1x4x128xf32>
    %142 = vector.shape_cast %141 : vector<1x4x128xf32> to vector<4x128xf32>
    %cst_179 = arith.constant dense<0.000000e+00> : vector<32x128xf32>
    %143 = tpu.matmul %140, %142, %cst_179 {dimension_numbers = #tpu.dot_dimension_numbers<[1], [0], [0], [1], [0, 0, 1, 1], [], []>} : vector<32x4xf32>, vector<4x128xf32>, vector<32x128xf32> -> vector<32x128xf32>
    %144 = arith.addf %138, %143 : vector<32x128xf32>
    %c0_180 = arith.constant 0 : index
    %c0_181 = arith.constant 0 : index
    %145 = vector.load %arg8[%c0_180, %c0_181] : memref<4x128xf32, #tpu.memory_space<vmem>>, vector<1x128xf32>
    %146 = vector.broadcast %145 : vector<1x128xf32> to vector<32x128xf32>
    %147 = arith.addf %144, %146 : vector<32x128xf32>
    %cst_182 = arith.constant 0.000000e+00 : f32
    %148 = vector.broadcast %cst_182 : f32 to vector<32x128xf32>
    %149 = arith.maximumf %147, %148 : vector<32x128xf32>
    %c0_183 = arith.constant 0 : index
    %c0_184 = arith.constant 0 : index
    %150 = vector.load %arg10[%c0_183, %c0_184] : memref<64x128xf32, #tpu.memory_space<vmem>>, vector<32x128xf32>
    tpu.vector_store %arg10[%c0_183, %c0_184], %149 {strides = array<i32>} : memref<64x128xf32, #tpu.memory_space<vmem>>, vector<32x128xf32>,
    %c0_185 = arith.constant 0 : index
    %c0_186 = arith.constant 0 : index
    %151 = tpu.strided_load %arg10[%c0_185, %c0_186] {strides = array<i32: 2, 1>} : memref<64x128xf32, #tpu.memory_space<vmem>>, vector<16x128xf32>
    %c1_187 = arith.constant 1 : index
    %c0_188 = arith.constant 0 : index
    %152 = tpu.strided_load %arg10[%c1_187, %c0_188] {strides = array<i32: 2, 1>} : memref<64x128xf32, #tpu.memory_space<vmem>>, vector<16x128xf32>
    %153 = arith.maximumf %151, %152 : vector<16x128xf32>
    %c1_189 = arith.constant 1 : index
    %c0_190 = arith.constant 0 : index
    %154 = vector.load %arg11[%c1_189, %c0_190] : memref<40x128xf32, #tpu.memory_space<vmem>>, vector<16x128xf32>
    tpu.vector_store %arg11[%c1_189, %c0_190], %153 {strides = array<i32>} : memref<40x128xf32, #tpu.memory_space<vmem>>, vector<16x128xf32>,
    %c0_191 = arith.constant 0 : index
    %c0_192 = arith.constant 0 : index
    %155 = vector.load %arg11[%c0_191, %c0_192] : memref<40x128xf32, #tpu.memory_space<vmem>>, vector<16x128xf32>
    %c0_193 = arith.constant 0 : index
    %c0_194 = arith.constant 0 : index
    %c0_195 = arith.constant 0 : index
    %c0_196 = arith.constant 0 : index
    %156 = vector.load %arg7[%c0_193, %c0_194, %c0_195, %c0_196] : memref<3x4x128x128xf32, #tpu.memory_space<vmem>>, vector<1x1x128x128xf32>
    %157 = vector.shape_cast %156 : vector<1x1x128x128xf32> to vector<128x128xf32>
    %cst_197 = arith.constant dense<0.000000e+00> : vector<16x128xf32>
    %158 = tpu.matmul %155, %157, %cst_197 {dimension_numbers = #tpu.dot_dimension_numbers<[1], [0], [0], [1], [0, 0, 1, 1], [], []>} : vector<16x128xf32>, vector<128x128xf32>, vector<16x128xf32> -> vector<16x128xf32>
    %c1_198 = arith.constant 1 : index
    %c0_199 = arith.constant 0 : index
    %159 = vector.load %arg11[%c1_198, %c0_199] : memref<40x128xf32, #tpu.memory_space<vmem>>, vector<16x128xf32>
    %c0_200 = arith.constant 0 : index
    %c1_201 = arith.constant 1 : index
    %c0_202 = arith.constant 0 : index
    %c0_203 = arith.constant 0 : index
    %160 = vector.load %arg7[%c0_200, %c1_201, %c0_202, %c0_203] : memref<3x4x128x128xf32, #tpu.memory_space<vmem>>, vector<1x1x128x128xf32>
    %161 = vector.shape_cast %160 : vector<1x1x128x128xf32> to vector<128x128xf32>
    %cst_204 = arith.constant dense<0.000000e+00> : vector<16x128xf32>
    %162 = tpu.matmul %159, %161, %cst_204 {dimension_numbers = #tpu.dot_dimension_numbers<[1], [0], [0], [1], [0, 0, 1, 1], [], []>} : vector<16x128xf32>, vector<128x128xf32>, vector<16x128xf32> -> vector<16x128xf32>
    %163 = arith.addf %158, %162 : vector<16x128xf32>
    %c2_205 = arith.constant 2 : index
    %c0_206 = arith.constant 0 : index
    %164 = vector.load %arg11[%c2_205, %c0_206] : memref<40x128xf32, #tpu.memory_space<vmem>>, vector<16x128xf32>
    %c0_207 = arith.constant 0 : index
    %c2_208 = arith.constant 2 : index
    %c0_209 = arith.constant 0 : index
    %c0_210 = arith.constant 0 : index
    %165 = vector.load %arg7[%c0_207, %c2_208, %c0_209, %c0_210] : memref<3x4x128x128xf32, #tpu.memory_space<vmem>>, vector<1x1x128x128xf32>
    %166 = vector.shape_cast %165 : vector<1x1x128x128xf32> to vector<128x128xf32>
    %cst_211 = arith.constant dense<0.000000e+00> : vector<16x128xf32>
    %167 = tpu.matmul %164, %166, %cst_211 {dimension_numbers = #tpu.dot_dimension_numbers<[1], [0], [0], [1], [0, 0, 1, 1], [], []>} : vector<16x128xf32>, vector<128x128xf32>, vector<16x128xf32> -> vector<16x128xf32>
    %168 = arith.addf %163, %167 : vector<16x128xf32>
    %c3_212 = arith.constant 3 : index
    %c0_213 = arith.constant 0 : index
    %169 = vector.load %arg11[%c3_212, %c0_213] : memref<40x128xf32, #tpu.memory_space<vmem>>, vector<16x128xf32>
    %c0_214 = arith.constant 0 : index
    %c3_215 = arith.constant 3 : index
    %c0_216 = arith.constant 0 : index
    %c0_217 = arith.constant 0 : index
    %170 = vector.load %arg7[%c0_214, %c3_215, %c0_216, %c0_217] : memref<3x4x128x128xf32, #tpu.memory_space<vmem>>, vector<1x1x128x128xf32>
    %171 = vector.shape_cast %170 : vector<1x1x128x128xf32> to vector<128x128xf32>
    %cst_218 = arith.constant dense<0.000000e+00> : vector<16x128xf32>
    %172 = tpu.matmul %169, %171, %cst_218 {dimension_numbers = #tpu.dot_dimension_numbers<[1], [0], [0], [1], [0, 0, 1, 1], [], []>} : vector<16x128xf32>, vector<128x128xf32>, vector<16x128xf32> -> vector<16x128xf32>
    %173 = arith.addf %168, %172 : vector<16x128xf32>
    %c1_219 = arith.constant 1 : index
    %c0_220 = arith.constant 0 : index
    %174 = vector.load %arg8[%c1_219, %c0_220] : memref<4x128xf32, #tpu.memory_space<vmem>>, vector<1x128xf32>
    %175 = vector.broadcast %174 : vector<1x128xf32> to vector<16x128xf32>
    %176 = arith.addf %173, %175 : vector<16x128xf32>
    %cst_221 = arith.constant 0.000000e+00 : f32
    %177 = vector.broadcast %cst_221 : f32 to vector<16x128xf32>
    %178 = arith.maximumf %176, %177 : vector<16x128xf32>
    %c1_222 = arith.constant 1 : index
    %c0_223 = arith.constant 0 : index
    %179 = vector.load %arg12[%c1_222, %c0_223] : memref<40x128xf32, #tpu.memory_space<vmem>>, vector<16x128xf32>
    tpu.vector_store %arg12[%c1_222, %c0_223], %178 {strides = array<i32>} : memref<40x128xf32, #tpu.memory_space<vmem>>, vector<16x128xf32>,
    %c0_224 = arith.constant 0 : index
    %c0_225 = arith.constant 0 : index
    %180 = vector.load %arg12[%c0_224, %c0_225] : memref<40x128xf32, #tpu.memory_space<vmem>>, vector<16x128xf32>
    %c1_226 = arith.constant 1 : index
    %c0_227 = arith.constant 0 : index
    %c0_228 = arith.constant 0 : index
    %c0_229 = arith.constant 0 : index
    %181 = vector.load %arg7[%c1_226, %c0_227, %c0_228, %c0_229] : memref<3x4x128x128xf32, #tpu.memory_space<vmem>>, vector<1x1x128x128xf32>
    %182 = vector.shape_cast %181 : vector<1x1x128x128xf32> to vector<128x128xf32>
    %cst_230 = arith.constant dense<0.000000e+00> : vector<16x128xf32>
    %183 = tpu.matmul %180, %182, %cst_230 {dimension_numbers = #tpu.dot_dimension_numbers<[1], [0], [0], [1], [0, 0, 1, 1], [], []>} : vector<16x128xf32>, vector<128x128xf32>, vector<16x128xf32> -> vector<16x128xf32>
    %c1_231 = arith.constant 1 : index
    %c0_232 = arith.constant 0 : index
    %184 = vector.load %arg12[%c1_231, %c0_232] : memref<40x128xf32, #tpu.memory_space<vmem>>, vector<16x128xf32>
    %c1_233 = arith.constant 1 : index
    %c1_234 = arith.constant 1 : index
    %c0_235 = arith.constant 0 : index
    %c0_236 = arith.constant 0 : index
    %185 = vector.load %arg7[%c1_233, %c1_234, %c0_235, %c0_236] : memref<3x4x128x128xf32, #tpu.memory_space<vmem>>, vector<1x1x128x128xf32>
    %186 = vector.shape_cast %185 : vector<1x1x128x128xf32> to vector<128x128xf32>
    %cst_237 = arith.constant dense<0.000000e+00> : vector<16x128xf32>
    %187 = tpu.matmul %184, %186, %cst_237 {dimension_numbers = #tpu.dot_dimension_numbers<[1], [0], [0], [1], [0, 0, 1, 1], [], []>} : vector<16x128xf32>, vector<128x128xf32>, vector<16x128xf32> -> vector<16x128xf32>
    %188 = arith.addf %183, %187 : vector<16x128xf32>
    %c2_238 = arith.constant 2 : index
    %c0_239 = arith.constant 0 : index
    %189 = vector.load %arg12[%c2_238, %c0_239] : memref<40x128xf32, #tpu.memory_space<vmem>>, vector<16x128xf32>
    %c1_240 = arith.constant 1 : index
    %c2_241 = arith.constant 2 : index
    %c0_242 = arith.constant 0 : index
    %c0_243 = arith.constant 0 : index
    %190 = vector.load %arg7[%c1_240, %c2_241, %c0_242, %c0_243] : memref<3x4x128x128xf32, #tpu.memory_space<vmem>>, vector<1x1x128x128xf32>
    %191 = vector.shape_cast %190 : vector<1x1x128x128xf32> to vector<128x128xf32>
    %cst_244 = arith.constant dense<0.000000e+00> : vector<16x128xf32>
    %192 = tpu.matmul %189, %191, %cst_244 {dimension_numbers = #tpu.dot_dimension_numbers<[1], [0], [0], [1], [0, 0, 1, 1], [], []>} : vector<16x128xf32>, vector<128x128xf32>, vector<16x128xf32> -> vector<16x128xf32>
    %193 = arith.addf %188, %192 : vector<16x128xf32>
    %c3_245 = arith.constant 3 : index
    %c0_246 = arith.constant 0 : index
    %194 = vector.load %arg12[%c3_245, %c0_246] : memref<40x128xf32, #tpu.memory_space<vmem>>, vector<16x128xf32>
    %c1_247 = arith.constant 1 : index
    %c3_248 = arith.constant 3 : index
    %c0_249 = arith.constant 0 : index
    %c0_250 = arith.constant 0 : index
    %195 = vector.load %arg7[%c1_247, %c3_248, %c0_249, %c0_250] : memref<3x4x128x128xf32, #tpu.memory_space<vmem>>, vector<1x1x128x128xf32>
    %196 = vector.shape_cast %195 : vector<1x1x128x128xf32> to vector<128x128xf32>
    %cst_251 = arith.constant dense<0.000000e+00> : vector<16x128xf32>
    %197 = tpu.matmul %194, %196, %cst_251 {dimension_numbers = #tpu.dot_dimension_numbers<[1], [0], [0], [1], [0, 0, 1, 1], [], []>} : vector<16x128xf32>, vector<128x128xf32>, vector<16x128xf32> -> vector<16x128xf32>
    %198 = arith.addf %193, %197 : vector<16x128xf32>
    %c2_252 = arith.constant 2 : index
    %c0_253 = arith.constant 0 : index
    %199 = vector.load %arg8[%c2_252, %c0_253] : memref<4x128xf32, #tpu.memory_space<vmem>>, vector<1x128xf32>
    %200 = vector.broadcast %199 : vector<1x128xf32> to vector<16x128xf32>
    %201 = arith.addf %198, %200 : vector<16x128xf32>
    %cst_254 = arith.constant 0.000000e+00 : f32
    %202 = vector.broadcast %cst_254 : f32 to vector<16x128xf32>
    %203 = arith.maximumf %201, %202 : vector<16x128xf32>
    %c1_255 = arith.constant 1 : index
    %c0_256 = arith.constant 0 : index
    %204 = vector.load %arg11[%c1_255, %c0_256] : memref<40x128xf32, #tpu.memory_space<vmem>>, vector<16x128xf32>
    tpu.vector_store %arg11[%c1_255, %c0_256], %203 {strides = array<i32>} : memref<40x128xf32, #tpu.memory_space<vmem>>, vector<16x128xf32>,
    %c0_257 = arith.constant 0 : index
    %c0_258 = arith.constant 0 : index
    %205 = vector.load %arg11[%c0_257, %c0_258] : memref<40x128xf32, #tpu.memory_space<vmem>>, vector<16x128xf32>
    %c2_259 = arith.constant 2 : index
    %c0_260 = arith.constant 0 : index
    %c0_261 = arith.constant 0 : index
    %c0_262 = arith.constant 0 : index
    %206 = vector.load %arg7[%c2_259, %c0_260, %c0_261, %c0_262] : memref<3x4x128x128xf32, #tpu.memory_space<vmem>>, vector<1x1x128x128xf32>
    %207 = vector.shape_cast %206 : vector<1x1x128x128xf32> to vector<128x128xf32>
    %cst_263 = arith.constant dense<0.000000e+00> : vector<16x128xf32>
    %208 = tpu.matmul %205, %207, %cst_263 {dimension_numbers = #tpu.dot_dimension_numbers<[1], [0], [0], [1], [0, 0, 1, 1], [], []>} : vector<16x128xf32>, vector<128x128xf32>, vector<16x128xf32> -> vector<16x128xf32>
    %c1_264 = arith.constant 1 : index
    %c0_265 = arith.constant 0 : index
    %209 = vector.load %arg11[%c1_264, %c0_265] : memref<40x128xf32, #tpu.memory_space<vmem>>, vector<16x128xf32>
    %c2_266 = arith.constant 2 : index
    %c1_267 = arith.constant 1 : index
    %c0_268 = arith.constant 0 : index
    %c0_269 = arith.constant 0 : index
    %210 = vector.load %arg7[%c2_266, %c1_267, %c0_268, %c0_269] : memref<3x4x128x128xf32, #tpu.memory_space<vmem>>, vector<1x1x128x128xf32>
    %211 = vector.shape_cast %210 : vector<1x1x128x128xf32> to vector<128x128xf32>
    %cst_270 = arith.constant dense<0.000000e+00> : vector<16x128xf32>
    %212 = tpu.matmul %209, %211, %cst_270 {dimension_numbers = #tpu.dot_dimension_numbers<[1], [0], [0], [1], [0, 0, 1, 1], [], []>} : vector<16x128xf32>, vector<128x128xf32>, vector<16x128xf32> -> vector<16x128xf32>
    %213 = arith.addf %208, %212 : vector<16x128xf32>
    %c2_271 = arith.constant 2 : index
    %c0_272 = arith.constant 0 : index
    %214 = vector.load %arg11[%c2_271, %c0_272] : memref<40x128xf32, #tpu.memory_space<vmem>>, vector<16x128xf32>
    %c2_273 = arith.constant 2 : index
    %c2_274 = arith.constant 2 : index
    %c0_275 = arith.constant 0 : index
    %c0_276 = arith.constant 0 : index
    %215 = vector.load %arg7[%c2_273, %c2_274, %c0_275, %c0_276] : memref<3x4x128x128xf32, #tpu.memory_space<vmem>>, vector<1x1x128x128xf32>
    %216 = vector.shape_cast %215 : vector<1x1x128x128xf32> to vector<128x128xf32>
    %cst_277 = arith.constant dense<0.000000e+00> : vector<16x128xf32>
    %217 = tpu.matmul %214, %216, %cst_277 {dimension_numbers = #tpu.dot_dimension_numbers<[1], [0], [0], [1], [0, 0, 1, 1], [], []>} : vector<16x128xf32>, vector<128x128xf32>, vector<16x128xf32> -> vector<16x128xf32>
    %218 = arith.addf %213, %217 : vector<16x128xf32>
    %c3_278 = arith.constant 3 : index
    %c0_279 = arith.constant 0 : index
    %219 = vector.load %arg11[%c3_278, %c0_279] : memref<40x128xf32, #tpu.memory_space<vmem>>, vector<16x128xf32>
    %c2_280 = arith.constant 2 : index
    %c3_281 = arith.constant 3 : index
    %c0_282 = arith.constant 0 : index
    %c0_283 = arith.constant 0 : index
    %220 = vector.load %arg7[%c2_280, %c3_281, %c0_282, %c0_283] : memref<3x4x128x128xf32, #tpu.memory_space<vmem>>, vector<1x1x128x128xf32>
    %221 = vector.shape_cast %220 : vector<1x1x128x128xf32> to vector<128x128xf32>
    %cst_284 = arith.constant dense<0.000000e+00> : vector<16x128xf32>
    %222 = tpu.matmul %219, %221, %cst_284 {dimension_numbers = #tpu.dot_dimension_numbers<[1], [0], [0], [1], [0, 0, 1, 1], [], []>} : vector<16x128xf32>, vector<128x128xf32>, vector<16x128xf32> -> vector<16x128xf32>
    %223 = arith.addf %218, %222 : vector<16x128xf32>
    %c3_285 = arith.constant 3 : index
    %c0_286 = arith.constant 0 : index
    %224 = vector.load %arg8[%c3_285, %c0_286] : memref<4x128xf32, #tpu.memory_space<vmem>>, vector<1x128xf32>
    %225 = vector.broadcast %224 : vector<1x128xf32> to vector<16x128xf32>
    %226 = arith.addf %223, %225 : vector<16x128xf32>
    %cst_287 = arith.constant 0.000000e+00 : f32
    %227 = vector.broadcast %cst_287 : f32 to vector<16x128xf32>
    %228 = arith.maximumf %226, %227 : vector<16x128xf32>
    %c0_288 = arith.constant 0 : index
    %c0_289 = arith.constant 0 : index
    %229 = vector.load %arg10[%c0_288, %c0_289] : memref<64x128xf32, #tpu.memory_space<vmem>>, vector<16x128xf32>
    tpu.vector_store %arg10[%c0_288, %c0_289], %228 {strides = array<i32>} : memref<64x128xf32, #tpu.memory_space<vmem>>, vector<16x128xf32>,
    %c0_290 = arith.constant 0 : index
    %c0_291 = arith.constant 0 : index
    %230 = tpu.strided_load %arg10[%c0_290, %c0_291] {strides = array<i32: 2, 1>} : memref<64x128xf32, #tpu.memory_space<vmem>>, vector<8x128xf32>
    %c1_292 = arith.constant 1 : index
    %c0_293 = arith.constant 0 : index
    %231 = tpu.strided_load %arg10[%c1_292, %c0_293] {strides = array<i32: 2, 1>} : memref<64x128xf32, #tpu.memory_space<vmem>>, vector<8x128xf32>
    %232 = arith.maximumf %230, %231 : vector<8x128xf32>
    %c0_294 = arith.constant 0 : index
    %c16 = arith.constant 16 : index
    %c0_295 = arith.constant 0 : index
    %233 = vector.load %arg9[%c0_294, %c16, %c0_295] : memref<1x24x128xf32, #tpu.memory_space<vmem>>, vector<1x8x128xf32>
    %234 = vector.shape_cast %233 : vector<1x8x128xf32> to vector<8x128xf32>
    %235 = vector.shape_cast %232 : vector<8x128xf32> to vector<1x8x128xf32>
    tpu.vector_store %arg9[%c0_294, %c16, %c0_295], %235 {strides = array<i32>} : memref<1x24x128xf32, #tpu.memory_space<vmem>>, vector<1x8x128xf32>,
    return
  }
  func.func @transform_0(%arg0: i32) -> (i32, i32, i32) {
    %c0_i32 = arith.constant 0 : i32
    %c0_i32_0 = arith.constant 0 : i32
    %c0_i32_1 = arith.constant 0 : i32
    return %arg0, %c0_i32, %c0_i32_0 : i32, i32, i32
  }
  func.func @transform_1(%arg0: i32) -> (i32, i32, i32) {
    %c0_i32 = arith.constant 0 : i32
    %c0_i32_0 = arith.constant 0 : i32
    %c0_i32_1 = arith.constant 0 : i32
    return %arg0, %c0_i32, %c0_i32_0 : i32, i32, i32
  }
  func.func @transform_2(%arg0: i32) -> (i32, i32, i32) {
    %c0_i32 = arith.constant 0 : i32
    %c0_i32_0 = arith.constant 0 : i32
    %c0_i32_1 = arith.constant 0 : i32
    %c0_i32_2 = arith.constant 0 : i32
    return %c0_i32, %c0_i32_0, %c0_i32_1 : i32, i32, i32
  }
  func.func @transform_3(%arg0: i32) -> (i32, i32, i32, i32) {
    %c0_i32 = arith.constant 0 : i32
    %c0_i32_0 = arith.constant 0 : i32
    %c0_i32_1 = arith.constant 0 : i32
    %c0_i32_2 = arith.constant 0 : i32
    %c0_i32_3 = arith.constant 0 : i32
    return %c0_i32, %c0_i32_0, %c0_i32_1, %c0_i32_2 : i32, i32, i32, i32
  }
  func.func @transform_4(%arg0: i32) -> (i32, i32) {
    %c0_i32 = arith.constant 0 : i32
    %c0_i32_0 = arith.constant 0 : i32
    %c0_i32_1 = arith.constant 0 : i32
    return %c0_i32, %c0_i32_0 : i32, i32
  }
  func.func @transform_5(%arg0: i32) -> (i32, i32, i32) {
    %c0_i32 = arith.constant 0 : i32
    %c0_i32_0 = arith.constant 0 : i32
    %c0_i32_1 = arith.constant 0 : i32
    %c0_i32_2 = arith.constant 0 : i32
    return %c0_i32, %c0_i32_0, %c0_i32_1 : i32, i32, i32
  }
  func.func @transform_6(%arg0: i32) -> (i32, i32, i32, i32) {
    %c0_i32 = arith.constant 0 : i32
    %c0_i32_0 = arith.constant 0 : i32
    %c0_i32_1 = arith.constant 0 : i32
    %c0_i32_2 = arith.constant 0 : i32
    %c0_i32_3 = arith.constant 0 : i32
    return %c0_i32, %c0_i32_0, %c0_i32_1, %c0_i32_2 : i32, i32, i32, i32
  }
  func.func @transform_7(%arg0: i32) -> (i32, i32) {
    %c0_i32 = arith.constant 0 : i32
    %c0_i32_0 = arith.constant 0 : i32
    %c0_i32_1 = arith.constant 0 : i32
    return %c0_i32, %c0_i32_0 : i32, i32
  }
  func.func @transform_8(%arg0: i32) -> (i32, i32, i32) {
    %c0_i32 = arith.constant 0 : i32
    %c0_i32_0 = arith.constant 0 : i32
    %c0_i32_1 = arith.constant 0 : i32
    return %arg0, %c0_i32, %c0_i32_0 : i32, i32, i32
  }
}

</mosaic_0001>

<bundles_post_ra>
// kernel: _lambda_.1
= control target key start
LH: loop header
LB: loop body
LE: loop exit
PB: predicated region body
PF: predicated region fallthrough
CT: control target
= control target key end

     0   :  { %13 = vsyncpa [#allocation6], 0  ;;  %s6123_s0 = inlined_call_operand.vmem [shape: f32[2,67,2], index: 0, kind: input, shape index: {}]   ;;  %s6124_s1 = inlined_call_operand.vmem [shape: f32[2,35,4], index: 1, kind: input, shape index: {}]   ;;  %s6125_s2 = inlined_call_operand.vmem [shape: f32[4,2,128], index: 2, kind: input, shape index: {}]   ;;  %s6126_s3 = inlined_call_operand.hbm [shape: f32[3,4,128,128], index: 3, kind: input, shape index: {}]   ;;  %s6127_s4 = inlined_call_operand.vmem [shape: f32[4,128], index: 4, kind: input, shape index: {}]   ;;  %s6128_s5 = inlined_call_operand.vmem [shape: f32[4,4,128], index: 5, kind: input, shape index: {}]   ;;  %s6129_s6 = inlined_call_operand.hbm [shape: f32[3,4,128,128], index: 6, kind: input, shape index: {}]   ;;  %s6130_s7 = inlined_call_operand.vmem [shape: f32[4,128], index: 7, kind: input, shape index: {}]   ;;  %s6131_s8 = inlined_call_operand.vmem [shape: f32[2,24,128], index: 8, kind: output, shape index: {}]  }
   0x1   :  { %14 = vsyncpa [#allocation8], 0  ;;  %s5804_s27 = smov 0  }
   0x2 LB: > { %s5810_s28 = sadd.s32 4294967295, %s5752_s27   ;;  %p4093_p0 = scmp.ge.s32.totalorder %s5752_s27, 1  ;;  %s5752_s27 = sphi %s5804_s27, %s20_s27  }
   0x3   : > { %p229_p1 = scmp.lt.s32.totalorder %s5752_s27, 3  ;;  %s5754_s29 = smov [#allocation5]  }
   0x4   : > { %s244_s30 = sshll.u32 %s5754_s29, 4  ;;  %p5669_p3 = scmp.eq.s32.totalorder %s5810_s28, 0  ;;  %s245_s30 = int_to_ptr.vmem [resolvable:$true] %s244_s30 }
   0x5   : > { %p5814_p2 = pnand %p4093_p0, %p229_p1  ;;  %s5755_s10 = smov [#allocation7]  }
   0x6   : > { %s263_s11 = sshll.u32 %s5755_s10, 4  ;;  %s5697_s13 = scalar_lea.vmem %s245_s30, 24576  ;;  %s264_s11 = int_to_ptr.vmem [resolvable:$true] %s263_s11 }
   0x7   : > { %p5662_p4 = pneg %p5814_p2  ;;  %p5698_p7 = scmp.ne.s32.totalorder %s245_s30, %s5697_s13 }
   0x8   : > { %p5705_p10 = scmp.lt.s32.totalorder %s245_s30, %s245_s30  ;;  %p5706_p11 = scmp.lt.s32.totalorder %s5697_s13, %s5697_s13 }
   0x9   : > { %p5823_p5 = pnand %p5669_p3, %p5662_p4 }
   0xa   : > { %p5707_p12 = por %p5706_p11, %p5705_p10 }
   0xb   : > { %p5688_p6 = pneg %p5823_p5 }
   0xd   : > { %p5700_p8 = pnand %p5698_p7, %p5688_p6 }
   0xf   : > { %p5701_p9 = pneg %p5700_p8 }
  0x11   : > { %p5708_p13 = pnand %p5707_p12, %p5701_p9 }
  0x13   : > { %5711 = shalt.err (!%p5708_p13)
}
  0x14   : > { %s5756_s14 = smov 128   ;;  %s5757_s15 = smov 8  }
  0x15   : > { %5665 = dma.hbm_to_vmem [thread:$0]  (!%p5823_p5), %s6126_s3, 24576, %s245_s30, [#allocation6], %s5756_s14, %s5756_s14, %s5757_s15  }
  0x16   : > { %s5723_s18 = scalar_lea.vmem %s264_s11, 24576  ;;  %p5731_p7 = scmp.lt.s32.totalorder %s264_s11, %s264_s11 }
  0x17   : > { %p5724_p0 = scmp.ne.s32.totalorder %s264_s11, %s5723_s18  ;;  %p5732_p8 = scmp.lt.s32.totalorder %s5723_s18, %s5723_s18 }
  0x19   : > { %p5726_p1 = pnand %p5724_p0, %p5688_p6  ;;  %p5733_p10 = por %p5732_p8, %p5731_p7 }
  0x1b   : > { %p5727_p4 = pneg %p5726_p1 }
  0x1d   : > { %p5734_p9 = pnand %p5733_p10, %p5727_p4 }
  0x1f   : > { %5737 = shalt.err (!%p5734_p9)
}
  0x20   : > { %5668 = dma.hbm_to_vmem [thread:$0]  (!%p5823_p5), %s6129_s6, 24576, %s264_s11, [#allocation8], %s5756_s14, %s5756_s14, %s5757_s15  }
  0x21   : > { %298 = sbr.rel (%p5814_p2) target bundleno = 1774 (0x6ee), region = 52 }
  0x26   : > { %5743 = dma.done.wait (%p5669_p3), [#allocation6], 24576  }
  0x27   : > { %5745 = vsyncadd (%p5669_p3), [#allocation6], 4294942720 }
  0x28   : > { %5747 = dma.done.wait (%p5669_p3), [#allocation8], 24576  }
  0x29   : > { %5749 = vsyncadd (%p5669_p3), [#allocation8], 4294942720  ;;  %p341_p6 = scmp.lt.s32.totalorder %s5810_s28, 1  ;;  %vm410_vm0 = vcmask 1041408   ;;  %vm385_vm1 = vcmask 15360   ;;  %v1043_v36 = vld [vmem:[#allocation5 + $0xf8] sm:$0xff] }
  0x2a   : > { %v4103_v0 = vld [vmem:[%s6125_s2 + $0x2] sm:$0x3]  ;;  %v374_v1 = vld [vmem:[%s6125_s2] sm:$0x3]  ;;  %v4122_v6 = vld [vmem:[%s6125_s2 + $0x4] sm:$0x3] }
  0x2b   : > { %s6135_s28 = smov (!%p341_p6, %s5810_s28), 1  ;;  %4687 = vmatprep.subr.msk.mxu0 %vm410_vm0, %v4103_v0  ;;  %4701 = vmatprep.subr.msk.mxu1 %vm410_vm0, %v374_v1  ;;  %v4132_v7 = vld [vmem:[%s6125_s2 + $0x6] sm:$0x3]  ;;  %v1041_v38 = vld [vmem:[#allocation5 + $0xe8] sm:$0xff]  ;;  %v1040_v39 = vld [vmem:[#allocation5 + $0xe0] sm:$0xff]  ;;  %v5758_v62 = vmov 0.0  }
  0x2c   : > { %s5651_s21 = smul.u32 72, %s6135_s28  ;;  %4688 = vmatpush3.msk.msra.mxu0 %vm410_vm0, %v4103_v0  ;;  %4702 = vmatpush3.msk.msra.mxu1 %vm410_vm0, %v374_v1  ;;  %v1042_v37 = vld [vmem:[#allocation5 + $0xf0] sm:$0xff]  ;;  %v1022_v40 = vld [vmem:[#allocation5 + $0x78] sm:$0xff]  ;;  %v1020_v44 = vld [vmem:[#allocation5 + $0x68] sm:$0xff]  ;;  %356 = vst [vmem:[#allocation3] sm:$0xff] %v5758_v62  ;;  %vm2392_vm2 = vcmask 1043456  }
  0x2d   : > { %4715 = vmatprep.subr.msk.mxu0 %vm410_vm0, %v4122_v6  ;;  %4729 = vmatprep.subr.msk.mxu1 %vm410_vm0, %v4132_v7  ;;  %v1039_v41 = vld [vmem:[#allocation5 + $0xd8] sm:$0xff]  ;;  %v1021_v42 = vld [vmem:[#allocation5 + $0x70] sm:$0xff]  ;;  %v1037_v45 = vld [vmem:[#allocation5 + $0xc8] sm:$0xff]  ;;  %357 = vst [vmem:[#allocation3 + $0x8] sm:$0xff] %v5758_v62  ;;  %s5652_s19 = smul.u32 40, %s6135_s28  ;;  %vm2379_vm3 = vcmask 31744  }
  0x2e   : > { %s5863_s24 = scalar_lea.vmem %s6123_s0, %s5651_s21  ;;  %v1038_v43 = vld [vmem:[#allocation5 + $0xd0] sm:$0xff]  ;;  %v1019_v46 = vld [vmem:[#allocation5 + $0x60] sm:$0xff]  ;;  %v1018_v48 = vld [vmem:[#allocation5 + $0x58] sm:$0xff]  ;;  %358 = vst [vmem:[#allocation3 + $0x10] sm:$0xff] %v5758_v62  ;;  %s5653_s13 = smul.u32 24, %s6135_s28 }
  0x2f   : > { %v375_v2 = vld [vmem:[%s5863_s24 + $0x1] sm:$0xff]  ;;  %v376_v4 = vld [vmem:[%s5863_s24 + $0x9] sm:$0xff]  ;;  %v377_v8 = vld [vmem:[%s5863_s24 + $0x11] sm:$0xff]  ;;  %359 = vst [vmem:[#allocation3 + $0x18] sm:$0xff] %v5758_v62  ;;  %s6036_s26 = scalar_lea.vmem %s6124_s1, %s5652_s19 }
  0x30   : > { %v366_v3 = vld [vmem:[%s5863_s24] sm:$0xff]  ;;  %v367_v5 = vld [vmem:[%s5863_s24 + $0x8] sm:$0xff]  ;;  %4689 = vmatprep.mubr.msk.f32.mxu0 %vm385_vm1, %v375_v2  ;;  %v368_v9 = vld [vmem:[%s5863_s24 + $0x10] sm:$0xff]  ;;  %360 = vst [vmem:[#allocation3 + $0x20] sm:$0xff] %v5758_v62  ;;  %s6104_s18 = scalar_lea.vmem %s6131_s8, %s5653_s13 }
  0x31   : > { %4703 = vmatprep.mubr.msk.f32.mxu1 %vm385_vm1, %v366_v3  ;;  %4690 = vmatmul.mubr.msk.f32.vlgmr.msra.gmra.mxu0 %vm385_vm1, %v376_v4  ;;  %v378_v10 = vld [vmem:[%s5863_s24 + $0x19] sm:$0xff]  ;;  %v379_v12 = vld [vmem:[%s5863_s24 + $0x21] sm:$0xff]  ;;  %v380_v14 = vld [vmem:[%s5863_s24 + $0x29] sm:$0xff]  ;;  %361 = vst [vmem:[#allocation4] sm:$0xff] %v5758_v62 }
  0x32   : > { %4704 = vmatmul.mubr.msk.f32.vlgmr.msra.gmra.mxu1 %vm385_vm1, %v367_v5  ;;  %v369_v11 = vld [vmem:[%s5863_s24 + $0x18] sm:$0xff]  ;;  %4716 = vmatpush3.msk.msra.mxu0 %vm410_vm0, %v4122_v6  ;;  %v370_v13 = vld [vmem:[%s5863_s24 + $0x20] sm:$0xff]  ;;  %v371_v15 = vld [vmem:[%s5863_s24 + $0x28] sm:$0xff]  ;;  %362 = vst [vmem:[#allocation4 + $0x8] sm:$0xff] %v5758_v62 }
  0x33   : > { %4692 = vmatprep.mubr.msk.f32.mxu0 %vm385_vm1, %v377_v8  ;;  %4706 = vmatprep.mubr.msk.f32.mxu1 %vm385_vm1, %v368_v9  ;;  %v381_v16 = vld [vmem:[%s5863_s24 + $0x31] sm:$0xff]  ;;  %v382_v18 = vld [vmem:[%s5863_s24 + $0x39] sm:$0xff]  ;;  %v651_v20 = vld [vmem:[%s5863_s24 + $0x2] sm:$0xff]  ;;  %363 = vst [vmem:[#allocation4 + $0x10] sm:$0xff] %v5758_v62 }
  0x34   : > { %4730 = vmatpush3.msk.msra.mxu1 %vm410_vm0, %v4132_v7  ;;  %v372_v17 = vld [vmem:[%s5863_s24 + $0x30] sm:$0xff]  ;;  %v373_v19 = vld [vmem:[%s5863_s24 + $0x38] sm:$0xff]  ;;  %v801_v21 = vld [vmem:[%s5863_s24 + $0x3] sm:$0xff]  ;;  %4743 = vmatprep.subr.mxu0 %v1043_v36  ;;  %364 = vst [vmem:[#allocation4 + $0x18] sm:$0xff] %v5758_v62 }
  0x35   : > { %4693 = vmatmul.mubr.msk.f32.gmra.mxu0 %vm385_vm1, %v378_v10  ;;  %v652_v22 = vld [vmem:[%s5863_s24 + $0xa] sm:$0xff]  ;;  %v653_v24 = vld [vmem:[%s5863_s24 + $0x12] sm:$0xff]  ;;  %v654_v26 = vld [vmem:[%s5863_s24 + $0x1a] sm:$0xff]  ;;  %4781 = vmatprep.subr.mxu1 %v1022_v40  ;;  %365 = vst [vmem:[#allocation4 + $0x20] sm:$0xff] %v5758_v62 }
  0x36   : > { %4707 = vmatmul.mubr.msk.f32.gmra.mxu1 %vm385_vm1, %v369_v11  ;;  %4695 = vmatprep.mubr.msk.f32.mxu0 %vm385_vm1, %v379_v12  ;;  %v802_v23 = vld [vmem:[%s5863_s24 + $0xb] sm:$0xff]  ;;  %v803_v25 = vld [vmem:[%s5863_s24 + $0x13] sm:$0xff]  ;;  %v804_v27 = vld [vmem:[%s5863_s24 + $0x1b] sm:$0xff] }
  0x37   : > { %4709 = vmatprep.mubr.msk.f32.mxu1 %vm385_vm1, %v370_v13  ;;  %v655_v28 = vld [vmem:[%s5863_s24 + $0x22] sm:$0xff]  ;;  %v656_v30 = vld [vmem:[%s5863_s24 + $0x2a] sm:$0xff]  ;;  %v657_v32 = vld [vmem:[%s5863_s24 + $0x32] sm:$0xff] }
  0x38   : > { %v805_v29 = vld [vmem:[%s5863_s24 + $0x23] sm:$0xff]  ;;  %v806_v31 = vld [vmem:[%s5863_s24 + $0x2b] sm:$0xff]  ;;  %v807_v33 = vld [vmem:[%s5863_s24 + $0x33] sm:$0xff] }
  0x39   : > { %4696 = vmatmul.mubr.msk.f32.gmra.mxu0 %vm385_vm1, %v380_v14  ;;  %v658_v34 = vld [vmem:[%s5863_s24 + $0x3a] sm:$0xff]  ;;  %v1036_v47 = vld [vmem:[#allocation5 + $0xc0] sm:$0xff]  ;;  %v1035_v49 = vld [vmem:[#allocation5 + $0xb8] sm:$0xff] }
  0x3a   : > { %4710 = vmatmul.mubr.msk.f32.gmra.mxu1 %vm385_vm1, %v371_v15  ;;  %4698 = vmatprep.mubr.msk.f32.mxu0 %vm385_vm1, %v381_v16  ;;  %v808_v35 = vld [vmem:[%s5863_s24 + $0x3b] sm:$0xff]  ;;  %v1015_v54 = vld [vmem:[#allocation5 + $0x40] sm:$0xff]  ;;  %v1014_v56 = vld [vmem:[#allocation5 + $0x38] sm:$0xff] }
  0x3b   : > { %4712 = vmatprep.mubr.msk.f32.mxu1 %vm385_vm1, %v372_v17  ;;  %v1017_v50 = vld [vmem:[#allocation5 + $0x50] sm:$0xff]  ;;  %v1016_v52 = vld [vmem:[#allocation5 + $0x48] sm:$0xff]  ;;  %v1032_v55 = vld [vmem:[#allocation5 + $0xa0] sm:$0xff] }
  0x3c   : > { %v1034_v51 = vld [vmem:[#allocation5 + $0xb0] sm:$0xff]  ;;  %v1033_v53 = vld [vmem:[#allocation5 + $0xa8] sm:$0xff]  ;;  %v1031_v57 = vld [vmem:[#allocation5 + $0x98] sm:$0xff] }
  0x3d   : > { %4699 = vmatmul.mubr.msk.f32.gmra.mxu0 %vm385_vm1, %v382_v18  ;;  %v1013_v58 = vld [vmem:[#allocation5 + $0x30] sm:$0xff]  ;;  %v1012_v60 = vld [vmem:[#allocation5 + $0x28] sm:$0xff]  ;;  %v1011_v63 = vld [vmem:[#allocation5 + $0x20] sm:$0xff] }
  0x3e   : > { %4713 = vmatmul.mubr.msk.f32.gmra.mxu1 %vm385_vm1, %v373_v19  ;;  %4717 = vmatprep.mubr.msk.f32.mxu0 %vm385_vm1, %v651_v20  ;;  %v1030_v59 = vld [vmem:[#allocation5 + $0x90] sm:$0xff]  ;;  %v1029_v61 = vld [vmem:[#allocation5 + $0x88] sm:$0xff]  ;;  %v1028_v0 = vld [vmem:[#allocation5 + $0x80] sm:$0xff] }
  0x3f   : > { %4731 = vmatprep.mubr.msk.f32.mxu1 %vm385_vm1, %v801_v21  ;;  %v1010_v1 = vld [vmem:[#allocation5 + $0x18] sm:$0xff]  ;;  %v1009_v3 = vld [vmem:[#allocation5 + $0x10] sm:$0xff]  ;;  %v1008_v4 = vld [vmem:[#allocation5 + $0x8] sm:$0xff] }
  0x40   : > { %v5959_v2 = vld [vmem:[#allocation5 + $0x178] sm:$0xff]  ;;  %v1007_v5 = vld [vmem:[#allocation5] sm:$0xff] }
  0x41   : > { %4718 = vmatmul.mubr.msk.f32.vlgmr.msra.gmra.mxu0 %vm385_vm1, %v652_v22  ;;  %v5962_v6 = vld [vmem:[#allocation5 + $0x1f8] sm:$0xff] }
  0x42   : > { %4732 = vmatmul.mubr.msk.f32.vlgmr.msra.gmra.mxu1 %vm385_vm1, %v802_v23  ;;  %4720 = vmatprep.mubr.msk.f32.mxu0 %vm385_vm1, %v653_v24 }
  0x43   : > { %4734 = vmatprep.mubr.msk.f32.mxu1 %vm385_vm1, %v803_v25  ;;  %4744 = vmatpush3.msra.mxu0 %v1043_v36 }
  0x44   : > { %4745 = vmatprep.subr.mxu0 %v1042_v37  ;;  %4782 = vmatpush3.msra.mxu1 %v1022_v40 }
  0x45   : > { %4721 = vmatmul.mubr.msk.f32.gmra.mxu0 %vm385_vm1, %v654_v26  ;;  %4783 = vmatprep.subr.mxu1 %v1021_v42 }
  0x46   : > { %4735 = vmatmul.mubr.msk.f32.gmra.mxu1 %vm385_vm1, %v804_v27  ;;  %4723 = vmatprep.mubr.msk.f32.mxu0 %vm385_vm1, %v655_v28  ;;  %v4142_v28 = vld [vmem:[%s6127_s4] ss:$0 sm:$0xff] }
  0x47   : > { %4737 = vmatprep.mubr.msk.f32.mxu1 %vm385_vm1, %v805_v29  ;;  %4746 = vmatpush3.msra.mxu0 %v1042_v37 }
  0x48   : > { %4747 = vmatprep.subr.mxu0 %v1041_v38  ;;  %4784 = vmatpush3.msra.mxu1 %v1021_v42 }
  0x49   : > { %4724 = vmatmul.mubr.msk.f32.gmra.mxu0 %vm385_vm1, %v656_v30  ;;  %4785 = vmatprep.subr.mxu1 %v1020_v44 }
  0x4a   : > { %4738 = vmatmul.mubr.msk.f32.gmra.mxu1 %vm385_vm1, %v806_v31  ;;  %4726 = vmatprep.mubr.msk.f32.mxu0 %vm385_vm1, %v657_v32 }
  0x4b   : > { %4740 = vmatprep.mubr.msk.f32.mxu1 %vm385_vm1, %v807_v33  ;;  %4748 = vmatpush3.msra.mxu0 %v1041_v38 }
  0x4c   : > { %4749 = vmatprep.subr.mxu0 %v1040_v39  ;;  %4786 = vmatpush3.msra.mxu1 %v1020_v44 }
  0x4d   : > { %4727 = vmatmul.mubr.msk.f32.gmra.mxu0 %vm385_vm1, %v658_v34  ;;  %4787 = vmatprep.subr.mxu1 %v1019_v46 }
  0x4e   : > { %4741 = vmatmul.mubr.msk.f32.gmra.mxu1 %vm385_vm1, %v808_v35  ;;  %4750 = vmatpush3.msra.mxu0 %v1040_v39 }
  0x4f   : > { %4751 = vmatprep.subr.mxu0 %v1039_v41  ;;  %4788 = vmatpush3.msra.mxu1 %v1019_v46 }
  0x50   : > { %4752 = vmatpush3.msra.mxu0 %v1039_v41  ;;  %4789 = vmatprep.subr.mxu1 %v1018_v48 }
  0x51   : > { %4753 = vmatprep.subr.mxu0 %v1038_v43  ;;  %4790 = vmatpush3.msra.mxu1 %v1018_v48 }
  0x52   : > { %4754 = vmatpush3.msra.mxu0 %v1038_v43  ;;  %4791 = vmatprep.subr.mxu1 %v1017_v50 }
  0x53   : > { %4755 = vmatprep.subr.mxu0 %v1037_v45  ;;  %4792 = vmatpush3.msra.mxu1 %v1017_v50 }
  0x54   : > { %4756 = vmatpush3.msra.mxu0 %v1037_v45  ;;  %4793 = vmatprep.subr.mxu1 %v1016_v52 }
  0x55   : > { %4757 = vmatprep.subr.mxu0 %v1036_v47  ;;  %4794 = vmatpush3.msra.mxu1 %v1016_v52 }
  0x56   : > { %4758 = vmatpush3.msra.mxu0 %v1036_v47  ;;  %4795 = vmatprep.subr.mxu1 %v1015_v54 }
  0x57   : > { %4759 = vmatprep.subr.mxu0 %v1035_v49  ;;  %4796 = vmatpush3.msra.mxu1 %v1015_v54 }
  0x58   : > { %4760 = vmatpush3.msra.mxu0 %v1035_v49  ;;  %4797 = vmatprep.subr.mxu1 %v1014_v56 }
  0x59   : > { %4761 = vmatprep.subr.mxu0 %v1034_v51  ;;  %4798 = vmatpush3.msra.mxu1 %v1014_v56 }
  0x5a   : > { %4762 = vmatpush3.msra.mxu0 %v1034_v51  ;;  %4799 = vmatprep.subr.mxu1 %v1013_v58 }
  0x5b   : > { %4763 = vmatprep.subr.mxu0 %v1033_v53  ;;  %4800 = vmatpush3.msra.mxu1 %v1013_v58 }
  0x5c   : > { %4764 = vmatpush3.msra.mxu0 %v1033_v53  ;;  %4801 = vmatprep.subr.mxu1 %v1012_v60 }
  0x5d   : > { %4765 = vmatprep.subr.mxu0 %v1032_v55  ;;  %4802 = vmatpush3.msra.mxu1 %v1012_v60 }
  0x5e   : > { %4766 = vmatpush3.msra.mxu0 %v1032_v55  ;;  %4803 = vmatprep.subr.mxu1 %v1011_v63 }
  0x5f   : > { %4767 = vmatprep.subr.mxu0 %v1031_v57  ;;  %4804 = vmatpush3.msra.mxu1 %v1011_v63 }
  0x60   : > { %4768 = vmatpush3.msra.mxu0 %v1031_v57  ;;  %4805 = vmatprep.subr.mxu1 %v1010_v1 }
  0x61   : > { %4769 = vmatprep.subr.mxu0 %v1030_v59  ;;  %4806 = vmatpush3.msra.mxu1 %v1010_v1 }
  0x62   : > { %4770 = vmatpush3.msra.mxu0 %v1030_v59  ;;  %4807 = vmatprep.subr.mxu1 %v1009_v3 }
  0x63   : > { %4771 = vmatprep.subr.mxu0 %v1029_v61  ;;  %4808 = vmatpush3.msra.mxu1 %v1009_v3 }
  0x64   : > { %4772 = vmatpush3.msra.mxu0 %v1029_v61  ;;  %4809 = vmatprep.subr.mxu1 %v1008_v4 }
  0x65   : > { %4773 = vmatprep.subr.mxu0 %v1028_v0  ;;  %4810 = vmatpush3.msra.mxu1 %v1008_v4 }
  0x66   : > { %4774 = vmatpush3.msra.mxu0 %v1028_v0  ;;  %4811 = vmatprep.subr.mxu1 %v1007_v5 }
  0x67   : > { %4819 = vmatprep.subr.mxu0 %v5959_v2  ;;  %4812 = vmatpush3.msra.mxu1 %v1007_v5 }
  0x68   : > { %4857 = vmatprep.subr.mxu1 %v5962_v6 }
  0xf1   : > { %v4691_v7 = vpop.f32.mrf.mxu0 }
  0xf2   : > { %v4705_v8 = vpop.f32.mrf.mxu1 }
  0xf3   : > { %v480_v9 = vpop.f32.mrf.mxu0  ;;  %v618_v23 = vadd.f32 %v4705_v8, %v4691_v7 }
  0xf4   : > { %v612_v10 = vpop.f32.mrf.mxu1 }
  0xf5   : > { %v4694_v11 = vpop.f32.mrf.mxu0  ;;  %v613_v26 = vadd.f32 %v612_v10, %v480_v9 }
  0xf6   : > { %v4708_v12 = vpop.f32.mrf.mxu1 }
  0xf7   : > { %v490_v13 = vpop.f32.mrf.mxu0  ;;  %v628_v31 = vadd.f32 %v4708_v12, %v4694_v11 }
  0xf8   : > { %v622_v14 = vpop.f32.mrf.mxu1 }
  0xf9   : > { %v4697_v15 = vpop.f32.mrf.mxu0  ;;  %v623_v36 = vadd.f32 %v622_v14, %v490_v13 }
  0xfa   : > { %v4711_v16 = vpop.f32.mrf.mxu1 }
  0xfb   : > { %v500_v17 = vpop.f32.mrf.mxu0  ;;  %v638_v40 = vadd.f32 %v4711_v16, %v4697_v15 }
  0xfc   : > { %v632_v18 = vpop.f32.mrf.mxu1 }
  0xfd   : > { %v4700_v19 = vpop.f32.mrf.mxu0  ;;  %v633_v47 = vadd.f32 %v632_v18, %v500_v17 }
  0xfe   : > { %v4714_v20 = vpop.f32.mrf.mxu1 }
  0xff   : > { %v510_v21 = vpop.f32.mrf.mxu0  ;;  %v648_v54 = vadd.f32 %v4714_v20, %v4700_v19 }
 0x100   : > { %v642_v22 = vpop.f32.mrf.mxu1 }
 0x101   : > { %v4719_v24 = vpop.f32.mrf.mxu0  ;;  %v643_v61 = vadd.f32 %v642_v22, %v510_v21 }
 0x102   : > { %v4733_v25 = vpop.f32.mrf.mxu1  ;;  %v794_v27 = vadd.f32 %v4719_v24, %v618_v23 }
 0x103   : > { %v754_v29 = vpop.f32.mrf.mxu0 }
 0x104   : > { %v904_v30 = vpop.f32.mrf.mxu1  ;;  %v944_v32 = vadd.f32 %v4733_v25, %v794_v27  ;;  %v793_v33 = vadd.f32 %v754_v29, %v613_v26  ;;  %v1233_v25 = vld [vmem:[#allocation5 + $0x170] sm:$0xff]  ;;  %v1232_v29 = vld [vmem:[#allocation5 + $0x168] sm:$0xff] }
 0x105   : > { %v4722_v34 = vpop.f32.mrf.mxu0 }
 0x106   : > { %v4736_v35 = vpop.f32.mrf.mxu1  ;;  %v957_v37 = vadd.f32 %v4142_v28, %v944_v32  ;;  %v943_v38 = vadd.f32 %v904_v30, %v793_v33  ;;  %v796_v39 = vadd.f32 %v4722_v34, %v628_v31  ;;  %v1231_v31 = vld [vmem:[#allocation5 + $0x160] sm:$0xff]  ;;  %v1230_v34 = vld [vmem:[#allocation5 + $0x158] sm:$0xff] }
 0x107   : > { %v764_v41 = vpop.f32.mrf.mxu0 }
 0x108   : > { %v914_v42 = vpop.f32.mrf.mxu1  ;;  %v965_v43 = vmax.f32 %v957_v37, 0.0  ;;  %v956_v44 = vadd.f32 %v4142_v28, %v943_v38  ;;  %v946_v45 = vadd.f32 %v4736_v35, %v796_v39  ;;  %v795_v46 = vadd.f32 %v764_v41, %v623_v36  ;;  %v1343_v37 = vld [vmem:[#allocation5 + $0x1f0] sm:$0xff]  ;;  %v1342_v38 = vld [vmem:[#allocation5 + $0x1e8] sm:$0xff]  ;;  %v1341_v41 = vld [vmem:[#allocation5 + $0x1e0] sm:$0xff] }
 0x109   : > { %v4725_v48 = vpop.f32.mrf.mxu0 }
 0x10a   : > { %v4739_v49 = vpop.f32.mrf.mxu1  ;;  %973 = vst [vmem:[#allocation2 + $0x8] sm:$0xff] %v965_v43  ;;  %v964_v50 = vmax.f32 %v956_v44, 0.0  ;;  %v959_v51 = vadd.f32 %v4142_v28, %v946_v45  ;;  %v945_v52 = vadd.f32 %v914_v42, %v795_v46  ;;  %v798_v53 = vadd.f32 %v4725_v48, %v638_v40  ;;  %v1228_v42 = vld [vmem:[#allocation5 + $0x148] sm:$0xff]  ;;  %v1340_v43 = vld [vmem:[#allocation5 + $0x1d8] sm:$0xff]  ;;  %v1227_v46 = vld [vmem:[#allocation5 + $0x140] sm:$0xff] }
 0x10b   : > { %v774_v55 = vpop.f32.mrf.mxu0  ;;  %v1226_v48 = vld [vmem:[#allocation5 + $0x138] sm:$0xff] }
 0x10c   : > { %v924_v56 = vpop.f32.mrf.mxu1  ;;  %972 = vst [vmem:[#allocation2] sm:$0xff] %v964_v50  ;;  %v967_v57 = vmax.f32 %v959_v51, 0.0  ;;  %v958_v58 = vadd.f32 %v4142_v28, %v945_v52  ;;  %v797_v59 = vadd.f32 %v774_v55, %v633_v47  ;;  %v948_v60 = vadd.f32 %v4739_v49, %v798_v53  ;;  %v1338_v47 = vld [vmem:[#allocation5 + $0x1c8] sm:$0xff]  ;;  %v1337_v49 = vld [vmem:[#allocation5 + $0x1c0] sm:$0xff]  ;;  %v1225_v50 = vld [vmem:[#allocation5 + $0x130] sm:$0xff] }
 0x10d   : > { %v4728_v63 = vpop.f32.mrf.mxu0  ;;  %v1336_v51 = vld [vmem:[#allocation5 + $0x1b8] sm:$0xff]  ;;  %v1224_v52 = vld [vmem:[#allocation5 + $0x128] sm:$0xff]  ;;  %v1335_v53 = vld [vmem:[#allocation5 + $0x1b0] sm:$0xff] }
 0x10e   : > { %v4742_v0 = vpop.f32.mrf.mxu1  ;;  %975 = vst [vmem:[#allocation2 + $0x18] sm:$0xff] %v967_v57  ;;  %v966_v1 = vmax.f32 %v958_v58, 0.0  ;;  %v961_v3 = vadd.f32 %v4142_v28, %v948_v60  ;;  %v800_v4 = vadd.f32 %v4728_v63, %v648_v54  ;;  %v947_v5 = vadd.f32 %v924_v56, %v797_v59  ;;  %v1223_v54 = vld [vmem:[#allocation5 + $0x120] sm:$0xff]  ;;  %v1334_v55 = vld [vmem:[#allocation5 + $0x1a8] sm:$0xff]  ;;  %v1222_v56 = vld [vmem:[#allocation5 + $0x118] sm:$0xff] }
 0x10f   : > { %v784_v7 = vpop.f32.mrf.mxu0  ;;  %v1333_v57 = vld [vmem:[#allocation5 + $0x1a0] sm:$0xff]  ;;  %v1221_v58 = vld [vmem:[#allocation5 + $0x110] sm:$0xff]  ;;  %v1332_v59 = vld [vmem:[#allocation5 + $0x198] sm:$0xff] }
 0x110   : > { %v934_v8 = vpop.f32.mrf.mxu1  ;;  %974 = vst [vmem:[#allocation2 + $0x10] sm:$0xff] %v966_v1  ;;  %v969_v9 = vmax.f32 %v961_v3, 0.0  ;;  %v960_v10 = vadd.f32 %v4142_v28, %v947_v5  ;;  %v799_v11 = vadd.f32 %v784_v7, %v643_v61  ;;  %v950_v12 = vadd.f32 %v4742_v0, %v800_v4  ;;  %v1220_v60 = vld [vmem:[#allocation5 + $0x108] sm:$0xff]  ;;  %v1331_v61 = vld [vmem:[#allocation5 + $0x190] sm:$0xff]  ;;  %v1219_v63 = vld [vmem:[#allocation5 + $0x100] sm:$0xff] }
 0x111   : > { %v1330_v0 = vld [vmem:[#allocation5 + $0x188] sm:$0xff]  ;;  %v1329_v1 = vld [vmem:[#allocation5 + $0x180] sm:$0xff] }
 0x112   : > { %977 = vst [vmem:[#allocation2 + $0x28] sm:$0xff] %v969_v9  ;;  %v968_v13 = vmax.f32 %v960_v10, 0.0  ;;  %v963_v14 = vadd.f32 %v4142_v28, %v950_v12  ;;  %v949_v15 = vadd.f32 %v934_v8, %v799_v11  ;;  %v1492_v10 = vld [vmem:[#allocation5 + $0x2f8] sm:$0xff]  ;;  %v1491_v12 = vld [vmem:[#allocation5 + $0x2f0] sm:$0xff] }
 0x113   : > { %v980_v16 = vld [vmem:[#allocation2] ss:$2 sm:$0xff]  ;;  %v988_v17 = vld [vmem:[#allocation2 + $0x1] ss:$2 sm:$0xff] }
 0x114   : > { %976 = vst [vmem:[#allocation2 + $0x20] sm:$0xff] %v968_v13  ;;  %v971_v18 = vmax.f32 %v963_v14, 0.0  ;;  %v962_v19 = vadd.f32 %v4142_v28, %v949_v15  ;;  %v995_v20 = vmax.f32 %v980_v16, %v988_v17  ;;  %v1471_v11 = vld [vmem:[#allocation5 + $0x278] sm:$0xff]  ;;  %v1470_v13 = vld [vmem:[#allocation5 + $0x270] sm:$0xff]  ;;  %v1490_v14 = vld [vmem:[#allocation5 + $0x2e8] sm:$0xff] }
 0x115   : > { %v1469_v15 = vld [vmem:[#allocation5 + $0x268] sm:$0xff]  ;;  %v1489_v16 = vld [vmem:[#allocation5 + $0x2e0] sm:$0xff] }
 0x116   : > { %979 = vst [vmem:[#allocation2 + $0x38] sm:$0xff] %v971_v18  ;;  %v970_v21 = vmax.f32 %v962_v19, 0.0  ;;  %999 = vst [vmem:[#allocation3 + $0x1] sm:$0xff] %v995_v20  ;;  %4775 = vmatprep.mubr.f32.mxu0 %v995_v20  ;;  %v1468_v17 = vld [vmem:[#allocation5 + $0x260] sm:$0xff]  ;;  %v1488_v18 = vld [vmem:[#allocation5 + $0x2d8] sm:$0xff] }
 0x117   : > { %v982_v22 = vld [vmem:[#allocation2 + $0x10] ss:$2 sm:$0xff]  ;;  %v990_v23 = vld [vmem:[#allocation2 + $0x11] ss:$2 sm:$0xff]  ;;  %v1467_v19 = vld [vmem:[#allocation5 + $0x258] sm:$0xff] }
 0x118   : > { %v996_v24 = vmax.f32 %v982_v22, %v990_v23  ;;  %978 = vst [vmem:[#allocation2 + $0x30] sm:$0xff] %v970_v21  ;;  %v1487_v20 = vld [vmem:[#allocation5 + $0x2d0] sm:$0xff]  ;;  %v1486_v22 = vld [vmem:[#allocation5 + $0x2c8] sm:$0xff] }
 0x119   : > { %v1466_v21 = vld [vmem:[#allocation5 + $0x250] sm:$0xff]  ;;  %v1465_v23 = vld [vmem:[#allocation5 + $0x248] sm:$0xff] }
 0x11a   : > { %1000 = vst [vmem:[#allocation3 + $0x9] sm:$0xff] %v996_v24  ;;  %4776 = vmatmul.mubr.f32.vlgmr.msra.gmra.mxu0 %v996_v24  ;;  %v1485_v24 = vld [vmem:[#allocation5 + $0x2c0] sm:$0xff] }
 0x11b   : > { %v984_v26 = vld [vmem:[#allocation2 + $0x20] ss:$2 sm:$0xff]  ;;  %v992_v27 = vld [vmem:[#allocation2 + $0x21] ss:$2 sm:$0xff]  ;;  %4820 = vmatpush3.msra.mxu0 %v5959_v2 }
 0x11c   : > { %v997_v30 = vmax.f32 %v984_v26, %v992_v27  ;;  %4821 = vmatprep.subr.mxu0 %v1233_v25  ;;  %v1229_v2 = vld [vmem:[#allocation5 + $0x150] sm:$0xff]  ;;  %v1482_v27 = vld [vmem:[#allocation5 + $0x2a8] sm:$0xff] }
 0x11d   : > { %v1003_v28 = vld [vmem:[#allocation3] sm:$0xff]  ;;  %4822 = vmatpush3.msra.mxu0 %v1233_v25  ;;  %v1484_v25 = vld [vmem:[#allocation5 + $0x2b8] sm:$0xff] }
 0x11e   : > { %1001 = vst [vmem:[#allocation3 + $0x11] sm:$0xff] %v997_v30  ;;  %4813 = vmatprep.mubr.f32.mxu1 %v1003_v28  ;;  %4823 = vmatprep.subr.mxu0 %v1232_v29  ;;  %v1483_v26 = vld [vmem:[#allocation5 + $0x2b0] sm:$0xff]  ;;  %v1463_v28 = vld [vmem:[#allocation5 + $0x238] sm:$0xff] }
 0x11f   : > { %v986_v32 = vld [vmem:[#allocation2 + $0x30] ss:$2 sm:$0xff]  ;;  %v994_v33 = vld [vmem:[#allocation2 + $0x31] ss:$2 sm:$0xff]  ;;  %4778 = vmatprep.mubr.f32.mxu0 %v997_v30  ;;  %4824 = vmatpush3.msra.mxu0 %v1232_v29 }
 0x120   : > { %v998_v35 = vmax.f32 %v986_v32, %v994_v33  ;;  %4825 = vmatprep.subr.mxu0 %v1231_v31  ;;  %v1464_v29 = vld [vmem:[#allocation5 + $0x240] sm:$0xff]  ;;  %v1462_v32 = vld [vmem:[#allocation5 + $0x230] sm:$0xff] }
 0x121   : > { %v1004_v36 = vld [vmem:[#allocation3 + $0x8] sm:$0xff]  ;;  %4826 = vmatpush3.msra.mxu0 %v1231_v31  ;;  %v1481_v30 = vld [vmem:[#allocation5 + $0x2a0] sm:$0xff]  ;;  %v1479_v33 = vld [vmem:[#allocation5 + $0x290] sm:$0xff] }
 0x122   : > { %1002 = vst [vmem:[#allocation3 + $0x19] sm:$0xff] %v998_v35  ;;  %4814 = vmatmul.mubr.f32.vlgmr.msra.gmra.mxu1 %v1004_v36  ;;  %4827 = vmatprep.subr.mxu0 %v1230_v34  ;;  %v1214_v39 = vld [vmem:[#allocation3 + $0x2] sm:$0xff]  ;;  %v1460_v36 = vld [vmem:[#allocation5 + $0x220] sm:$0xff] }
 0x123   : > { %4858 = vmatpush3.msra.mxu1 %v5962_v6  ;;  %4779 = vmatmul.mubr.f32.gmra.mxu0 %v998_v35  ;;  %v1339_v6 = vld [vmem:[#allocation5 + $0x1d0] sm:$0xff]  ;;  %v1480_v31 = vld [vmem:[#allocation5 + $0x298] sm:$0xff]  ;;  %v1478_v35 = vld [vmem:[#allocation5 + $0x288] sm:$0xff] }
 0x124   : > { %4859 = vmatprep.subr.mxu1 %v1343_v37  ;;  %4828 = vmatpush3.msra.mxu0 %v1230_v34  ;;  %v1324_v45 = vld [vmem:[#allocation3 + $0x3] sm:$0xff]  ;;  %v1461_v34 = vld [vmem:[#allocation5 + $0x228] sm:$0xff] }
 0x125   : > { %4860 = vmatpush3.msra.mxu1 %v1343_v37  ;;  %v1005_v40 = vld [vmem:[#allocation3 + $0x10] sm:$0xff]  ;;  %4829 = vmatprep.subr.mxu0 %v1229_v2 }
 0x126   : > { %4861 = vmatprep.subr.mxu1 %v1342_v38  ;;  %4816 = vmatprep.mubr.f32.mxu1 %v1005_v40  ;;  %v1215_v3 = vld [vmem:[#allocation3 + $0xa] sm:$0xff]  ;;  %v1457_v40 = vld [vmem:[#allocation5 + $0x208] sm:$0xff] }
 0x127   : > { %4862 = vmatpush3.msra.mxu1 %v1342_v38  ;;  %4851 = vmatprep.mubr.f32.mxu0 %v1214_v39  ;;  %v1325_v5 = vld [vmem:[#allocation3 + $0xb] sm:$0xff]  ;;  %v1458_v38 = vld [vmem:[#allocation5 + $0x210] sm:$0xff] }
 0x128   : > { %4863 = vmatprep.subr.mxu1 %v1341_v41  ;;  %4830 = vmatpush3.msra.mxu0 %v1229_v2  ;;  %v1477_v37 = vld [vmem:[#allocation5 + $0x280] sm:$0xff]  ;;  %v1459_v2 = vld [vmem:[#allocation5 + $0x218] sm:$0xff] }
 0x129   : > { %4864 = vmatpush3.msra.mxu1 %v1341_v41  ;;  %v1006_v44 = vld [vmem:[#allocation3 + $0x18] sm:$0xff]  ;;  %4831 = vmatprep.subr.mxu0 %v1228_v42  ;;  %v1683_v39 = vld [vmem:[#allocation5 + $0x378] sm:$0xff]  ;;  %v1456_v41 = vld [vmem:[#allocation5 + $0x200] sm:$0xff] }
 0x12a   : > { %4865 = vmatprep.subr.mxu1 %v1340_v43  ;;  %4817 = vmatmul.mubr.f32.gmra.mxu1 %v1006_v44  ;;  %v1216_v4 = vld [vmem:[#allocation3 + $0x12] sm:$0xff]  ;;  %v1217_v8 = vld [vmem:[#allocation3 + $0x1a] sm:$0xff] }
 0x12b   : > { %4866 = vmatpush3.msra.mxu1 %v1340_v43  ;;  %4889 = vmatprep.mubr.f32.mxu1 %v1324_v45  ;;  %v1326_v7 = vld [vmem:[#allocation3 + $0x13] sm:$0xff]  ;;  %v1327_v9 = vld [vmem:[#allocation3 + $0x1b] sm:$0xff] }
 0x12c   : > { %4867 = vmatprep.subr.mxu1 %v1339_v6  ;;  %4832 = vmatpush3.msra.mxu0 %v1228_v42  ;;  %v5970_v42 = vld [vmem:[#allocation5 + $0x3f8] sm:$0xff] }
 0x12d   : > { %4868 = vmatpush3.msra.mxu1 %v1339_v6  ;;  %4833 = vmatprep.subr.mxu0 %v1227_v46 }
 0x12e   : > { %4869 = vmatprep.subr.mxu1 %v1338_v47  ;;  %4834 = vmatpush3.msra.mxu0 %v1227_v46 }
 0x12f   : > { %4870 = vmatpush3.msra.mxu1 %v1338_v47  ;;  %4835 = vmatprep.subr.mxu0 %v1226_v48 }
 0x130   : > { %4871 = vmatprep.subr.mxu1 %v1337_v49  ;;  %4836 = vmatpush3.msra.mxu0 %v1226_v48 }
 0x131   : > { %4872 = vmatpush3.msra.mxu1 %v1337_v49  ;;  %4837 = vmatprep.subr.mxu0 %v1225_v50 }
 0x132   : > { %4873 = vmatprep.subr.mxu1 %v1336_v51  ;;  %4838 = vmatpush3.msra.mxu0 %v1225_v50 }
 0x133   : > { %4874 = vmatpush3.msra.mxu1 %v1336_v51  ;;  %4839 = vmatprep.subr.mxu0 %v1224_v52 }
 0x134   : > { %4875 = vmatprep.subr.mxu1 %v1335_v53  ;;  %4840 = vmatpush3.msra.mxu0 %v1224_v52 }
 0x135   : > { %4876 = vmatpush3.msra.mxu1 %v1335_v53  ;;  %4841 = vmatprep.subr.mxu0 %v1223_v54 }
 0x136   : > { %4877 = vmatprep.subr.mxu1 %v1334_v55  ;;  %4842 = vmatpush3.msra.mxu0 %v1223_v54 }
 0x137   : > { %4878 = vmatpush3.msra.mxu1 %v1334_v55  ;;  %4843 = vmatprep.subr.mxu0 %v1222_v56 }
 0x138   : > { %4879 = vmatprep.subr.mxu1 %v1333_v57  ;;  %4844 = vmatpush3.msra.mxu0 %v1222_v56  ;;  %v4143_v56 = vld [vmem:[%s6127_s4 + $0x1] ss:$0 sm:$0xff] }
 0x139   : > { %4880 = vmatpush3.msra.mxu1 %v1333_v57  ;;  %4845 = vmatprep.subr.mxu0 %v1221_v58 }
 0x13a   : > { %4881 = vmatprep.subr.mxu1 %v1332_v59  ;;  %4846 = vmatpush3.msra.mxu0 %v1221_v58 }
 0x13b   : > { %4882 = vmatpush3.msra.mxu1 %v1332_v59  ;;  %4847 = vmatprep.subr.mxu0 %v1220_v60 }
 0x13c   : > { %4883 = vmatprep.subr.mxu1 %v1331_v61  ;;  %4848 = vmatpush3.msra.mxu0 %v1220_v60 }
 0x13d   : > { %4884 = vmatpush3.msra.mxu1 %v1331_v61  ;;  %4849 = vmatprep.subr.mxu0 %v1219_v63 }
 0x13e   : > { %4885 = vmatprep.subr.mxu1 %v1330_v0  ;;  %4850 = vmatpush3.msra.mxu0 %v1219_v63 }
 0x13f   : > { %4886 = vmatpush3.msra.mxu1 %v1330_v0  ;;  %4852 = vmatmul.mubr.f32.vlgmr.msra.gmra.mxu0 %v1215_v3 }
 0x140   : > { %4887 = vmatprep.subr.mxu1 %v1329_v1  ;;  %4854 = vmatprep.mubr.f32.mxu0 %v1216_v4 }
 0x141   : > { %4888 = vmatpush3.msra.mxu1 %v1329_v1  ;;  %4895 = vmatprep.subr.mxu0 %v1492_v10 }
 0x142   : > { %4890 = vmatmul.mubr.f32.vlgmr.msra.gmra.mxu1 %v1325_v5  ;;  %4933 = vmatprep.subr.mxu1 %v1471_v11 }
 0x143   : > { %4892 = vmatprep.mubr.f32.mxu1 %v1326_v7  ;;  %4855 = vmatmul.mubr.f32.gmra.mxu0 %v1217_v8 }
 0x144   : > { %4896 = vmatpush3.msra.mxu0 %v1492_v10  ;;  %4934 = vmatpush3.msra.mxu1 %v1471_v11 }
 0x145   : > { %4897 = vmatprep.subr.mxu0 %v1491_v12  ;;  %4935 = vmatprep.subr.mxu1 %v1470_v13 }
 0x146   : > { %4893 = vmatmul.mubr.f32.gmra.mxu1 %v1327_v9  ;;  %4898 = vmatpush3.msra.mxu0 %v1491_v12 }
 0x147   : > { %4936 = vmatpush3.msra.mxu1 %v1470_v13  ;;  %4899 = vmatprep.subr.mxu0 %v1490_v14 }
 0x148   : > { %4937 = vmatprep.subr.mxu1 %v1469_v15  ;;  %4900 = vmatpush3.msra.mxu0 %v1490_v14 }
 0x149   : > { %4938 = vmatpush3.msra.mxu1 %v1469_v15  ;;  %4901 = vmatprep.subr.mxu0 %v1489_v16 }
 0x14a   : > { %4939 = vmatprep.subr.mxu1 %v1468_v17  ;;  %4902 = vmatpush3.msra.mxu0 %v1489_v16 }
 0x14b   : > { %4940 = vmatpush3.msra.mxu1 %v1468_v17  ;;  %4903 = vmatprep.subr.mxu0 %v1488_v18  ;;  %v1682_v17 = vld [vmem:[#allocation5 + $0x370] sm:$0xff] }
 0x14c   : > { %4941 = vmatprep.subr.mxu1 %v1467_v19  ;;  %4904 = vmatpush3.msra.mxu0 %v1488_v18 }
 0x14d   : > { %4942 = vmatpush3.msra.mxu1 %v1467_v19  ;;  %4905 = vmatprep.subr.mxu0 %v1487_v20  ;;  %v1681_v19 = vld [vmem:[#allocation5 + $0x368] sm:$0xff] }
 0x14e   : > { %4943 = vmatprep.subr.mxu1 %v1466_v21  ;;  %4906 = vmatpush3.msra.mxu0 %v1487_v20  ;;  %v1680_v20 = vld [vmem:[#allocation5 + $0x360] sm:$0xff] }
 0x14f   : > { %4944 = vmatpush3.msra.mxu1 %v1466_v21  ;;  %4907 = vmatprep.subr.mxu0 %v1486_v22  ;;  %v1679_v21 = vld [vmem:[#allocation5 + $0x358] sm:$0xff] }
 0x150   : > { %4945 = vmatprep.subr.mxu1 %v1465_v23  ;;  %4908 = vmatpush3.msra.mxu0 %v1486_v22 }
 0x151   : > { %4946 = vmatpush3.msra.mxu1 %v1465_v23  ;;  %4909 = vmatprep.subr.mxu0 %v1485_v24 }
 0x152   : > { %4910 = vmatpush3.msra.mxu0 %v1485_v24  ;;  %4947 = vmatprep.subr.mxu1 %v1464_v29 }
 0x153   : > { %4911 = vmatprep.subr.mxu0 %v1484_v25  ;;  %4948 = vmatpush3.msra.mxu1 %v1464_v29 }
 0x154   : > { %4912 = vmatpush3.msra.mxu0 %v1484_v25  ;;  %4949 = vmatprep.subr.mxu1 %v1463_v28  ;;  %v1792_v25 = vld [vmem:[#allocation5 + $0x3f0] sm:$0xff] }
 0x155   : > { %4913 = vmatprep.subr.mxu0 %v1483_v26  ;;  %4950 = vmatpush3.msra.mxu1 %v1463_v28  ;;  %v1790_v28 = vld [vmem:[#allocation5 + $0x3e0] sm:$0xff] }
 0x156   : > { %4914 = vmatpush3.msra.mxu0 %v1483_v26  ;;  %4951 = vmatprep.subr.mxu1 %v1462_v32 }
 0x157   : > { %4915 = vmatprep.subr.mxu0 %v1482_v27  ;;  %4952 = vmatpush3.msra.mxu1 %v1462_v32 }
 0x158   : > { %4916 = vmatpush3.msra.mxu0 %v1482_v27  ;;  %4953 = vmatprep.subr.mxu1 %v1461_v34 }
 0x159   : > { %4917 = vmatprep.subr.mxu0 %v1481_v30  ;;  %4954 = vmatpush3.msra.mxu1 %v1461_v34 }
 0x15a   : > { %4918 = vmatpush3.msra.mxu0 %v1481_v30  ;;  %4955 = vmatprep.subr.mxu1 %v1460_v36  ;;  %v1791_v30 = vld [vmem:[#allocation5 + $0x3e8] sm:$0xff] }
 0x15b   : > { %4919 = vmatprep.subr.mxu0 %v1480_v31  ;;  %4956 = vmatpush3.msra.mxu1 %v1460_v36 }
 0x15c   : > { %4920 = vmatpush3.msra.mxu0 %v1480_v31  ;;  %4957 = vmatprep.subr.mxu1 %v1459_v2  ;;  %v1678_v31 = vld [vmem:[#allocation5 + $0x350] sm:$0xff] }
 0x15d   : > { %4921 = vmatprep.subr.mxu0 %v1479_v33  ;;  %4958 = vmatpush3.msra.mxu1 %v1459_v2  ;;  %v1789_v2 = vld [vmem:[#allocation5 + $0x3d8] sm:$0xff] }
 0x15e   : > { %4922 = vmatpush3.msra.mxu0 %v1479_v33  ;;  %4959 = vmatprep.subr.mxu1 %v1458_v38 }
 0x15f   : > { %4923 = vmatprep.subr.mxu0 %v1478_v35  ;;  %4960 = vmatpush3.msra.mxu1 %v1458_v38  ;;  %v1677_v38 = vld [vmem:[#allocation5 + $0x348] sm:$0xff] }
 0x160   : > { %4924 = vmatpush3.msra.mxu0 %v1478_v35  ;;  %4961 = vmatprep.subr.mxu1 %v1457_v40 }
 0x161   : > { %4925 = vmatprep.subr.mxu0 %v1477_v37  ;;  %4962 = vmatpush3.msra.mxu1 %v1457_v40  ;;  %v1676_v40 = vld [vmem:[#allocation5 + $0x340] sm:$0xff] }
 0x162   : > { %4926 = vmatpush3.msra.mxu0 %v1477_v37  ;;  %4963 = vmatprep.subr.mxu1 %v1456_v41 }
 0x163   : > { %4971 = vmatprep.subr.mxu0 %v1683_v39  ;;  %4964 = vmatpush3.msra.mxu1 %v1456_v41  ;;  %v1787_v41 = vld [vmem:[#allocation5 + $0x3c8] sm:$0xff] }
 0x164   : > { %5009 = vmatprep.subr.mxu1 %v5970_v42 }
 0x1da   : > { %v4777_v43 = vpop.f32.mrf.mxu0 }
 0x1dc   : > { %v1110_v6 = vpop.f32.mrf.mxu0 }
 0x1e2   : > { %v4815_v44 = vpop.f32.mrf.mxu1 }
 0x1e3   : > { %v4780_v45 = vpop.f32.mrf.mxu0  ;;  %v1201_v49 = vadd.f32 %v4815_v44, %v4777_v43  ;;  %v1786_v43 = vld [vmem:[#allocation5 + $0x3c0] sm:$0xff]  ;;  %v1674_v44 = vld [vmem:[#allocation5 + $0x330] sm:$0xff] }
 0x1e4   : > { %v1195_v46 = vpop.f32.mrf.mxu1 }
 0x1e5   : > { %v1120_v48 = vpop.f32.mrf.mxu0  ;;  %v1196_v52 = vadd.f32 %v1195_v46, %v1110_v6  ;;  %v1785_v6 = vld [vmem:[#allocation5 + $0x3b8] sm:$0xff]  ;;  %v1784_v46 = vld [vmem:[#allocation5 + $0x3b0] sm:$0xff] }
 0x1ea   : > { %v4818_v47 = vpop.f32.mrf.mxu1 }
 0x1eb   : > { %v1211_v57 = vadd.f32 %v4818_v47, %v4780_v45  ;;  %v1673_v45 = vld [vmem:[#allocation5 + $0x328] sm:$0xff]  ;;  %v1672_v47 = vld [vmem:[#allocation5 + $0x320] sm:$0xff] }
 0x1ec   : > { %v1205_v51 = vpop.f32.mrf.mxu1 }
 0x1ed   : > { %v1206_v63 = vadd.f32 %v1205_v51, %v1120_v48  ;;  %v1783_v48 = vld [vmem:[#allocation5 + $0x3a8] sm:$0xff]  ;;  %v1670_v51 = vld [vmem:[#allocation5 + $0x310] sm:$0xff] }
 0x1ff   : > { %v4853_v50 = vpop.f32.mrf.mxu0 }
 0x200   : > { %v1321_v53 = vadd.f32 %v4853_v50, %v1201_v49  ;;  %v1671_v49 = vld [vmem:[#allocation5 + $0x318] sm:$0xff]  ;;  %v1782_v50 = vld [vmem:[#allocation5 + $0x3a0] sm:$0xff] }
 0x201   : > { %v1301_v54 = vpop.f32.mrf.mxu0 }
 0x202   : > { %v4891_v55 = vpop.f32.mrf.mxu1  ;;  %v1320_v59 = vadd.f32 %v1301_v54, %v1196_v52  ;;  %v1781_v52 = vld [vmem:[#allocation5 + $0x398] sm:$0xff]  ;;  %v1780_v54 = vld [vmem:[#allocation5 + $0x390] sm:$0xff] }
 0x203   : > { %v1431_v58 = vadd.f32 %v4891_v55, %v1321_v53  ;;  %v4856_v60 = vpop.f32.mrf.mxu0  ;;  %v1669_v53 = vld [vmem:[#allocation5 + $0x308] sm:$0xff]  ;;  %v1668_v55 = vld [vmem:[#allocation5 + $0x300] sm:$0xff] }
 0x204   : > { %v1411_v61 = vpop.f32.mrf.mxu1  ;;  %v1323_v3 = vadd.f32 %v4856_v60, %v1211_v57  ;;  %v1778_v57 = vld [vmem:[#allocation5 + $0x380] sm:$0xff]  ;;  %v1940_v60 = vld [vmem:[#allocation5 + $0x4f0] sm:$0xff] }
 0x205   : > { %v1440_v0 = vadd.f32 %v4143_v56, %v1431_v58  ;;  %v1430_v1 = vadd.f32 %v1411_v61, %v1320_v59  ;;  %v1311_v4 = vpop.f32.mrf.mxu0  ;;  %v1941_v58 = vld [vmem:[#allocation5 + $0x4f8] sm:$0xff]  ;;  %v1919_v61 = vld [vmem:[#allocation5 + $0x470] sm:$0xff] }
 0x206   : > { %v4894_v5 = vpop.f32.mrf.mxu1  ;;  %v1322_v10 = vadd.f32 %v1311_v4, %v1206_v63  ;;  %v1920_v59 = vld [vmem:[#allocation5 + $0x478] sm:$0xff]  ;;  %v1939_v63 = vld [vmem:[#allocation5 + $0x4e8] sm:$0xff] }
 0x207   : > { %v1444_v7 = vmax.f32 %v1440_v0, 0.0  ;;  %v1439_v8 = vadd.f32 %v4143_v56, %v1430_v1  ;;  %v1433_v9 = vadd.f32 %v4894_v5, %v1323_v3  ;;  %v1918_v0 = vld [vmem:[#allocation5 + $0x468] sm:$0xff]  ;;  %v1938_v1 = vld [vmem:[#allocation5 + $0x4e0] sm:$0xff]  ;;  %v1937_v4 = vld [vmem:[#allocation5 + $0x4d8] sm:$0xff] }
 0x208   : > { %v1421_v11 = vpop.f32.mrf.mxu1  ;;  %v1917_v3 = vld [vmem:[#allocation5 + $0x460] sm:$0xff]  ;;  %v1916_v5 = vld [vmem:[#allocation5 + $0x458] sm:$0xff] }
 0x209   : > { %1448 = vst [vmem:[#allocation4 + $0x9] sm:$0xff] %v1444_v7  ;;  %v1443_v12 = vmax.f32 %v1439_v8, 0.0  ;;  %v1442_v13 = vadd.f32 %v4143_v56, %v1433_v9  ;;  %v1432_v14 = vadd.f32 %v1421_v11, %v1322_v10  ;;  %v1915_v8 = vld [vmem:[#allocation5 + $0x450] sm:$0xff]  ;;  %v1935_v9 = vld [vmem:[#allocation5 + $0x4c8] sm:$0xff]  ;;  %v1934_v11 = vld [vmem:[#allocation5 + $0x4c0] sm:$0xff] }
 0x20a   : > { %v1914_v10 = vld [vmem:[#allocation5 + $0x448] sm:$0xff] }
 0x20b   : > { %1447 = vst [vmem:[#allocation4 + $0x1] sm:$0xff] %v1443_v12  ;;  %v1446_v15 = vmax.f32 %v1442_v13, 0.0  ;;  %v1441_v16 = vadd.f32 %v4143_v56, %v1432_v14  ;;  %4927 = vmatprep.mubr.f32.mxu0 %v1443_v12  ;;  %v1779_v56 = vld [vmem:[#allocation5 + $0x388] sm:$0xff]  ;;  %v1933_v12 = vld [vmem:[#allocation5 + $0x4b8] sm:$0xff]  ;;  %v1932_v13 = vld [vmem:[#allocation5 + $0x4b0] sm:$0xff] }
 0x20c   : > { %4928 = vmatmul.mubr.f32.vlgmr.msra.gmra.mxu0 %v1444_v7  ;;  %v1936_v7 = vld [vmem:[#allocation5 + $0x4d0] sm:$0xff]  ;;  %v1931_v14 = vld [vmem:[#allocation5 + $0x4a8] sm:$0xff] }
 0x20d   : > { %1450 = vst [vmem:[#allocation4 + $0x19] sm:$0xff] %v1446_v15  ;;  %v1445_v18 = vmax.f32 %v1441_v16, 0.0  ;;  %4972 = vmatpush3.msra.mxu0 %v1683_v39  ;;  %v1788_v39 = vld [vmem:[#allocation5 + $0x3d0] sm:$0xff]  ;;  %v1930_v16 = vld [vmem:[#allocation5 + $0x4a0] sm:$0xff] }
 0x20e   : > { %4973 = vmatprep.subr.mxu0 %v1682_v17 }
 0x20f   : > { %1449 = vst [vmem:[#allocation4 + $0x11] sm:$0xff] %v1445_v18  ;;  %4974 = vmatpush3.msra.mxu0 %v1682_v17  ;;  %4930 = vmatprep.mubr.f32.mxu0 %v1445_v18  ;;  %v1912_v17 = vld [vmem:[#allocation5 + $0x438] sm:$0xff] }
 0x210   : > { %4975 = vmatprep.subr.mxu0 %v1681_v19  ;;  %4931 = vmatmul.mubr.f32.gmra.mxu0 %v1446_v15  ;;  %v1913_v15 = vld [vmem:[#allocation5 + $0x440] sm:$0xff]  ;;  %v1929_v18 = vld [vmem:[#allocation5 + $0x498] sm:$0xff] }
 0x211   : > { %4976 = vmatpush3.msra.mxu0 %v1681_v19  ;;  %v1911_v19 = vld [vmem:[#allocation5 + $0x430] sm:$0xff] }
 0x212   : > { %v1451_v22 = vld [vmem:[#allocation4] sm:$0xff]  ;;  %v1452_v23 = vld [vmem:[#allocation4 + $0x8] sm:$0xff]  ;;  %4977 = vmatprep.subr.mxu0 %v1680_v20 }
 0x213   : > { %v1663_v24 = vld [vmem:[#allocation4 + $0x2] sm:$0xff]  ;;  %4965 = vmatprep.mubr.f32.mxu1 %v1451_v22  ;;  %4978 = vmatpush3.msra.mxu0 %v1680_v20  ;;  %v1928_v20 = vld [vmem:[#allocation5 + $0x490] sm:$0xff]  ;;  %v1927_v22 = vld [vmem:[#allocation5 + $0x488] sm:$0xff] }
 0x214   : > { %5003 = vmatprep.mubr.f32.mxu0 %v1663_v24  ;;  %v1773_v26 = vld [vmem:[#allocation4 + $0x3] sm:$0xff]  ;;  %4966 = vmatmul.mubr.f32.vlgmr.msra.gmra.mxu1 %v1452_v23  ;;  %v5977_v27 = vld [vmem:[#allocation4 + $0x1a] sm:$0xff] }
 0x215   : > { %2363 = vst [vmem:[#allocation4] sm:$0xff] %v5758_v62  ;;  %v5979_v29 = vld [vmem:[#allocation4 + $0x1b] sm:$0xff]  ;;  %5010 = vmatpush3.msra.mxu1 %v5970_v42  ;;  %4979 = vmatprep.subr.mxu0 %v1679_v21  ;;  %v1909_v23 = vld [vmem:[#allocation5 + $0x420] sm:$0xff] }
 0x216   : > { %2367 = vst [vmem:[#allocation4 + $0x20] sm:$0xff] %v5758_v62  ;;  %5011 = vmatprep.subr.mxu1 %v1792_v25  ;;  %v1453_v32 = vld [vmem:[#allocation4 + $0x10] sm:$0xff]  ;;  %v1454_v33 = vld [vmem:[#allocation4 + $0x18] sm:$0xff]  ;;  %4980 = vmatpush3.msra.mxu0 %v1679_v21  ;;  %v1675_v42 = vld [vmem:[#allocation5 + $0x338] sm:$0xff] }
 0x217   : > { %v5983_v34 = vld [vmem:[#allocation4 + $0xa] sm:$0xff]  ;;  %5012 = vmatpush3.msra.mxu1 %v1792_v25  ;;  %4968 = vmatprep.mubr.f32.mxu1 %v1453_v32  ;;  %v5987_v36 = vld [vmem:[#allocation4 + $0x12] sm:$0xff]  ;;  %v1908_v25 = vld [vmem:[#allocation5 + $0x418] sm:$0xff] }
 0x218   : > { %v5985_v35 = vld [vmem:[#allocation4 + $0xb] sm:$0xff]  ;;  %v5989_v37 = vld [vmem:[#allocation4 + $0x13] sm:$0xff]  ;;  %5013 = vmatprep.subr.mxu1 %v1791_v30  ;;  %4969 = vmatmul.mubr.f32.gmra.mxu1 %v1454_v33 }
 0x219   : > { %2364 = vst [vmem:[#allocation4 + $0x8] sm:$0xff] %v5758_v62  ;;  %2365 = vst [vmem:[#allocation4 + $0x10] sm:$0xff] %v5758_v62  ;;  %5014 = vmatpush3.msra.mxu1 %v1791_v30  ;;  %5041 = vmatprep.mubr.f32.mxu1 %v1773_v26  ;;  %v1910_v21 = vld [vmem:[#allocation5 + $0x428] sm:$0xff]  ;;  %v1926_v24 = vld [vmem:[#allocation5 + $0x480] sm:$0xff] }
 0x21a   : > { %2366 = vst [vmem:[#allocation4 + $0x18] sm:$0xff] %v5758_v62  ;;  %5015 = vmatprep.subr.mxu1 %v1790_v28  ;;  %4981 = vmatprep.subr.mxu0 %v1678_v31  ;;  %v2132_v26 = vld [vmem:[#allocation5 + $0x578] sm:$0xff]  ;;  %v1905_v30 = vld [vmem:[#allocation5 + $0x400] sm:$0xff] }
 0x21b   : > { %5016 = vmatpush3.msra.mxu1 %v1790_v28  ;;  %4982 = vmatpush3.msra.mxu0 %v1678_v31  ;;  %v6000_v28 = vld [vmem:[#allocation5 + $0x5f8] sm:$0xff] }
 0x21c   : > { %5017 = vmatprep.subr.mxu1 %v1789_v2  ;;  %4983 = vmatprep.subr.mxu0 %v1677_v38 }
 0x21d   : > { %5018 = vmatpush3.msra.mxu1 %v1789_v2  ;;  %4984 = vmatpush3.msra.mxu0 %v1677_v38 }
 0x21e   : > { %5019 = vmatprep.subr.mxu1 %v1788_v39  ;;  %4985 = vmatprep.subr.mxu0 %v1676_v40 }
 0x21f   : > { %5020 = vmatpush3.msra.mxu1 %v1788_v39  ;;  %4986 = vmatpush3.msra.mxu0 %v1676_v40 }
 0x220   : > { %5021 = vmatprep.subr.mxu1 %v1787_v41  ;;  %4987 = vmatprep.subr.mxu0 %v1675_v42 }
 0x221   : > { %5022 = vmatpush3.msra.mxu1 %v1787_v41  ;;  %4988 = vmatpush3.msra.mxu0 %v1675_v42 }
 0x222   : > { %5023 = vmatprep.subr.mxu1 %v1786_v43  ;;  %4989 = vmatprep.subr.mxu0 %v1674_v44 }
 0x223   : > { %5024 = vmatpush3.msra.mxu1 %v1786_v43  ;;  %4990 = vmatpush3.msra.mxu0 %v1674_v44  ;;  %v4144_v44 = vld [vmem:[%s6127_s4 + $0x2] ss:$0 sm:$0xff] }
 0x224   : > { %5025 = vmatprep.subr.mxu1 %v1785_v6  ;;  %4991 = vmatprep.subr.mxu0 %v1673_v45 }
 0x225   : > { %5026 = vmatpush3.msra.mxu1 %v1785_v6  ;;  %4992 = vmatpush3.msra.mxu0 %v1673_v45 }
 0x226   : > { %5027 = vmatprep.subr.mxu1 %v1784_v46  ;;  %4993 = vmatprep.subr.mxu0 %v1672_v47 }
 0x227   : > { %5028 = vmatpush3.msra.mxu1 %v1784_v46  ;;  %4994 = vmatpush3.msra.mxu0 %v1672_v47 }
 0x228   : > { %5029 = vmatprep.subr.mxu1 %v1783_v48  ;;  %4995 = vmatprep.subr.mxu0 %v1671_v49 }
 0x229   : > { %5030 = vmatpush3.msra.mxu1 %v1783_v48  ;;  %4996 = vmatpush3.msra.mxu0 %v1671_v49 }
 0x22a   : > { %5031 = vmatprep.subr.mxu1 %v1782_v50  ;;  %4997 = vmatprep.subr.mxu0 %v1670_v51 }
 0x22b   : > { %5032 = vmatpush3.msra.mxu1 %v1782_v50  ;;  %4998 = vmatpush3.msra.mxu0 %v1670_v51 }
 0x22c   : > { %5033 = vmatprep.subr.mxu1 %v1781_v52  ;;  %4999 = vmatprep.subr.mxu0 %v1669_v53 }
 0x22d   : > { %5034 = vmatpush3.msra.mxu1 %v1781_v52  ;;  %5000 = vmatpush3.msra.mxu0 %v1669_v53 }
 0x22e   : > { %5035 = vmatprep.subr.mxu1 %v1780_v54  ;;  %5001 = vmatprep.subr.mxu0 %v1668_v55 }
 0x22f   : > { %5036 = vmatpush3.msra.mxu1 %v1780_v54  ;;  %5002 = vmatpush3.msra.mxu0 %v1668_v55 }
 0x230   : > { %5037 = vmatprep.subr.mxu1 %v1779_v56  ;;  %5004 = vmatmul.mubr.f32.vlgmr.msra.gmra.mxu0 %v5983_v34 }
 0x231   : > { %5038 = vmatpush3.msra.mxu1 %v1779_v56  ;;  %5006 = vmatprep.mubr.f32.mxu0 %v5987_v36 }
 0x232   : > { %5039 = vmatprep.subr.mxu1 %v1778_v57  ;;  %5047 = vmatprep.subr.mxu0 %v1941_v58 }
 0x233   : > { %5040 = vmatpush3.msra.mxu1 %v1778_v57  ;;  %5048 = vmatpush3.msra.mxu0 %v1941_v58 }
 0x234   : > { %5042 = vmatmul.mubr.f32.vlgmr.msra.gmra.mxu1 %v5985_v35  ;;  %5007 = vmatmul.mubr.f32.gmra.mxu0 %v5977_v27  ;;  %v1907_v27 = vld [vmem:[#allocation5 + $0x410] sm:$0xff] }
 0x235   : > { %5044 = vmatprep.mubr.f32.mxu1 %v5989_v37  ;;  %5085 = vmatprep.subr.mxu1 %v1920_v59 }
 0x236   : > { %5086 = vmatpush3.msra.mxu1 %v1920_v59  ;;  %5049 = vmatprep.subr.mxu0 %v1940_v60 }
 0x237   : > { %5087 = vmatprep.subr.mxu1 %v1919_v61  ;;  %5050 = vmatpush3.msra.mxu0 %v1940_v60 }
 0x238   : > { %5045 = vmatmul.mubr.f32.gmra.mxu1 %v5979_v29  ;;  %5051 = vmatprep.subr.mxu0 %v1939_v63  ;;  %v1906_v29 = vld [vmem:[#allocation5 + $0x408] sm:$0xff] }
 0x239   : > { %5088 = vmatpush3.msra.mxu1 %v1919_v61  ;;  %5052 = vmatpush3.msra.mxu0 %v1939_v63 }
 0x23a   : > { %5089 = vmatprep.subr.mxu1 %v1918_v0  ;;  %5053 = vmatprep.subr.mxu0 %v1938_v1 }
 0x23b   : > { %5090 = vmatpush3.msra.mxu1 %v1918_v0  ;;  %5054 = vmatpush3.msra.mxu0 %v1938_v1 }
 0x23c   : > { %5091 = vmatprep.subr.mxu1 %v1917_v3  ;;  %5055 = vmatprep.subr.mxu0 %v1937_v4 }
 0x23d   : > { %5092 = vmatpush3.msra.mxu1 %v1917_v3  ;;  %5056 = vmatpush3.msra.mxu0 %v1937_v4  ;;  %v2131_v3 = vld [vmem:[#allocation5 + $0x570] sm:$0xff] }
 0x23e   : > { %5093 = vmatprep.subr.mxu1 %v1916_v5  ;;  %5057 = vmatprep.subr.mxu0 %v1936_v7 }
 0x23f   : > { %5094 = vmatpush3.msra.mxu1 %v1916_v5  ;;  %5058 = vmatpush3.msra.mxu0 %v1936_v7  ;;  %v2130_v5 = vld [vmem:[#allocation5 + $0x568] sm:$0xff]  ;;  %v2129_v7 = vld [vmem:[#allocation5 + $0x560] sm:$0xff] }
 0x240   : > { %5095 = vmatprep.subr.mxu1 %v1915_v8  ;;  %5059 = vmatprep.subr.mxu0 %v1935_v9 }
 0x241   : > { %5096 = vmatpush3.msra.mxu1 %v1915_v8  ;;  %5060 = vmatpush3.msra.mxu0 %v1935_v9  ;;  %v2128_v8 = vld [vmem:[#allocation5 + $0x558] sm:$0xff] }
 0x242   : > { %5097 = vmatprep.subr.mxu1 %v1914_v10  ;;  %5061 = vmatprep.subr.mxu0 %v1934_v11 }
 0x243   : > { %5098 = vmatpush3.msra.mxu1 %v1914_v10  ;;  %5062 = vmatpush3.msra.mxu0 %v1934_v11 }
 0x244   : > { %5063 = vmatprep.subr.mxu0 %v1933_v12  ;;  %5099 = vmatprep.subr.mxu1 %v1913_v15 }
 0x245   : > { %5064 = vmatpush3.msra.mxu0 %v1933_v12  ;;  %5100 = vmatpush3.msra.mxu1 %v1913_v15  ;;  %v2241_v12 = vld [vmem:[#allocation5 + $0x5f0] sm:$0xff] }
 0x246   : > { %5065 = vmatprep.subr.mxu0 %v1932_v13  ;;  %5101 = vmatprep.subr.mxu1 %v1912_v17 }
 0x247   : > { %5066 = vmatpush3.msra.mxu0 %v1932_v13  ;;  %5102 = vmatpush3.msra.mxu1 %v1912_v17  ;;  %v2239_v17 = vld [vmem:[#allocation5 + $0x5e0] sm:$0xff] }
 0x248   : > { %5067 = vmatprep.subr.mxu0 %v1931_v14  ;;  %5103 = vmatprep.subr.mxu1 %v1911_v19 }
 0x249   : > { %5068 = vmatpush3.msra.mxu0 %v1931_v14  ;;  %5104 = vmatpush3.msra.mxu1 %v1911_v19 }
 0x24a   : > { %5069 = vmatprep.subr.mxu0 %v1930_v16  ;;  %5105 = vmatprep.subr.mxu1 %v1910_v21 }
 0x24b   : > { %5070 = vmatpush3.msra.mxu0 %v1930_v16  ;;  %5106 = vmatpush3.msra.mxu1 %v1910_v21  ;;  %v2240_v16 = vld [vmem:[#allocation5 + $0x5e8] sm:$0xff] }
 0x24c   : > { %5071 = vmatprep.subr.mxu0 %v1929_v18  ;;  %5107 = vmatprep.subr.mxu1 %v1909_v23 }
 0x24d   : > { %5072 = vmatpush3.msra.mxu0 %v1929_v18  ;;  %5108 = vmatpush3.msra.mxu1 %v1909_v23  ;;  %v2127_v18 = vld [vmem:[#allocation5 + $0x550] sm:$0xff] }
 0x24e   : > { %5073 = vmatprep.subr.mxu0 %v1928_v20  ;;  %5109 = vmatprep.subr.mxu1 %v1908_v25 }
 0x24f   : > { %5074 = vmatpush3.msra.mxu0 %v1928_v20  ;;  %5110 = vmatpush3.msra.mxu1 %v1908_v25  ;;  %v2238_v25 = vld [vmem:[#allocation5 + $0x5d8] sm:$0xff] }
 0x250   : > { %5075 = vmatprep.subr.mxu0 %v1927_v22  ;;  %5111 = vmatprep.subr.mxu1 %v1907_v27 }
 0x251   : > { %5076 = vmatpush3.msra.mxu0 %v1927_v22  ;;  %5112 = vmatpush3.msra.mxu1 %v1907_v27  ;;  %v2237_v27 = vld [vmem:[#allocation5 + $0x5d0] sm:$0xff] }
 0x252   : > { %5077 = vmatprep.subr.mxu0 %v1926_v24  ;;  %5113 = vmatprep.subr.mxu1 %v1906_v29 }
 0x253   : > { %5078 = vmatpush3.msra.mxu0 %v1926_v24  ;;  %5114 = vmatpush3.msra.mxu1 %v1906_v29  ;;  %v2125_v29 = vld [vmem:[#allocation5 + $0x540] sm:$0xff] }
 0x254   : > { %5123 = vmatprep.subr.mxu0 %v2132_v26  ;;  %5115 = vmatprep.subr.mxu1 %v1905_v30 }
 0x255   : > { %5116 = vmatpush3.msra.mxu1 %v1905_v30  ;;  %v2236_v30 = vld [vmem:[#allocation5 + $0x5c8] sm:$0xff] }
 0x256   : > { %5161 = vmatprep.subr.mxu1 %v6000_v28 }
 0x2cc   : > { %v4929_v31 = vpop.f32.mrf.mxu0 }
 0x2ce   : > { %v1559_v33 = vpop.f32.mrf.mxu0 }
 0x2d0   : > { %v4932_v35 = vpop.f32.mrf.mxu0 }
 0x2d2   : > { %v1569_v37 = vpop.f32.mrf.mxu0 }
 0x2d4   : > { %v4967_v32 = vpop.f32.mrf.mxu1 }
 0x2d5   : > { %v1650_v38 = vadd.f32 %v4967_v32, %v4929_v31  ;;  %v2123_v31 = vld [vmem:[#allocation5 + $0x530] sm:$0xff]  ;;  %v2234_v32 = vld [vmem:[#allocation5 + $0x5b8] sm:$0xff] }
 0x2d6   : > { %v1644_v34 = vpop.f32.mrf.mxu1 }
 0x2d7   : > { %v1645_v41 = vadd.f32 %v1644_v34, %v1559_v33  ;;  %v2122_v33 = vld [vmem:[#allocation5 + $0x528] sm:$0xff]  ;;  %v2233_v34 = vld [vmem:[#allocation5 + $0x5b0] sm:$0xff] }
 0x2d8   : > { %v4970_v36 = vpop.f32.mrf.mxu1 }
 0x2d9   : > { %v1660_v45 = vadd.f32 %v4970_v36, %v4932_v35  ;;  %v2121_v35 = vld [vmem:[#allocation5 + $0x520] sm:$0xff]  ;;  %v2232_v36 = vld [vmem:[#allocation5 + $0x5a8] sm:$0xff] }
 0x2da   : > { %v1654_v39 = vpop.f32.mrf.mxu1 }
 0x2db   : > { %v1655_v50 = vadd.f32 %v1654_v39, %v1569_v37  ;;  %v2120_v37 = vld [vmem:[#allocation5 + $0x518] sm:$0xff] }
 0x2dc   : > { %v2230_v39 = vld [vmem:[#allocation5 + $0x598] sm:$0xff] }
 0x2f0   : > { %v5005_v2 = vpop.f32.mrf.mxu0 }
 0x2f1   : > { %v1770_v42 = vadd.f32 %v5005_v2, %v1650_v38  ;;  %v2231_v2 = vld [vmem:[#allocation5 + $0x5a0] sm:$0xff]  ;;  %v2119_v38 = vld [vmem:[#allocation5 + $0x510] sm:$0xff] }
 0x2f2   : > { %v1750_v40 = vpop.f32.mrf.mxu0 }
 0x2f3   : > { %v1769_v47 = vadd.f32 %v1750_v40, %v1645_v41  ;;  %v2118_v40 = vld [vmem:[#allocation5 + $0x508] sm:$0xff]  ;;  %v2229_v41 = vld [vmem:[#allocation5 + $0x590] sm:$0xff] }
 0x2f4   : > { %v5043_v43 = vpop.f32.mrf.mxu1  ;;  %v5008_v6 = vpop.f32.mrf.mxu0 }
 0x2f5   : > { %v1880_v46 = vadd.f32 %v5043_v43, %v1770_v42  ;;  %v1772_v53 = vadd.f32 %v5008_v6, %v1660_v45  ;;  %v2117_v42 = vld [vmem:[#allocation5 + $0x500] sm:$0xff]  ;;  %v2228_v43 = vld [vmem:[#allocation5 + $0x588] sm:$0xff]  ;;  %v2372_v45 = vld [vmem:[%s6128_s5] sm:$0xf] }
 0x2f6   : > { %v1860_v48 = vpop.f32.mrf.mxu1  ;;  %v1760_v49 = vpop.f32.mrf.mxu0  ;;  %v2227_v6 = vld [vmem:[#allocation5 + $0x580] sm:$0xff] }
 0x2f7   : > { %v1889_v51 = vadd.f32 %v4144_v44, %v1880_v46  ;;  %v1879_v52 = vadd.f32 %v1860_v48, %v1769_v47  ;;  %v1771_v58 = vadd.f32 %v1760_v49, %v1655_v50  ;;  %v4157_v46 = vld [vmem:[%s6128_s5 + $0x8] sm:$0xf]  ;;  %v4163_v48 = vld [vmem:[%s6128_s5 + $0xc] sm:$0xf]  ;;  %v2368_v49 = vld [vmem:[%s6036_s26] sm:$0xff] }
 0x2f8   : > { %v5046_v54 = vpop.f32.mrf.mxu1  ;;  %v2373_v47 = vld [vmem:[%s6036_s26 + $0x1] sm:$0xff]  ;;  %v2374_v50 = vld [vmem:[%s6036_s26 + $0x9] sm:$0xff] }
 0x2f9   : > { %v1893_v55 = vmax.f32 %v1889_v51, 0.0  ;;  %v1888_v56 = vadd.f32 %v4144_v44, %v1879_v52  ;;  %v1882_v57 = vadd.f32 %v5046_v54, %v1772_v53  ;;  %v2375_v51 = vld [vmem:[%s6036_s26 + $0x11] sm:$0xff]  ;;  %v2369_v52 = vld [vmem:[%s6036_s26 + $0x8] sm:$0xff]  ;;  %v2376_v54 = vld [vmem:[%s6036_s26 + $0x19] sm:$0xff] }
 0x2fa   : > { %v1870_v59 = vpop.f32.mrf.mxu1  ;;  %v2370_v53 = vld [vmem:[%s6036_s26 + $0x10] sm:$0xff] }
 0x2fb   : > { %1897 = vst [vmem:[#allocation3 + $0x9] sm:$0xff] %v1893_v55  ;;  %v1892_v60 = vmax.f32 %v1888_v56, 0.0  ;;  %v1891_v61 = vadd.f32 %v4144_v44, %v1882_v57  ;;  %v1881_v63 = vadd.f32 %v1870_v59, %v1771_v58  ;;  %v2371_v56 = vld [vmem:[%s6036_s26 + $0x18] sm:$0xff]  ;;  %v2691_v57 = vld [vmem:[%s6036_s26 + $0x3] sm:$0xff] }
 0x2fc   : > { %v2582_v58 = vld [vmem:[%s6036_s26 + $0xa] sm:$0xff]  ;;  %v2583_v59 = vld [vmem:[%s6036_s26 + $0x12] sm:$0xff] }
 0x2fd   : > { %1896 = vst [vmem:[#allocation3 + $0x1] sm:$0xff] %v1892_v60  ;;  %v1895_v0 = vmax.f32 %v1891_v61, 0.0  ;;  %v1890_v1 = vadd.f32 %v4144_v44, %v1881_v63  ;;  %5079 = vmatprep.mubr.f32.mxu0 %v1892_v60  ;;  %v4146_v44 = vld [vmem:[%s6128_s5 + $0x4] sm:$0xf]  ;;  %v2692_v60 = vld [vmem:[%s6036_s26 + $0xb] sm:$0xff]  ;;  %v2693_v61 = vld [vmem:[%s6036_s26 + $0x13] sm:$0xff] }
 0x2fe   : > { %5080 = vmatmul.mubr.f32.vlgmr.msra.gmra.mxu0 %v1893_v55  ;;  %v2581_v55 = vld [vmem:[%s6036_s26 + $0x2] sm:$0xff]  ;;  %v2584_v63 = vld [vmem:[%s6036_s26 + $0x1a] sm:$0xff] }
 0x2ff   : > { %1899 = vst [vmem:[#allocation3 + $0x19] sm:$0xff] %v1895_v0  ;;  %v1894_v4 = vmax.f32 %v1890_v1, 0.0  ;;  %5124 = vmatpush3.msra.mxu0 %v2132_v26  ;;  %v2126_v26 = vld [vmem:[#allocation5 + $0x548] sm:$0xff]  ;;  %v2862_v1 = vld [vmem:[#allocation7 + $0xf8] sm:$0xff] }
 0x300   : > { %5125 = vmatprep.subr.mxu0 %v2131_v3 }
 0x301   : > { %1898 = vst [vmem:[#allocation3 + $0x11] sm:$0xff] %v1894_v4  ;;  %5126 = vmatpush3.msra.mxu0 %v2131_v3  ;;  %5082 = vmatprep.mubr.f32.mxu0 %v1894_v4  ;;  %v2861_v3 = vld [vmem:[#allocation7 + $0xf0] sm:$0xff]  ;;  %v2843_v4 = vld [vmem:[#allocation7 + $0x78] sm:$0xff] }
 0x302   : > { %5127 = vmatprep.subr.mxu0 %v2130_v5  ;;  %5083 = vmatmul.mubr.f32.gmra.mxu0 %v1895_v0  ;;  %v2694_v0 = vld [vmem:[%s6036_s26 + $0x1b] sm:$0xff] }
 0x303   : > { %5128 = vmatpush3.msra.mxu0 %v2130_v5  ;;  %v2860_v5 = vld [vmem:[#allocation7 + $0xe8] sm:$0xff] }
 0x304   : > { %v1900_v9 = vld [vmem:[#allocation3] sm:$0xff]  ;;  %v1901_v10 = vld [vmem:[#allocation3 + $0x8] sm:$0xff]  ;;  %5129 = vmatprep.subr.mxu0 %v2129_v7 }
 0x305   : > { %v2112_v11 = vld [vmem:[#allocation3 + $0x2] sm:$0xff]  ;;  %5117 = vmatprep.mubr.f32.mxu1 %v1900_v9  ;;  %5130 = vmatpush3.msra.mxu0 %v2129_v7  ;;  %v2859_v7 = vld [vmem:[#allocation7 + $0xe0] sm:$0xff] }
 0x306   : > { %5155 = vmatprep.mubr.f32.mxu0 %v2112_v11  ;;  %v2222_v13 = vld [vmem:[#allocation3 + $0x3] sm:$0xff]  ;;  %5118 = vmatmul.mubr.f32.vlgmr.msra.gmra.mxu1 %v1901_v10  ;;  %v6007_v14 = vld [vmem:[#allocation3 + $0x1a] sm:$0xff] }
 0x307   : > { %2358 = vst [vmem:[#allocation3] sm:$0xff] %v5758_v62  ;;  %v6009_v15 = vld [vmem:[#allocation3 + $0x1b] sm:$0xff]  ;;  %5162 = vmatpush3.msra.mxu1 %v6000_v28  ;;  %5131 = vmatprep.subr.mxu0 %v2128_v8  ;;  %v2124_v28 = vld [vmem:[#allocation5 + $0x538] sm:$0xff] }
 0x308   : > { %2362 = vst [vmem:[#allocation3 + $0x20] sm:$0xff] %v5758_v62  ;;  %5163 = vmatprep.subr.mxu1 %v2241_v12  ;;  %v1902_v19 = vld [vmem:[#allocation3 + $0x10] sm:$0xff]  ;;  %v1903_v20 = vld [vmem:[#allocation3 + $0x18] sm:$0xff]  ;;  %5132 = vmatpush3.msra.mxu0 %v2128_v8  ;;  %v2858_v8 = vld [vmem:[#allocation7 + $0xd8] sm:$0xff] }
 0x309   : > { %v6013_v21 = vld [vmem:[#allocation3 + $0xa] sm:$0xff]  ;;  %5164 = vmatpush3.msra.mxu1 %v2241_v12  ;;  %5120 = vmatprep.mubr.f32.mxu1 %v1902_v19  ;;  %v6017_v23 = vld [vmem:[#allocation3 + $0x12] sm:$0xff]  ;;  %v2842_v9 = vld [vmem:[#allocation7 + $0x70] sm:$0xff] }
 0x30a   : > { %v6015_v22 = vld [vmem:[#allocation3 + $0xb] sm:$0xff]  ;;  %v6019_v24 = vld [vmem:[#allocation3 + $0x13] sm:$0xff]  ;;  %5165 = vmatprep.subr.mxu1 %v2240_v16  ;;  %5121 = vmatmul.mubr.f32.gmra.mxu1 %v1903_v20  ;;  %v2857_v10 = vld [vmem:[#allocation7 + $0xd0] sm:$0xff] }
 0x30b   : > { %2359 = vst [vmem:[#allocation3 + $0x8] sm:$0xff] %v5758_v62  ;;  %2360 = vst [vmem:[#allocation3 + $0x10] sm:$0xff] %v5758_v62  ;;  %5166 = vmatpush3.msra.mxu1 %v2240_v16  ;;  %5193 = vmatprep.mubr.f32.mxu1 %v2222_v13  ;;  %v2841_v11 = vld [vmem:[#allocation7 + $0x68] sm:$0xff]  ;;  %v2840_v13 = vld [vmem:[#allocation7 + $0x60] sm:$0xff] }
 0x30c   : > { %2361 = vst [vmem:[#allocation3 + $0x18] sm:$0xff] %v5758_v62  ;;  %5167 = vmatprep.subr.mxu1 %v2239_v17  ;;  %5133 = vmatprep.subr.mxu0 %v2127_v18  ;;  %v2235_v62 = vld [vmem:[#allocation5 + $0x5c0] sm:$0xff]  ;;  %v2856_v12 = vld [vmem:[#allocation7 + $0xc8] sm:$0xff]  ;;  %v2854_v16 = vld [vmem:[#allocation7 + $0xb8] sm:$0xff] }
 0x30d   : > { %5168 = vmatpush3.msra.mxu1 %v2239_v17  ;;  %5134 = vmatpush3.msra.mxu0 %v2127_v18  ;;  %v2838_v17 = vld [vmem:[#allocation7 + $0x50] sm:$0xff]  ;;  %v2837_v19 = vld [vmem:[#allocation7 + $0x48] sm:$0xff] }
 0x30e   : > { %5169 = vmatprep.subr.mxu1 %v2238_v25  ;;  %5135 = vmatprep.subr.mxu0 %v2126_v26  ;;  %v2853_v18 = vld [vmem:[#allocation7 + $0xb0] sm:$0xff]  ;;  %v2852_v20 = vld [vmem:[#allocation7 + $0xa8] sm:$0xff] }
 0x30f   : > { %5170 = vmatpush3.msra.mxu1 %v2238_v25  ;;  %5136 = vmatpush3.msra.mxu0 %v2126_v26  ;;  %v2834_v25 = vld [vmem:[#allocation7 + $0x30] sm:$0xff] }
 0x310   : > { %5171 = vmatprep.subr.mxu1 %v2237_v27  ;;  %5137 = vmatprep.subr.mxu0 %v2125_v29  ;;  %v2849_v26 = vld [vmem:[#allocation7 + $0x90] sm:$0xff] }
 0x311   : > { %5172 = vmatpush3.msra.mxu1 %v2237_v27  ;;  %5138 = vmatpush3.msra.mxu0 %v2125_v29  ;;  %v2833_v27 = vld [vmem:[#allocation7 + $0x28] sm:$0xff] }
 0x312   : > { %5173 = vmatprep.subr.mxu1 %v2236_v30  ;;  %5139 = vmatprep.subr.mxu0 %v2124_v28  ;;  %v2848_v29 = vld [vmem:[#allocation7 + $0x88] sm:$0xff] }
 0x313   : > { %5174 = vmatpush3.msra.mxu1 %v2236_v30  ;;  %5140 = vmatpush3.msra.mxu0 %v2124_v28  ;;  %v2832_v30 = vld [vmem:[#allocation7 + $0x20] sm:$0xff]  ;;  %v2831_v28 = vld [vmem:[#allocation7 + $0x18] sm:$0xff] }
 0x314   : > { %5175 = vmatprep.subr.mxu1 %v2235_v62  ;;  %5141 = vmatprep.subr.mxu0 %v2123_v31 }
 0x315   : > { %5176 = vmatpush3.msra.mxu1 %v2235_v62  ;;  %5142 = vmatpush3.msra.mxu0 %v2123_v31  ;;  %v2847_v62 = vld [vmem:[#allocation7 + $0x80] sm:$0xff]  ;;  %v2830_v31 = vld [vmem:[#allocation7 + $0x10] sm:$0xff] }
 0x316   : > { %5177 = vmatprep.subr.mxu1 %v2234_v32  ;;  %5143 = vmatprep.subr.mxu0 %v2122_v33 }
 0x317   : > { %5178 = vmatpush3.msra.mxu1 %v2234_v32  ;;  %5144 = vmatpush3.msra.mxu0 %v2122_v33  ;;  %v6088_v32 = vld [vmem:[#allocation7 + $0x178] sm:$0xff]  ;;  %v2829_v33 = vld [vmem:[#allocation7 + $0x8] sm:$0xff] }
 0x318   : > { %5179 = vmatprep.subr.mxu1 %v2233_v34  ;;  %5145 = vmatprep.subr.mxu0 %v2121_v35 }
 0x319   : > { %5180 = vmatpush3.msra.mxu1 %v2233_v34  ;;  %5146 = vmatpush3.msra.mxu0 %v2121_v35  ;;  %v2828_v34 = vld [vmem:[#allocation7] sm:$0xff]  ;;  %v6091_v35 = vld [vmem:[#allocation7 + $0x1f8] sm:$0xff] }
 0x31a   : > { %5181 = vmatprep.subr.mxu1 %v2232_v36  ;;  %5147 = vmatprep.subr.mxu0 %v2120_v37 }
 0x31b   : > { %5182 = vmatpush3.msra.mxu1 %v2232_v36  ;;  %5148 = vmatpush3.msra.mxu0 %v2120_v37 }
 0x31c   : > { %5183 = vmatprep.subr.mxu1 %v2231_v2  ;;  %5149 = vmatprep.subr.mxu0 %v2119_v38 }
 0x31d   : > { %5184 = vmatpush3.msra.mxu1 %v2231_v2  ;;  %5150 = vmatpush3.msra.mxu0 %v2119_v38 }
 0x31e   : > { %5185 = vmatprep.subr.mxu1 %v2230_v39  ;;  %5151 = vmatprep.subr.mxu0 %v2118_v40 }
 0x31f   : > { %5186 = vmatpush3.msra.mxu1 %v2230_v39  ;;  %5152 = vmatpush3.msra.mxu0 %v2118_v40 }
 0x320   : > { %5187 = vmatprep.subr.mxu1 %v2229_v41  ;;  %5153 = vmatprep.subr.mxu0 %v2117_v42 }
 0x321   : > { %5188 = vmatpush3.msra.mxu1 %v2229_v41  ;;  %5154 = vmatpush3.msra.mxu0 %v2117_v42 }
 0x322   : > { %5189 = vmatprep.subr.mxu1 %v2228_v43  ;;  %5156 = vmatmul.mubr.f32.vlgmr.msra.gmra.mxu0 %v6013_v21  ;;  %v2836_v21 = vld [vmem:[#allocation7 + $0x40] sm:$0xff] }
 0x323   : > { %5190 = vmatpush3.msra.mxu1 %v2228_v43  ;;  %5199 = vmatprep.subr.msk.mxu0 %vm2392_vm2, %v4146_v44 }
 0x324   : > { %5191 = vmatprep.subr.mxu1 %v2227_v6  ;;  %5158 = vmatprep.mubr.f32.mxu0 %v6017_v23  ;;  %v2835_v23 = vld [vmem:[#allocation7 + $0x38] sm:$0xff] }
 0x325   : > { %5192 = vmatpush3.msra.mxu1 %v2227_v6  ;;  %5200 = vmatpush3.msk.msra.mxu0 %vm2392_vm2, %v4146_v44 }
 0x326   : > { %5194 = vmatmul.mubr.f32.vlgmr.msra.gmra.mxu1 %v6015_v22  ;;  %5207 = vmatprep.subr.msk.mxu1 %vm2392_vm2, %v2372_v45  ;;  %v2851_v22 = vld [vmem:[#allocation7 + $0xa0] sm:$0xff] }
 0x327   : > { %5196 = vmatprep.mubr.f32.mxu1 %v6019_v24  ;;  %5208 = vmatpush3.msk.msra.mxu1 %vm2392_vm2, %v2372_v45  ;;  %v2850_v24 = vld [vmem:[#allocation7 + $0x98] sm:$0xff] }
 0x328   : > { %5159 = vmatmul.mubr.f32.gmra.mxu0 %v6007_v14  ;;  %5215 = vmatprep.subr.msk.mxu0 %vm2392_vm2, %v4157_v46  ;;  %v2855_v14 = vld [vmem:[#allocation7 + $0xc0] sm:$0xff] }
 0x329   : > { %5201 = vmatprep.mubr.msk.f32.mxu0 %vm2379_vm3, %v2373_v47  ;;  %5223 = vmatprep.subr.msk.mxu1 %vm2392_vm2, %v4163_v48 }
 0x32a   : > { %5197 = vmatmul.mubr.f32.gmra.mxu1 %v6009_v15  ;;  %v2839_v15 = vld [vmem:[#allocation7 + $0x58] sm:$0xff] }
 0x32b   : > { %5209 = vmatprep.mubr.msk.f32.mxu1 %vm2379_vm3, %v2368_v49 }
 0x32c   : > { %5202 = vmatmul.mubr.msk.f32.vlgmr.msra.gmra.mxu0 %vm2379_vm3, %v2374_v50 }
 0x32d   : > { %5216 = vmatpush3.msk.msra.mxu0 %vm2392_vm2, %v4157_v46  ;;  %5204 = vmatprep.mubr.msk.f32.mxu0 %vm2379_vm3, %v2375_v51 }
 0x32e   : > { %5210 = vmatmul.mubr.msk.f32.vlgmr.msra.gmra.mxu1 %vm2379_vm3, %v2369_v52  ;;  %5231 = vmatprep.subr.mxu0 %v2862_v1 }
 0x32f   : > { %5212 = vmatprep.mubr.msk.f32.mxu1 %vm2379_vm3, %v2370_v53  ;;  %5224 = vmatpush3.msk.msra.mxu1 %vm2392_vm2, %v4163_v48  ;;  %v4145_v48 = vld [vmem:[%s6127_s4 + $0x3] ss:$0 sm:$0xff] }
 0x330   : > { %5205 = vmatmul.mubr.msk.f32.gmra.mxu0 %vm2379_vm3, %v2376_v54  ;;  %5266 = vmatprep.subr.mxu1 %v2843_v4 }
 0x331   : > { %5217 = vmatprep.mubr.msk.f32.mxu0 %vm2379_vm3, %v2581_v55 }
 0x332   : > { %5213 = vmatmul.mubr.msk.f32.gmra.mxu1 %vm2379_vm3, %v2371_v56 }
 0x333   : > { %5225 = vmatprep.mubr.msk.f32.mxu1 %vm2379_vm3, %v2691_v57 }
 0x334   : > { %5218 = vmatmul.mubr.msk.f32.vlgmr.msra.gmra.mxu0 %vm2379_vm3, %v2582_v58 }
 0x335   : > { %5220 = vmatprep.mubr.msk.f32.mxu0 %vm2379_vm3, %v2583_v59  ;;  %5232 = vmatpush3.msra.mxu0 %v2862_v1 }
 0x336   : > { %5226 = vmatmul.mubr.msk.f32.vlgmr.msra.gmra.mxu1 %vm2379_vm3, %v2692_v60  ;;  %5233 = vmatprep.subr.mxu0 %v2861_v3 }
 0x337   : > { %5228 = vmatprep.mubr.msk.f32.mxu1 %vm2379_vm3, %v2693_v61  ;;  %5234 = vmatpush3.msra.mxu0 %v2861_v3 }
 0x338   : > { %5221 = vmatmul.mubr.msk.f32.gmra.mxu0 %vm2379_vm3, %v2584_v63  ;;  %5235 = vmatprep.subr.mxu0 %v2860_v5 }
 0x339   : > { %5267 = vmatpush3.msra.mxu1 %v2843_v4  ;;  %5236 = vmatpush3.msra.mxu0 %v2860_v5 }
 0x33a   : > { %5229 = vmatmul.mubr.msk.f32.gmra.mxu1 %vm2379_vm3, %v2694_v0  ;;  %5237 = vmatprep.subr.mxu0 %v2859_v7 }
 0x33b   : > { %5238 = vmatpush3.msra.mxu0 %v2859_v7  ;;  %5268 = vmatprep.subr.mxu1 %v2842_v9 }
 0x33c   : > { %5239 = vmatprep.subr.mxu0 %v2858_v8  ;;  %5269 = vmatpush3.msra.mxu1 %v2842_v9 }
 0x33d   : > { %5240 = vmatpush3.msra.mxu0 %v2858_v8  ;;  %5270 = vmatprep.subr.mxu1 %v2841_v11 }
 0x33e   : > { %5241 = vmatprep.subr.mxu0 %v2857_v10  ;;  %5271 = vmatpush3.msra.mxu1 %v2841_v11 }
 0x33f   : > { %5242 = vmatpush3.msra.mxu0 %v2857_v10  ;;  %5272 = vmatprep.subr.mxu1 %v2840_v13 }
 0x340   : > { %5243 = vmatprep.subr.mxu0 %v2856_v12  ;;  %5273 = vmatpush3.msra.mxu1 %v2840_v13 }
 0x341   : > { %5244 = vmatpush3.msra.mxu0 %v2856_v12  ;;  %5274 = vmatprep.subr.mxu1 %v2839_v15 }
 0x342   : > { %5245 = vmatprep.subr.mxu0 %v2855_v14  ;;  %5275 = vmatpush3.msra.mxu1 %v2839_v15 }
 0x343   : > { %5246 = vmatpush3.msra.mxu0 %v2855_v14  ;;  %5276 = vmatprep.subr.mxu1 %v2838_v17 }
 0x344   : > { %5247 = vmatprep.subr.mxu0 %v2854_v16  ;;  %5277 = vmatpush3.msra.mxu1 %v2838_v17 }
 0x345   : > { %5248 = vmatpush3.msra.mxu0 %v2854_v16  ;;  %5278 = vmatprep.subr.mxu1 %v2837_v19 }
 0x346   : > { %5249 = vmatprep.subr.mxu0 %v2853_v18  ;;  %5279 = vmatpush3.msra.mxu1 %v2837_v19 }
 0x347   : > { %5250 = vmatpush3.msra.mxu0 %v2853_v18  ;;  %5280 = vmatprep.subr.mxu1 %v2836_v21 }
 0x348   : > { %5251 = vmatprep.subr.mxu0 %v2852_v20  ;;  %5281 = vmatpush3.msra.mxu1 %v2836_v21 }
 0x349   : > { %5252 = vmatpush3.msra.mxu0 %v2852_v20  ;;  %5282 = vmatprep.subr.mxu1 %v2835_v23 }
 0x34a   : > { %5253 = vmatprep.subr.mxu0 %v2851_v22  ;;  %5283 = vmatpush3.msra.mxu1 %v2835_v23 }
 0x34b   : > { %5254 = vmatpush3.msra.mxu0 %v2851_v22  ;;  %5284 = vmatprep.subr.mxu1 %v2834_v25 }
 0x34c   : > { %5255 = vmatprep.subr.mxu0 %v2850_v24  ;;  %5285 = vmatpush3.msra.mxu1 %v2834_v25 }
 0x34d   : > { %5256 = vmatpush3.msra.mxu0 %v2850_v24  ;;  %5286 = vmatprep.subr.mxu1 %v2833_v27 }
 0x34e   : > { %5257 = vmatprep.subr.mxu0 %v2849_v26  ;;  %5287 = vmatpush3.msra.mxu1 %v2833_v27 }
 0x34f   : > { %5258 = vmatpush3.msra.mxu0 %v2849_v26  ;;  %5288 = vmatprep.subr.mxu1 %v2832_v30  ;;  %v4169_v26 = vld [vmem:[%s6130_s7] ss:$0 sm:$0xff] }
 0x350   : > { %5259 = vmatprep.subr.mxu0 %v2848_v29  ;;  %5289 = vmatpush3.msra.mxu1 %v2832_v30 }
 0x351   : > { %5260 = vmatpush3.msra.mxu0 %v2848_v29  ;;  %5290 = vmatprep.subr.mxu1 %v2831_v28 }
 0x352   : > { %5261 = vmatprep.subr.mxu0 %v2847_v62  ;;  %5291 = vmatpush3.msra.mxu1 %v2831_v28 }
 0x353   : > { %5262 = vmatpush3.msra.mxu0 %v2847_v62  ;;  %5292 = vmatprep.subr.mxu1 %v2830_v31 }
 0x354   : > { %5301 = vmatprep.subr.mxu0 %v6088_v32  ;;  %5293 = vmatpush3.msra.mxu1 %v2830_v31 }
 0x355   : > { %5294 = vmatprep.subr.mxu1 %v2829_v33 }
 0x356   : > { %5295 = vmatpush3.msra.mxu1 %v2829_v33 }
 0x357   : > { %5296 = vmatprep.subr.mxu1 %v2828_v34 }
 0x358   : > { %5297 = vmatpush3.msra.mxu1 %v2828_v34 }
 0x359   : > { %5336 = vmatprep.subr.mxu1 %v6091_v35 }
 0x3be   : > { %v5081_v36 = vpop.f32.mrf.mxu0 }
 0x3c0   : > { %v2008_v2 = vpop.f32.mrf.mxu0 }
 0x3c2   : > { %v5084_v39 = vpop.f32.mrf.mxu0 }
 0x3c4   : > { %v2018_v41 = vpop.f32.mrf.mxu0 }
 0x3c6   : > { %v5119_v37 = vpop.f32.mrf.mxu1 }
 0x3c7   : > { %v2099_v43 = vadd.f32 %v5119_v37, %v5081_v36 }
 0x3c8   : > { %v2093_v38 = vpop.f32.mrf.mxu1 }
 0x3c9   : > { %v2094_v45 = vadd.f32 %v2093_v38, %v2008_v2 }
 0x3ca   : > { %v5122_v40 = vpop.f32.mrf.mxu1 }
 0x3cb   : > { %v2109_v49 = vadd.f32 %v5122_v40, %v5084_v39 }
 0x3cc   : > { %v2103_v44 = vpop.f32.mrf.mxu1 }
 0x3cd   : > { %v2104_v54 = vadd.f32 %v2103_v44, %v2018_v41 }
 0x3e2   : > { %v5157_v42 = vpop.f32.mrf.mxu0 }
 0x3e3   : > { %v2219_v46 = vadd.f32 %v5157_v42, %v2099_v43 }
 0x3e4   : > { %v2199_v6 = vpop.f32.mrf.mxu0 }
 0x3e5   : > { %v2218_v51 = vadd.f32 %v2199_v6, %v2094_v45 }
 0x3e6   : > { %v5195_v47 = vpop.f32.mrf.mxu1 }
 0x3e7   : > { %v2329_v50 = vadd.f32 %v5195_v47, %v2219_v46 }
 0x3e8   : > { %v2309_v52 = vpop.f32.mrf.mxu1  ;;  %v5160_v53 = vpop.f32.mrf.mxu0 }
 0x3e9   : > { %v2338_v55 = vadd.f32 %v4145_v48, %v2329_v50  ;;  %v2328_v56 = vadd.f32 %v2309_v52, %v2218_v51  ;;  %v2221_v57 = vadd.f32 %v5160_v53, %v2109_v49 }
 0x3ea   : > { %v5198_v58 = vpop.f32.mrf.mxu1  ;;  %v2209_v59 = vpop.f32.mrf.mxu0 }
 0x3eb   : > { %v2342_v60 = vmax.f32 %v2338_v55, 0.0  ;;  %v2337_v61 = vadd.f32 %v4145_v48, %v2328_v56  ;;  %v2331_v63 = vadd.f32 %v5198_v58, %v2221_v57  ;;  %v2220_v0 = vadd.f32 %v2209_v59, %v2104_v54  ;;  %v3030_v58 = vld [vmem:[#allocation7 + $0x170] sm:$0xff]  ;;  %v3029_v59 = vld [vmem:[#allocation7 + $0x168] sm:$0xff] }
 0x3ec   : > { %v2319_v1 = vpop.f32.mrf.mxu1  ;;  %v5203_v3 = vpop.f32.mrf.mxu0 }
 0x3ed   : > { %2346 = vst [vmem:[#allocation2 + $0x8] sm:$0xff] %v2342_v60  ;;  %v2341_v4 = vmax.f32 %v2337_v61, 0.0  ;;  %v2340_v5 = vadd.f32 %v4145_v48, %v2331_v63  ;;  %v2330_v7 = vadd.f32 %v2319_v1, %v2220_v0  ;;  %v3028_v61 = vld [vmem:[#allocation7 + $0x160] sm:$0xff]  ;;  %v3126_v63 = vld [vmem:[#allocation7 + $0x1f0] sm:$0xff]  ;;  %v3027_v0 = vld [vmem:[#allocation7 + $0x158] sm:$0xff] }
 0x3ee   : > { %v5211_v8 = vpop.f32.mrf.mxu1  ;;  %v2462_v9 = vpop.f32.mrf.mxu0 }
 0x3ef   : > { %2345 = vst [vmem:[#allocation2] sm:$0xff] %v2341_v4  ;;  %v2344_v10 = vmax.f32 %v2340_v5, 0.0  ;;  %v2339_v11 = vadd.f32 %v4145_v48, %v2330_v7  ;;  %v2568_v15 = vadd.f32 %v5211_v8, %v5203_v3  ;;  %v3026_v5 = vld [vmem:[#allocation7 + $0x150] sm:$0xff]  ;;  %v3124_v7 = vld [vmem:[#allocation7 + $0x1e0] sm:$0xff]  ;;  %v3025_v8 = vld [vmem:[#allocation7 + $0x148] sm:$0xff] }
 0x3f0   : > { %v2562_v12 = vpop.f32.mrf.mxu1  ;;  %v5206_v13 = vpop.f32.mrf.mxu0 }
 0x3f1   : > { %2348 = vst [vmem:[#allocation2 + $0x18] sm:$0xff] %v2344_v10  ;;  %v2343_v14 = vmax.f32 %v2339_v11, 0.0  ;;  %v2563_v18 = vadd.f32 %v2562_v12, %v2462_v9  ;;  %v3123_v9 = vld [vmem:[#allocation7 + $0x1d8] sm:$0xff]  ;;  %v3024_v10 = vld [vmem:[#allocation7 + $0x140] sm:$0xff]  ;;  %v3122_v11 = vld [vmem:[#allocation7 + $0x1d0] sm:$0xff] }
 0x3f2   : > { %v5214_v16 = vpop.f32.mrf.mxu1  ;;  %v2472_v17 = vpop.f32.mrf.mxu0  ;;  %v3121_v12 = vld [vmem:[#allocation7 + $0x1c8] sm:$0xff] }
 0x3f3   : > { %2347 = vst [vmem:[#allocation2 + $0x10] sm:$0xff] %v2343_v14  ;;  %v2578_v21 = vadd.f32 %v5214_v16, %v5206_v13  ;;  %v3022_v13 = vld [vmem:[#allocation7 + $0x130] sm:$0xff]  ;;  %v3120_v14 = vld [vmem:[#allocation7 + $0x1c0] sm:$0xff]  ;;  %v3119_v16 = vld [vmem:[#allocation7 + $0x1b8] sm:$0xff] }
 0x3f4   : > { %v2572_v19 = vpop.f32.mrf.mxu1  ;;  %v5219_v20 = vpop.f32.mrf.mxu0 }
 0x3f5   : > { %v2688_v22 = vadd.f32 %v5219_v20, %v2568_v15  ;;  %v2573_v62 = vadd.f32 %v2572_v19, %v2472_v17  ;;  %v3021_v15 = vld [vmem:[#allocation7 + $0x128] sm:$0xff]  ;;  %v3020_v17 = vld [vmem:[#allocation7 + $0x120] sm:$0xff]  ;;  %v3019_v19 = vld [vmem:[#allocation7 + $0x118] sm:$0xff] }
 0x3f6   : > { %v2349_v23 = vld [vmem:[#allocation2] ss:$2 sm:$0xff]  ;;  %v2352_v24 = vld [vmem:[#allocation2 + $0x1] ss:$2 sm:$0xff]  ;;  %v5227_v25 = vpop.f32.mrf.mxu1  ;;  %v2668_v27 = vpop.f32.mrf.mxu0  ;;  %v3117_v20 = vld [vmem:[#allocation7 + $0x1a8] sm:$0xff] }
 0x3f7   : > { %v2354_v29 = vmax.f32 %v2349_v23, %v2352_v24  ;;  %v2798_v30 = vadd.f32 %v5227_v25, %v2688_v22  ;;  %v2687_v28 = vadd.f32 %v2668_v27, %v2563_v18  ;;  %v3118_v18 = vld [vmem:[#allocation7 + $0x1b0] sm:$0xff]  ;;  %v3116_v22 = vld [vmem:[#allocation7 + $0x1a0] sm:$0xff]  ;;  %v3017_v23 = vld [vmem:[#allocation7 + $0x108] sm:$0xff] }
 0x3f8   : > { %v2778_v31 = vpop.f32.mrf.mxu1  ;;  %v5222_v33 = vpop.f32.mrf.mxu0  ;;  %v3115_v24 = vld [vmem:[#allocation7 + $0x198] sm:$0xff]  ;;  %v3016_v25 = vld [vmem:[#allocation7 + $0x100] sm:$0xff]  ;;  %v3113_v27 = vld [vmem:[#allocation7 + $0x188] sm:$0xff] }
 0x3f9   : > { %v2807_v34 = vadd.f32 %v4169_v26, %v2798_v30  ;;  %v2797_v36 = vadd.f32 %v2778_v31, %v2687_v28  ;;  %v2690_v37 = vadd.f32 %v5222_v33, %v2578_v21  ;;  %2356 = vst [vmem:[%s6104_s18] sm:$0xff] %v2354_v29  ;;  %v3018_v21 = vld [vmem:[#allocation7 + $0x110] sm:$0xff]  ;;  %v3112_v30 = vld [vmem:[#allocation7 + $0x180] sm:$0xff]  ;;  %v3234_v31 = vld [vmem:[#allocation7 + $0x278] sm:$0xff] }
 0x3fa   : > { %v2351_v2 = vld [vmem:[#allocation2 + $0x10] ss:$2 sm:$0xff]  ;;  %v2353_v38 = vld [vmem:[#allocation2 + $0x11] ss:$2 sm:$0xff]  ;;  %v5230_v39 = vpop.f32.mrf.mxu1  ;;  %v2678_v40 = vpop.f32.mrf.mxu0  ;;  %v3252_v33 = vld [vmem:[#allocation7 + $0x2f0] sm:$0xff] }
 0x3fb   : > { %v2811_v41 = vmax.f32 %v2807_v34, 0.0  ;;  %v2806_v42 = vadd.f32 %v4169_v26, %v2797_v36  ;;  %v2355_v43 = vmax.f32 %v2351_v2, %v2353_v38  ;;  %v2800_v44 = vadd.f32 %v5230_v39, %v2690_v37  ;;  %v3233_v34 = vld [vmem:[#allocation7 + $0x270] sm:$0xff]  ;;  %v3251_v36 = vld [vmem:[#allocation7 + $0x2e8] sm:$0xff]  ;;  %v3250_v2 = vld [vmem:[#allocation7 + $0x2e0] sm:$0xff] }
 0x3fc   : > { %v2689_v6 = vadd.f32 %v2678_v40, %v2573_v62  ;;  %v2788_v45 = vpop.f32.mrf.mxu1  ;;  %v3253_v62 = vld [vmem:[#allocation7 + $0x2f8] sm:$0xff]  ;;  %v3232_v37 = vld [vmem:[#allocation7 + $0x268] sm:$0xff]  ;;  %v3231_v38 = vld [vmem:[#allocation7 + $0x260] sm:$0xff] }
 0x3fd   : > { %2815 = vst [vmem:[#allocation2 + $0x8] sm:$0xff] %v2811_v41  ;;  %v2810_v46 = vmax.f32 %v2806_v42, 0.0  ;;  %2357 = vst [vmem:[%s6104_s18 + $0x8] sm:$0xff] %v2355_v43  ;;  %v2809_v47 = vadd.f32 %v4169_v26, %v2800_v44  ;;  %v3249_v39 = vld [vmem:[#allocation7 + $0x2d8] sm:$0xff]  ;;  %v3248_v41 = vld [vmem:[#allocation7 + $0x2d0] sm:$0xff] }
 0x3fe   : > { %v2799_v48 = vadd.f32 %v2788_v45, %v2689_v6  ;;  %v3230_v40 = vld [vmem:[#allocation7 + $0x258] sm:$0xff]  ;;  %v3229_v42 = vld [vmem:[#allocation7 + $0x250] sm:$0xff]  ;;  %v3247_v43 = vld [vmem:[#allocation7 + $0x2c8] sm:$0xff] }
 0x3ff   : > { %2814 = vst [vmem:[#allocation2] sm:$0xff] %v2810_v46  ;;  %v2813_v49 = vmax.f32 %v2809_v47, 0.0  ;;  %v3228_v44 = vld [vmem:[#allocation7 + $0x248] sm:$0xff]  ;;  %v3246_v6 = vld [vmem:[#allocation7 + $0x2c0] sm:$0xff]  ;;  %v3245_v45 = vld [vmem:[#allocation7 + $0x2b8] sm:$0xff] }
 0x400   : > { %v2808_v50 = vadd.f32 %v4169_v26, %v2799_v48  ;;  %v3114_v26 = vld [vmem:[#allocation7 + $0x190] sm:$0xff]  ;;  %v3243_v47 = vld [vmem:[#allocation7 + $0x2a8] sm:$0xff]  ;;  %v3227_v48 = vld [vmem:[#allocation7 + $0x240] sm:$0xff] }
 0x401   : > { %2817 = vst [vmem:[#allocation2 + $0x18] sm:$0xff] %v2813_v49  ;;  %v3244_v46 = vld [vmem:[#allocation7 + $0x2b0] sm:$0xff]  ;;  %v3242_v49 = vld [vmem:[#allocation7 + $0x2a0] sm:$0xff] }
 0x402   : > { %v2812_v51 = vmax.f32 %v2808_v50, 0.0  ;;  %v3226_v50 = vld [vmem:[#allocation7 + $0x238] sm:$0xff] }
 0x404   : > { %2816 = vst [vmem:[#allocation2 + $0x10] sm:$0xff] %v2812_v51  ;;  %v3241_v51 = vld [vmem:[#allocation7 + $0x298] sm:$0xff] }
 0x406   : > { %v2818_v52 = vld [vmem:[#allocation2] ss:$2 sm:$0xff]  ;;  %v2820_v53 = vld [vmem:[#allocation2 + $0x1] ss:$2 sm:$0xff] }
 0x407   : > { %v2822_v54 = vmax.f32 %v2818_v52, %v2820_v53  ;;  %v3225_v52 = vld [vmem:[#allocation7 + $0x230] sm:$0xff] }
 0x408   : > { %v3240_v53 = vld [vmem:[#allocation7 + $0x290] sm:$0xff] }
 0x409   : > { %2824 = vst [vmem:[#allocation3 + $0x1] sm:$0xff] %v2822_v54  ;;  %5263 = vmatprep.mubr.f32.mxu0 %v2822_v54  ;;  %v3224_v54 = vld [vmem:[#allocation7 + $0x228] sm:$0xff] }
 0x40b   : > { %v2819_v55 = vld [vmem:[#allocation2 + $0x10] ss:$2 sm:$0xff]  ;;  %v2821_v56 = vld [vmem:[#allocation2 + $0x11] ss:$2 sm:$0xff] }
 0x40c   : > { %v2823_v57 = vmax.f32 %v2819_v55, %v2821_v56  ;;  %v3239_v55 = vld [vmem:[#allocation7 + $0x288] sm:$0xff]  ;;  %v3223_v56 = vld [vmem:[#allocation7 + $0x220] sm:$0xff] }
 0x40e   : > { %2825 = vst [vmem:[#allocation3 + $0x9] sm:$0xff] %v2823_v57  ;;  %5264 = vmatmul.mubr.f32.vlgmr.msra.gmra.mxu0 %v2823_v57  ;;  %v3222_v57 = vld [vmem:[#allocation7 + $0x218] sm:$0xff] }
 0x40f   : > { %5302 = vmatpush3.msra.mxu0 %v6088_v32  ;;  %v3125_v32 = vld [vmem:[#allocation7 + $0x1e8] sm:$0xff] }
 0x410   : > { %v2826_v60 = vld [vmem:[#allocation3] sm:$0xff]  ;;  %5303 = vmatprep.subr.mxu0 %v3030_v58 }
 0x411   : > { %5298 = vmatprep.mubr.f32.mxu1 %v2826_v60  ;;  %5304 = vmatpush3.msra.mxu0 %v3030_v58  ;;  %v3238_v58 = vld [vmem:[#allocation7 + $0x280] sm:$0xff]  ;;  %v3422_v60 = vld [vmem:[#allocation7 + $0x378] sm:$0xff] }
 0x412   : > { %5305 = vmatprep.subr.mxu0 %v3029_v59 }
 0x413   : > { %5306 = vmatpush3.msra.mxu0 %v3029_v59  ;;  %v3221_v59 = vld [vmem:[#allocation7 + $0x210] sm:$0xff] }
 0x414   : > { %5307 = vmatprep.subr.mxu0 %v3028_v61 }
 0x415   : > { %v2827_v1 = vld [vmem:[#allocation3 + $0x8] sm:$0xff]  ;;  %5308 = vmatpush3.msra.mxu0 %v3028_v61  ;;  %v3220_v61 = vld [vmem:[#allocation7 + $0x208] sm:$0xff] }
 0x416   : > { %v3013_v3 = vld [vmem:[#allocation3 + $0x2] sm:$0xff]  ;;  %5299 = vmatmul.mubr.f32.vlgmr.msra.gmra.mxu1 %v2827_v1  ;;  %5309 = vmatprep.subr.mxu0 %v3027_v0  ;;  %v3014_v29 = vld [vmem:[#allocation3 + $0xa] sm:$0xff] }
 0x417   : > { %v3109_v4 = vld [vmem:[#allocation3 + $0x3] sm:$0xff]  ;;  %5333 = vmatprep.mubr.f32.mxu0 %v3013_v3  ;;  %5337 = vmatpush3.msra.mxu1 %v6091_v35  ;;  %v3110_v28 = vld [vmem:[#allocation3 + $0xb] sm:$0xff] }
 0x418   : > { %5368 = vmatprep.mubr.f32.mxu1 %v3109_v4  ;;  %5338 = vmatprep.subr.mxu1 %v3126_v63  ;;  %v3023_v35 = vld [vmem:[#allocation7 + $0x138] sm:$0xff] }
 0x419   : > { %5339 = vmatpush3.msra.mxu1 %v3126_v63  ;;  %5310 = vmatpush3.msra.mxu0 %v3027_v0  ;;  %v3219_v63 = vld [vmem:[#allocation7 + $0x200] sm:$0xff]  ;;  %v3518_v0 = vld [vmem:[#allocation7 + $0x3f8] sm:$0xff] }
 0x41a   : > { %5340 = vmatprep.subr.mxu1 %v3125_v32  ;;  %5311 = vmatprep.subr.mxu0 %v3026_v5 }
 0x41b   : > { %5341 = vmatpush3.msra.mxu1 %v3125_v32  ;;  %5312 = vmatpush3.msra.mxu0 %v3026_v5 }
 0x41c   : > { %5342 = vmatprep.subr.mxu1 %v3124_v7  ;;  %5313 = vmatprep.subr.mxu0 %v3025_v8 }
 0x41d   : > { %5343 = vmatpush3.msra.mxu1 %v3124_v7  ;;  %5314 = vmatpush3.msra.mxu0 %v3025_v8 }
 0x41e   : > { %5344 = vmatprep.subr.mxu1 %v3123_v9  ;;  %5315 = vmatprep.subr.mxu0 %v3024_v10 }
 0x41f   : > { %5345 = vmatpush3.msra.mxu1 %v3123_v9  ;;  %5316 = vmatpush3.msra.mxu0 %v3024_v10 }
 0x420   : > { %5346 = vmatprep.subr.mxu1 %v3122_v11  ;;  %5317 = vmatprep.subr.mxu0 %v3023_v35 }
 0x421   : > { %5347 = vmatpush3.msra.mxu1 %v3122_v11  ;;  %5318 = vmatpush3.msra.mxu0 %v3023_v35  ;;  %v4170_v35 = vld [vmem:[%s6130_s7 + $0x1] ss:$0 sm:$0xff] }
 0x422   : > { %5348 = vmatprep.subr.mxu1 %v3121_v12  ;;  %5319 = vmatprep.subr.mxu0 %v3022_v13 }
 0x423   : > { %5349 = vmatpush3.msra.mxu1 %v3121_v12  ;;  %5320 = vmatpush3.msra.mxu0 %v3022_v13 }
 0x424   : > { %5350 = vmatprep.subr.mxu1 %v3120_v14  ;;  %5321 = vmatprep.subr.mxu0 %v3021_v15 }
 0x425   : > { %5351 = vmatpush3.msra.mxu1 %v3120_v14  ;;  %5322 = vmatpush3.msra.mxu0 %v3021_v15 }
 0x426   : > { %5352 = vmatprep.subr.mxu1 %v3119_v16  ;;  %5323 = vmatprep.subr.mxu0 %v3020_v17 }
 0x427   : > { %5353 = vmatpush3.msra.mxu1 %v3119_v16  ;;  %5324 = vmatpush3.msra.mxu0 %v3020_v17 }
 0x428   : > { %5354 = vmatprep.subr.mxu1 %v3118_v18  ;;  %5325 = vmatprep.subr.mxu0 %v3019_v19 }
 0x429   : > { %5355 = vmatpush3.msra.mxu1 %v3118_v18  ;;  %5326 = vmatpush3.msra.mxu0 %v3019_v19 }
 0x42a   : > { %5356 = vmatprep.subr.mxu1 %v3117_v20  ;;  %5327 = vmatprep.subr.mxu0 %v3018_v21 }
 0x42b   : > { %5357 = vmatpush3.msra.mxu1 %v3117_v20  ;;  %5328 = vmatpush3.msra.mxu0 %v3018_v21  ;;  %v3421_v20 = vld [vmem:[#allocation7 + $0x370] sm:$0xff]  ;;  %v3420_v21 = vld [vmem:[#allocation7 + $0x368] sm:$0xff] }
 0x42c   : > { %5358 = vmatprep.subr.mxu1 %v3116_v22  ;;  %5329 = vmatprep.subr.mxu0 %v3017_v23 }
 0x42d   : > { %5359 = vmatpush3.msra.mxu1 %v3116_v22  ;;  %5330 = vmatpush3.msra.mxu0 %v3017_v23  ;;  %v3419_v22 = vld [vmem:[#allocation7 + $0x360] sm:$0xff] }
 0x42e   : > { %5360 = vmatprep.subr.mxu1 %v3115_v24  ;;  %5331 = vmatprep.subr.mxu0 %v3016_v25 }
 0x42f   : > { %5361 = vmatpush3.msra.mxu1 %v3115_v24  ;;  %5332 = vmatpush3.msra.mxu0 %v3016_v25 }
 0x430   : > { %5362 = vmatprep.subr.mxu1 %v3114_v26  ;;  %5334 = vmatmul.mubr.f32.vlgmr.msra.gmra.mxu0 %v3014_v29 }
 0x431   : > { %5363 = vmatpush3.msra.mxu1 %v3114_v26  ;;  %5371 = vmatprep.subr.mxu0 %v3253_v62  ;;  %v3517_v26 = vld [vmem:[#allocation7 + $0x3f0] sm:$0xff] }
 0x432   : > { %5364 = vmatprep.subr.mxu1 %v3113_v27  ;;  %5372 = vmatpush3.msra.mxu0 %v3253_v62  ;;  %v3515_v62 = vld [vmem:[#allocation7 + $0x3e0] sm:$0xff] }
 0x433   : > { %5365 = vmatpush3.msra.mxu1 %v3113_v27  ;;  %5373 = vmatprep.subr.mxu0 %v3252_v33  ;;  %v3418_v27 = vld [vmem:[#allocation7 + $0x358] sm:$0xff] }
 0x434   : > { %5366 = vmatprep.subr.mxu1 %v3112_v30  ;;  %5374 = vmatpush3.msra.mxu0 %v3252_v33  ;;  %v3514_v33 = vld [vmem:[#allocation7 + $0x3d8] sm:$0xff] }
 0x435   : > { %5367 = vmatpush3.msra.mxu1 %v3112_v30  ;;  %5375 = vmatprep.subr.mxu0 %v3251_v36  ;;  %v3516_v30 = vld [vmem:[#allocation7 + $0x3e8] sm:$0xff] }
 0x436   : > { %5369 = vmatmul.mubr.f32.vlgmr.msra.gmra.mxu1 %v3110_v28  ;;  %5406 = vmatprep.subr.mxu1 %v3234_v31  ;;  %v3417_v28 = vld [vmem:[#allocation7 + $0x350] sm:$0xff] }
 0x437   : > { %5407 = vmatpush3.msra.mxu1 %v3234_v31  ;;  %5376 = vmatpush3.msra.mxu0 %v3251_v36  ;;  %v3416_v31 = vld [vmem:[#allocation7 + $0x348] sm:$0xff]  ;;  %v3513_v36 = vld [vmem:[#allocation7 + $0x3d0] sm:$0xff] }
 0x438   : > { %5408 = vmatprep.subr.mxu1 %v3233_v34  ;;  %5377 = vmatprep.subr.mxu0 %v3250_v2 }
 0x439   : > { %5409 = vmatpush3.msra.mxu1 %v3233_v34  ;;  %5378 = vmatpush3.msra.mxu0 %v3250_v2  ;;  %v3415_v34 = vld [vmem:[#allocation7 + $0x340] sm:$0xff]  ;;  %v3512_v2 = vld [vmem:[#allocation7 + $0x3c8] sm:$0xff] }
 0x43a   : > { %5410 = vmatprep.subr.mxu1 %v3232_v37  ;;  %5379 = vmatprep.subr.mxu0 %v3249_v39 }
 0x43b   : > { %5411 = vmatpush3.msra.mxu1 %v3232_v37  ;;  %5380 = vmatpush3.msra.mxu0 %v3249_v39  ;;  %v3414_v37 = vld [vmem:[#allocation7 + $0x338] sm:$0xff]  ;;  %v3511_v39 = vld [vmem:[#allocation7 + $0x3c0] sm:$0xff] }
 0x43c   : > { %5412 = vmatprep.subr.mxu1 %v3231_v38  ;;  %5381 = vmatprep.subr.mxu0 %v3248_v41 }
 0x43d   : > { %5413 = vmatpush3.msra.mxu1 %v3231_v38  ;;  %5382 = vmatpush3.msra.mxu0 %v3248_v41  ;;  %v3413_v38 = vld [vmem:[#allocation7 + $0x330] sm:$0xff]  ;;  %v3510_v41 = vld [vmem:[#allocation7 + $0x3b8] sm:$0xff] }
 0x43e   : > { %5414 = vmatprep.subr.mxu1 %v3230_v40  ;;  %5383 = vmatprep.subr.mxu0 %v3247_v43 }
 0x43f   : > { %5415 = vmatpush3.msra.mxu1 %v3230_v40  ;;  %5384 = vmatpush3.msra.mxu0 %v3247_v43  ;;  %v3412_v40 = vld [vmem:[#allocation7 + $0x328] sm:$0xff]  ;;  %v3509_v43 = vld [vmem:[#allocation7 + $0x3b0] sm:$0xff] }
 0x440   : > { %5416 = vmatprep.subr.mxu1 %v3229_v42  ;;  %5385 = vmatprep.subr.mxu0 %v3246_v6 }
 0x441   : > { %5417 = vmatpush3.msra.mxu1 %v3229_v42  ;;  %5386 = vmatpush3.msra.mxu0 %v3246_v6  ;;  %v3411_v42 = vld [vmem:[#allocation7 + $0x320] sm:$0xff]  ;;  %v3508_v6 = vld [vmem:[#allocation7 + $0x3a8] sm:$0xff] }
 0x442   : > { %5418 = vmatprep.subr.mxu1 %v3228_v44  ;;  %5387 = vmatprep.subr.mxu0 %v3245_v45 }
 0x443   : > { %5419 = vmatpush3.msra.mxu1 %v3228_v44  ;;  %5388 = vmatpush3.msra.mxu0 %v3245_v45  ;;  %v3410_v44 = vld [vmem:[#allocation7 + $0x318] sm:$0xff]  ;;  %v3409_v45 = vld [vmem:[#allocation7 + $0x310] sm:$0xff] }
 0x444   : > { %5389 = vmatprep.subr.mxu0 %v3244_v46  ;;  %5420 = vmatprep.subr.mxu1 %v3227_v48 }
 0x445   : > { %5390 = vmatpush3.msra.mxu0 %v3244_v46  ;;  %5421 = vmatpush3.msra.mxu1 %v3227_v48  ;;  %v3507_v46 = vld [vmem:[#allocation7 + $0x3a0] sm:$0xff]  ;;  %v3506_v48 = vld [vmem:[#allocation7 + $0x398] sm:$0xff] }
 0x446   : > { %5391 = vmatprep.subr.mxu0 %v3243_v47  ;;  %5422 = vmatprep.subr.mxu1 %v3226_v50 }
 0x447   : > { %5392 = vmatpush3.msra.mxu0 %v3243_v47  ;;  %5423 = vmatpush3.msra.mxu1 %v3226_v50  ;;  %v3408_v47 = vld [vmem:[#allocation7 + $0x308] sm:$0xff]  ;;  %v3505_v50 = vld [vmem:[#allocation7 + $0x390] sm:$0xff] }
 0x448   : > { %5393 = vmatprep.subr.mxu0 %v3242_v49  ;;  %5424 = vmatprep.subr.mxu1 %v3225_v52 }
 0x449   : > { %5394 = vmatpush3.msra.mxu0 %v3242_v49  ;;  %5425 = vmatpush3.msra.mxu1 %v3225_v52  ;;  %v3407_v49 = vld [vmem:[#allocation7 + $0x300] sm:$0xff] }
 0x44a   : > { %5395 = vmatprep.subr.mxu0 %v3241_v51  ;;  %5426 = vmatprep.subr.mxu1 %v3224_v54 }
 0x44b   : > { %5396 = vmatpush3.msra.mxu0 %v3241_v51  ;;  %5427 = vmatpush3.msra.mxu1 %v3224_v54  ;;  %v3504_v51 = vld [vmem:[#allocation7 + $0x388] sm:$0xff] }
 0x44c   : > { %5397 = vmatprep.subr.mxu0 %v3240_v53  ;;  %5428 = vmatprep.subr.mxu1 %v3223_v56 }
 0x44d   : > { %5398 = vmatpush3.msra.mxu0 %v3240_v53  ;;  %5429 = vmatpush3.msra.mxu1 %v3223_v56  ;;  %v3503_v53 = vld [vmem:[#allocation7 + $0x380] sm:$0xff]  ;;  %v3625_v56 = vld [vmem:[#allocation7 + $0x478] sm:$0xff] }
 0x44e   : > { %5399 = vmatprep.subr.mxu0 %v3239_v55  ;;  %5430 = vmatprep.subr.mxu1 %v3222_v57 }
 0x44f   : > { %5400 = vmatpush3.msra.mxu0 %v3239_v55  ;;  %5431 = vmatpush3.msra.mxu1 %v3222_v57  ;;  %v3644_v55 = vld [vmem:[#allocation7 + $0x4f8] sm:$0xff]  ;;  %v3643_v57 = vld [vmem:[#allocation7 + $0x4f0] sm:$0xff] }
 0x450   : > { %5401 = vmatprep.subr.mxu0 %v3238_v58  ;;  %5432 = vmatprep.subr.mxu1 %v3221_v59 }
 0x451   : > { %5402 = vmatpush3.msra.mxu0 %v3238_v58  ;;  %5433 = vmatpush3.msra.mxu1 %v3221_v59  ;;  %v3624_v58 = vld [vmem:[#allocation7 + $0x470] sm:$0xff]  ;;  %v3642_v59 = vld [vmem:[#allocation7 + $0x4e8] sm:$0xff] }
 0x452   : > { %5441 = vmatprep.subr.mxu0 %v3422_v60  ;;  %5434 = vmatprep.subr.mxu1 %v3220_v61 }
 0x453   : > { %5435 = vmatpush3.msra.mxu1 %v3220_v61  ;;  %v3641_v61 = vld [vmem:[#allocation7 + $0x4e0] sm:$0xff] }
 0x454   : > { %5436 = vmatprep.subr.mxu1 %v3219_v63 }
 0x455   : > { %5437 = vmatpush3.msra.mxu1 %v3219_v63  ;;  %v3622_v63 = vld [vmem:[#allocation7 + $0x460] sm:$0xff] }
 0x456   : > { %5476 = vmatprep.subr.mxu1 %v3518_v0 }
 0x4ce   : > { %v5265_v1 = vpop.f32.mrf.mxu0 }
 0x4d0   : > { %v2929_v4 = vpop.f32.mrf.mxu0 }
 0x4d6   : > { %v5300_v3 = vpop.f32.mrf.mxu1 }
 0x4d7   : > { %v3010_v7 = vadd.f32 %v5300_v3, %v5265_v1  ;;  %v3621_v1 = vld [vmem:[#allocation7 + $0x458] sm:$0xff]  ;;  %v3639_v3 = vld [vmem:[#allocation7 + $0x4d0] sm:$0xff] }
 0x4d8   : > { %v3004_v5 = vpop.f32.mrf.mxu1 }
 0x4d9   : > { %v3005_v9 = vadd.f32 %v3004_v5, %v2929_v4  ;;  %v3620_v4 = vld [vmem:[#allocation7 + $0x450] sm:$0xff]  ;;  %v3619_v5 = vld [vmem:[#allocation7 + $0x448] sm:$0xff] }
 0x4f0   : > { %v5335_v32 = vpop.f32.mrf.mxu0 }
 0x4f1   : > { %v3108_v10 = vadd.f32 %v5335_v32, %v3010_v7  ;;  %v3638_v32 = vld [vmem:[#allocation7 + $0x4c8] sm:$0xff]  ;;  %v3637_v7 = vld [vmem:[#allocation7 + $0x4c0] sm:$0xff] }
 0x4f2   : > { %v3098_v8 = vpop.f32.mrf.mxu0 }
 0x4f3   : > { %v3107_v13 = vadd.f32 %v3098_v8, %v3005_v9  ;;  %v3636_v8 = vld [vmem:[#allocation7 + $0x4b8] sm:$0xff]  ;;  %v3635_v9 = vld [vmem:[#allocation7 + $0x4b0] sm:$0xff] }
 0x4f6   : > { %v5370_v11 = vpop.f32.mrf.mxu1 }
 0x4f7   : > { %v3204_v12 = vadd.f32 %v5370_v11, %v3108_v10  ;;  %v3634_v10 = vld [vmem:[#allocation7 + $0x4a8] sm:$0xff]  ;;  %v3618_v11 = vld [vmem:[#allocation7 + $0x440] sm:$0xff] }
 0x4f8   : > { %v3194_v14 = vpop.f32.mrf.mxu1 }
 0x4f9   : > { %v3211_v15 = vadd.f32 %v4170_v35, %v3204_v12  ;;  %v3203_v16 = vadd.f32 %v3194_v14, %v3107_v13  ;;  %v3617_v12 = vld [vmem:[#allocation7 + $0x438] sm:$0xff]  ;;  %v3616_v14 = vld [vmem:[#allocation7 + $0x430] sm:$0xff] }
 0x4fa   : > { %v3632_v13 = vld [vmem:[#allocation7 + $0x498] sm:$0xff] }
 0x4fb   : > { %v3213_v17 = vmax.f32 %v3211_v15, 0.0  ;;  %v3210_v18 = vadd.f32 %v4170_v35, %v3203_v16  ;;  %v3633_v35 = vld [vmem:[#allocation7 + $0x4a0] sm:$0xff]  ;;  %v3631_v15 = vld [vmem:[#allocation7 + $0x490] sm:$0xff]  ;;  %v3615_v16 = vld [vmem:[#allocation7 + $0x428] sm:$0xff] }
 0x4fd   : > { %3215 = vst [vmem:[#allocation4 + $0x9] sm:$0xff] %v3213_v17  ;;  %v3212_v19 = vmax.f32 %v3210_v18, 0.0  ;;  %v3614_v18 = vld [vmem:[#allocation7 + $0x420] sm:$0xff] }
 0x4ff   : > { %3214 = vst [vmem:[#allocation4 + $0x1] sm:$0xff] %v3212_v19  ;;  %5403 = vmatprep.mubr.f32.mxu0 %v3212_v19  ;;  %v3613_v19 = vld [vmem:[#allocation7 + $0x418] sm:$0xff] }
 0x500   : > { %5404 = vmatmul.mubr.f32.vlgmr.msra.gmra.mxu0 %v3213_v17  ;;  %v3630_v17 = vld [vmem:[#allocation7 + $0x488] sm:$0xff] }
 0x501   : > { %5442 = vmatpush3.msra.mxu0 %v3422_v60  ;;  %v3623_v60 = vld [vmem:[#allocation7 + $0x468] sm:$0xff] }
 0x502   : > { %5443 = vmatprep.subr.mxu0 %v3421_v20 }
 0x503   : > { %5444 = vmatpush3.msra.mxu0 %v3421_v20  ;;  %v3629_v20 = vld [vmem:[#allocation7 + $0x480] sm:$0xff] }
 0x504   : > { %5445 = vmatprep.subr.mxu0 %v3420_v21  ;;  %v3405_v52 = vld [vmem:[#allocation4 + $0xa] sm:$0xff] }
 0x505   : > { %5446 = vmatpush3.msra.mxu0 %v3420_v21  ;;  %v3501_v54 = vld [vmem:[#allocation4 + $0xb] sm:$0xff]  ;;  %v3612_v21 = vld [vmem:[#allocation7 + $0x410] sm:$0xff] }
 0x506   : > { %v3216_v23 = vld [vmem:[#allocation4] sm:$0xff]  ;;  %v3217_v24 = vld [vmem:[#allocation4 + $0x8] sm:$0xff]  ;;  %5447 = vmatprep.subr.mxu0 %v3419_v22 }
 0x507   : > { %v3404_v25 = vld [vmem:[#allocation4 + $0x2] sm:$0xff]  ;;  %5438 = vmatprep.mubr.f32.mxu1 %v3216_v23  ;;  %5448 = vmatpush3.msra.mxu0 %v3419_v22  ;;  %v3611_v23 = vld [vmem:[#allocation7 + $0x408] sm:$0xff] }
 0x508   : > { %5473 = vmatprep.mubr.f32.mxu0 %v3404_v25  ;;  %5439 = vmatmul.mubr.f32.vlgmr.msra.gmra.mxu1 %v3217_v24  ;;  %v3500_v29 = vld [vmem:[#allocation4 + $0x3] sm:$0xff] }
 0x509   : > { %5477 = vmatpush3.msra.mxu1 %v3518_v0  ;;  %5508 = vmatprep.mubr.f32.mxu1 %v3500_v29  ;;  %v3640_v0 = vld [vmem:[#allocation7 + $0x4d8] sm:$0xff]  ;;  %v3610_v24 = vld [vmem:[#allocation7 + $0x400] sm:$0xff] }
 0x50a   : > { %5478 = vmatprep.subr.mxu1 %v3517_v26  ;;  %5449 = vmatprep.subr.mxu0 %v3418_v27  ;;  %v3813_v22 = vld [vmem:[#allocation7 + $0x578] sm:$0xff] }
 0x50b   : > { %5479 = vmatpush3.msra.mxu1 %v3517_v26  ;;  %5450 = vmatpush3.msra.mxu0 %v3418_v27  ;;  %v3909_v25 = vld [vmem:[#allocation7 + $0x5f8] sm:$0xff] }
 0x50c   : > { %5480 = vmatprep.subr.mxu1 %v3516_v30  ;;  %5451 = vmatprep.subr.mxu0 %v3417_v28 }
 0x50d   : > { %5481 = vmatpush3.msra.mxu1 %v3516_v30  ;;  %5452 = vmatpush3.msra.mxu0 %v3417_v28 }
 0x50e   : > { %5482 = vmatprep.subr.mxu1 %v3515_v62  ;;  %5453 = vmatprep.subr.mxu0 %v3416_v31 }
 0x50f   : > { %5483 = vmatpush3.msra.mxu1 %v3515_v62  ;;  %5454 = vmatpush3.msra.mxu0 %v3416_v31 }
 0x510   : > { %5484 = vmatprep.subr.mxu1 %v3514_v33  ;;  %5455 = vmatprep.subr.mxu0 %v3415_v34 }
 0x511   : > { %5485 = vmatpush3.msra.mxu1 %v3514_v33  ;;  %5456 = vmatpush3.msra.mxu0 %v3415_v34 }
 0x512   : > { %5486 = vmatprep.subr.mxu1 %v3513_v36  ;;  %5457 = vmatprep.subr.mxu0 %v3414_v37 }
 0x513   : > { %5487 = vmatpush3.msra.mxu1 %v3513_v36  ;;  %5458 = vmatpush3.msra.mxu0 %v3414_v37  ;;  %v4171_v37 = vld [vmem:[%s6130_s7 + $0x2] ss:$0 sm:$0xff] }
 0x514   : > { %5488 = vmatprep.subr.mxu1 %v3512_v2  ;;  %5459 = vmatprep.subr.mxu0 %v3413_v38 }
 0x515   : > { %5489 = vmatpush3.msra.mxu1 %v3512_v2  ;;  %5460 = vmatpush3.msra.mxu0 %v3413_v38 }
 0x516   : > { %5490 = vmatprep.subr.mxu1 %v3511_v39  ;;  %5461 = vmatprep.subr.mxu0 %v3412_v40 }
 0x517   : > { %5491 = vmatpush3.msra.mxu1 %v3511_v39  ;;  %5462 = vmatpush3.msra.mxu0 %v3412_v40 }
 0x518   : > { %5492 = vmatprep.subr.mxu1 %v3510_v41  ;;  %5463 = vmatprep.subr.mxu0 %v3411_v42 }
 0x519   : > { %5493 = vmatpush3.msra.mxu1 %v3510_v41  ;;  %5464 = vmatpush3.msra.mxu0 %v3411_v42 }
 0x51a   : > { %5494 = vmatprep.subr.mxu1 %v3509_v43  ;;  %5465 = vmatprep.subr.mxu0 %v3410_v44 }
 0x51b   : > { %5495 = vmatpush3.msra.mxu1 %v3509_v43  ;;  %5466 = vmatpush3.msra.mxu0 %v3410_v44 }
 0x51c   : > { %5496 = vmatprep.subr.mxu1 %v3508_v6  ;;  %5467 = vmatprep.subr.mxu0 %v3409_v45 }
 0x51d   : > { %5497 = vmatpush3.msra.mxu1 %v3508_v6  ;;  %5468 = vmatpush3.msra.mxu0 %v3409_v45  ;;  %v3812_v6 = vld [vmem:[#allocation7 + $0x570] sm:$0xff]  ;;  %v3811_v45 = vld [vmem:[#allocation7 + $0x568] sm:$0xff] }
 0x51e   : > { %5498 = vmatprep.subr.mxu1 %v3507_v46  ;;  %5469 = vmatprep.subr.mxu0 %v3408_v47 }
 0x51f   : > { %5499 = vmatpush3.msra.mxu1 %v3507_v46  ;;  %5470 = vmatpush3.msra.mxu0 %v3408_v47  ;;  %v3810_v46 = vld [vmem:[#allocation7 + $0x560] sm:$0xff] }
 0x520   : > { %5500 = vmatprep.subr.mxu1 %v3506_v48  ;;  %5471 = vmatprep.subr.mxu0 %v3407_v49 }
 0x521   : > { %5501 = vmatpush3.msra.mxu1 %v3506_v48  ;;  %5472 = vmatpush3.msra.mxu0 %v3407_v49 }
 0x522   : > { %5502 = vmatprep.subr.mxu1 %v3505_v50  ;;  %5474 = vmatmul.mubr.f32.vlgmr.msra.gmra.mxu0 %v3405_v52 }
 0x523   : > { %5503 = vmatpush3.msra.mxu1 %v3505_v50  ;;  %5511 = vmatprep.subr.mxu0 %v3644_v55  ;;  %v3908_v50 = vld [vmem:[#allocation7 + $0x5f0] sm:$0xff] }
 0x524   : > { %5504 = vmatprep.subr.mxu1 %v3504_v51  ;;  %5512 = vmatpush3.msra.mxu0 %v3644_v55  ;;  %v3906_v55 = vld [vmem:[#allocation7 + $0x5e0] sm:$0xff] }
 0x525   : > { %5505 = vmatpush3.msra.mxu1 %v3504_v51  ;;  %5513 = vmatprep.subr.mxu0 %v3643_v57  ;;  %v3809_v51 = vld [vmem:[#allocation7 + $0x558] sm:$0xff] }
 0x526   : > { %5506 = vmatprep.subr.mxu1 %v3503_v53  ;;  %5514 = vmatpush3.msra.mxu0 %v3643_v57  ;;  %v3905_v57 = vld [vmem:[#allocation7 + $0x5d8] sm:$0xff] }
 0x527   : > { %5507 = vmatpush3.msra.mxu1 %v3503_v53  ;;  %5515 = vmatprep.subr.mxu0 %v3642_v59  ;;  %v3907_v53 = vld [vmem:[#allocation7 + $0x5e8] sm:$0xff] }
 0x528   : > { %5509 = vmatmul.mubr.f32.vlgmr.msra.gmra.mxu1 %v3501_v54  ;;  %5546 = vmatprep.subr.mxu1 %v3625_v56  ;;  %v3808_v54 = vld [vmem:[#allocation7 + $0x550] sm:$0xff] }
 0x529   : > { %5547 = vmatpush3.msra.mxu1 %v3625_v56  ;;  %5516 = vmatpush3.msra.mxu0 %v3642_v59  ;;  %v3807_v56 = vld [vmem:[#allocation7 + $0x548] sm:$0xff]  ;;  %v3904_v59 = vld [vmem:[#allocation7 + $0x5d0] sm:$0xff] }
 0x52a   : > { %5548 = vmatprep.subr.mxu1 %v3624_v58  ;;  %5517 = vmatprep.subr.mxu0 %v3641_v61 }
 0x52b   : > { %5549 = vmatpush3.msra.mxu1 %v3624_v58  ;;  %5518 = vmatpush3.msra.mxu0 %v3641_v61  ;;  %v3806_v58 = vld [vmem:[#allocation7 + $0x540] sm:$0xff]  ;;  %v3903_v61 = vld [vmem:[#allocation7 + $0x5c8] sm:$0xff] }
 0x52c   : > { %5550 = vmatprep.subr.mxu1 %v3623_v60  ;;  %5519 = vmatprep.subr.mxu0 %v3640_v0 }
 0x52d   : > { %5551 = vmatpush3.msra.mxu1 %v3623_v60  ;;  %5520 = vmatpush3.msra.mxu0 %v3640_v0  ;;  %v3805_v60 = vld [vmem:[#allocation7 + $0x538] sm:$0xff]  ;;  %v3902_v0 = vld [vmem:[#allocation7 + $0x5c0] sm:$0xff] }
 0x52e   : > { %5552 = vmatprep.subr.mxu1 %v3622_v63  ;;  %5521 = vmatprep.subr.mxu0 %v3639_v3 }
 0x52f   : > { %5553 = vmatpush3.msra.mxu1 %v3622_v63  ;;  %5522 = vmatpush3.msra.mxu0 %v3639_v3  ;;  %v3804_v63 = vld [vmem:[#allocation7 + $0x530] sm:$0xff]  ;;  %v3901_v3 = vld [vmem:[#allocation7 + $0x5b8] sm:$0xff] }
 0x530   : > { %5554 = vmatprep.subr.mxu1 %v3621_v1  ;;  %5523 = vmatprep.subr.mxu0 %v3638_v32 }
 0x531   : > { %5555 = vmatpush3.msra.mxu1 %v3621_v1  ;;  %5524 = vmatpush3.msra.mxu0 %v3638_v32  ;;  %v3803_v1 = vld [vmem:[#allocation7 + $0x528] sm:$0xff]  ;;  %v3900_v32 = vld [vmem:[#allocation7 + $0x5b0] sm:$0xff] }
 0x532   : > { %5556 = vmatprep.subr.mxu1 %v3620_v4  ;;  %5525 = vmatprep.subr.mxu0 %v3637_v7 }
 0x533   : > { %5557 = vmatpush3.msra.mxu1 %v3620_v4  ;;  %5526 = vmatpush3.msra.mxu0 %v3637_v7  ;;  %v3802_v4 = vld [vmem:[#allocation7 + $0x520] sm:$0xff]  ;;  %v3899_v7 = vld [vmem:[#allocation7 + $0x5a8] sm:$0xff] }
 0x534   : > { %5558 = vmatprep.subr.mxu1 %v3619_v5  ;;  %5527 = vmatprep.subr.mxu0 %v3636_v8 }
 0x535   : > { %5559 = vmatpush3.msra.mxu1 %v3619_v5  ;;  %5528 = vmatpush3.msra.mxu0 %v3636_v8  ;;  %v3801_v5 = vld [vmem:[#allocation7 + $0x518] sm:$0xff]  ;;  %v3800_v8 = vld [vmem:[#allocation7 + $0x510] sm:$0xff] }
 0x536   : > { %5529 = vmatprep.subr.mxu0 %v3635_v9  ;;  %5560 = vmatprep.subr.mxu1 %v3618_v11 }
 0x537   : > { %5530 = vmatpush3.msra.mxu0 %v3635_v9  ;;  %5561 = vmatpush3.msra.mxu1 %v3618_v11  ;;  %v3898_v9 = vld [vmem:[#allocation7 + $0x5a0] sm:$0xff]  ;;  %v3897_v11 = vld [vmem:[#allocation7 + $0x598] sm:$0xff] }
 0x538   : > { %5531 = vmatprep.subr.mxu0 %v3634_v10  ;;  %5562 = vmatprep.subr.mxu1 %v3617_v12 }
 0x539   : > { %5532 = vmatpush3.msra.mxu0 %v3634_v10  ;;  %5563 = vmatpush3.msra.mxu1 %v3617_v12  ;;  %v3799_v10 = vld [vmem:[#allocation7 + $0x508] sm:$0xff]  ;;  %v3896_v12 = vld [vmem:[#allocation7 + $0x590] sm:$0xff] }
 0x53a   : > { %5533 = vmatprep.subr.mxu0 %v3633_v35  ;;  %5564 = vmatprep.subr.mxu1 %v3616_v14 }
 0x53b   : > { %5534 = vmatpush3.msra.mxu0 %v3633_v35  ;;  %5565 = vmatpush3.msra.mxu1 %v3616_v14  ;;  %v3798_v35 = vld [vmem:[#allocation7 + $0x500] sm:$0xff] }
 0x53c   : > { %5535 = vmatprep.subr.mxu0 %v3632_v13  ;;  %5566 = vmatprep.subr.mxu1 %v3615_v16 }
 0x53d   : > { %5536 = vmatpush3.msra.mxu0 %v3632_v13  ;;  %5567 = vmatpush3.msra.mxu1 %v3615_v16  ;;  %v3895_v13 = vld [vmem:[#allocation7 + $0x588] sm:$0xff] }
 0x53e   : > { %5537 = vmatprep.subr.mxu0 %v3631_v15  ;;  %5568 = vmatprep.subr.mxu1 %v3614_v18 }
 0x53f   : > { %5538 = vmatpush3.msra.mxu0 %v3631_v15  ;;  %5569 = vmatpush3.msra.mxu1 %v3614_v18  ;;  %v3894_v15 = vld [vmem:[#allocation7 + $0x580] sm:$0xff] }
 0x540   : > { %5539 = vmatprep.subr.mxu0 %v3630_v17  ;;  %5570 = vmatprep.subr.mxu1 %v3613_v19 }
 0x541   : > { %5540 = vmatpush3.msra.mxu0 %v3630_v17  ;;  %5571 = vmatpush3.msra.mxu1 %v3613_v19 }
 0x542   : > { %5541 = vmatprep.subr.mxu0 %v3629_v20  ;;  %5572 = vmatprep.subr.mxu1 %v3612_v21 }
 0x543   : > { %5542 = vmatpush3.msra.mxu0 %v3629_v20  ;;  %5573 = vmatpush3.msra.mxu1 %v3612_v21 }
 0x544   : > { %5581 = vmatprep.subr.mxu0 %v3813_v22  ;;  %5574 = vmatprep.subr.mxu1 %v3611_v23 }
 0x545   : > { %5575 = vmatpush3.msra.mxu1 %v3611_v23 }
 0x546   : > { %5576 = vmatprep.subr.mxu1 %v3610_v24 }
 0x547   : > { %5577 = vmatpush3.msra.mxu1 %v3610_v24 }
 0x548   : > { %5616 = vmatprep.subr.mxu1 %v3909_v25 }
 0x5c0   : > { %v5405_v26 = vpop.f32.mrf.mxu0 }
 0x5c2   : > { %v3320_v29 = vpop.f32.mrf.mxu0 }
 0x5c8   : > { %v5440_v27 = vpop.f32.mrf.mxu1 }
 0x5c9   : > { %v3401_v62 = vadd.f32 %v5440_v27, %v5405_v26  ;;  %v4172_v27 = vld [vmem:[%s6130_s7 + $0x3] ss:$0 sm:$0xff] }
 0x5ca   : > { %v3395_v28 = vpop.f32.mrf.mxu1 }
 0x5cb   : > { %v3396_v33 = vadd.f32 %v3395_v28, %v3320_v29 }
 0x5e2   : > { %v5475_v30 = vpop.f32.mrf.mxu0 }
 0x5e3   : > { %v3499_v34 = vadd.f32 %v5475_v30, %v3401_v62 }
 0x5e4   : > { %v3489_v31 = vpop.f32.mrf.mxu0 }
 0x5e5   : > { %v3498_v38 = vadd.f32 %v3489_v31, %v3396_v33 }
 0x5e8   : > { %v5510_v36 = vpop.f32.mrf.mxu1 }
 0x5e9   : > { %v3595_v2 = vadd.f32 %v5510_v36, %v3499_v34 }
 0x5ea   : > { %v3585_v39 = vpop.f32.mrf.mxu1 }
 0x5eb   : > { %v3602_v40 = vadd.f32 %v4171_v37, %v3595_v2  ;;  %v3594_v41 = vadd.f32 %v3585_v39, %v3498_v38 }
 0x5ed   : > { %v3604_v42 = vmax.f32 %v3602_v40, 0.0  ;;  %v3601_v43 = vadd.f32 %v4171_v37, %v3594_v41 }
 0x5ef   : > { %3606 = vst [vmem:[#allocation3 + $0x9] sm:$0xff] %v3604_v42  ;;  %v3603_v44 = vmax.f32 %v3601_v43, 0.0 }
 0x5f1   : > { %3605 = vst [vmem:[#allocation3 + $0x1] sm:$0xff] %v3603_v44  ;;  %5543 = vmatprep.mubr.f32.mxu0 %v3603_v44 }
 0x5f2   : > { %5544 = vmatmul.mubr.f32.vlgmr.msra.gmra.mxu0 %v3604_v42 }
 0x5f3   : > { %5582 = vmatpush3.msra.mxu0 %v3813_v22 }
 0x5f4   : > { %5583 = vmatprep.subr.mxu0 %v3812_v6 }
 0x5f5   : > { %5584 = vmatpush3.msra.mxu0 %v3812_v6 }
 0x5f6   : > { %5585 = vmatprep.subr.mxu0 %v3811_v45  ;;  %v3796_v14 = vld [vmem:[#allocation3 + $0xa] sm:$0xff] }
 0x5f7   : > { %5586 = vmatpush3.msra.mxu0 %v3811_v45  ;;  %v3892_v16 = vld [vmem:[#allocation3 + $0xb] sm:$0xff] }
 0x5f8   : > { %v3607_v47 = vld [vmem:[#allocation3] sm:$0xff]  ;;  %v3608_v48 = vld [vmem:[#allocation3 + $0x8] sm:$0xff]  ;;  %5587 = vmatprep.subr.mxu0 %v3810_v46 }
 0x5f9   : > { %v3795_v49 = vld [vmem:[#allocation3 + $0x2] sm:$0xff]  ;;  %5578 = vmatprep.mubr.f32.mxu1 %v3607_v47  ;;  %5588 = vmatpush3.msra.mxu0 %v3810_v46 }
 0x5fa   : > { %5613 = vmatprep.mubr.f32.mxu0 %v3795_v49  ;;  %5579 = vmatmul.mubr.f32.vlgmr.msra.gmra.mxu1 %v3608_v48  ;;  %v3891_v52 = vld [vmem:[#allocation3 + $0x3] sm:$0xff] }
 0x5fb   : > { %5617 = vmatpush3.msra.mxu1 %v3909_v25  ;;  %5648 = vmatprep.mubr.f32.mxu1 %v3891_v52 }
 0x5fc   : > { %5618 = vmatprep.subr.mxu1 %v3908_v50  ;;  %5589 = vmatprep.subr.mxu0 %v3809_v51 }
 0x5fd   : > { %5619 = vmatpush3.msra.mxu1 %v3908_v50  ;;  %5590 = vmatpush3.msra.mxu0 %v3809_v51 }
 0x5fe   : > { %5620 = vmatprep.subr.mxu1 %v3907_v53  ;;  %5591 = vmatprep.subr.mxu0 %v3808_v54 }
 0x5ff   : > { %5621 = vmatpush3.msra.mxu1 %v3907_v53  ;;  %5592 = vmatpush3.msra.mxu0 %v3808_v54 }
 0x600   : > { %5622 = vmatprep.subr.mxu1 %v3906_v55  ;;  %5593 = vmatprep.subr.mxu0 %v3807_v56 }
 0x601   : > { %5623 = vmatpush3.msra.mxu1 %v3906_v55  ;;  %5594 = vmatpush3.msra.mxu0 %v3807_v56 }
 0x602   : > { %5624 = vmatprep.subr.mxu1 %v3905_v57  ;;  %5595 = vmatprep.subr.mxu0 %v3806_v58 }
 0x603   : > { %5625 = vmatpush3.msra.mxu1 %v3905_v57  ;;  %5596 = vmatpush3.msra.mxu0 %v3806_v58 }
 0x604   : > { %5626 = vmatprep.subr.mxu1 %v3904_v59  ;;  %5597 = vmatprep.subr.mxu0 %v3805_v60 }
 0x605   : > { %5627 = vmatpush3.msra.mxu1 %v3904_v59  ;;  %5598 = vmatpush3.msra.mxu0 %v3805_v60 }
 0x606   : > { %5628 = vmatprep.subr.mxu1 %v3903_v61  ;;  %5599 = vmatprep.subr.mxu0 %v3804_v63 }
 0x607   : > { %5629 = vmatpush3.msra.mxu1 %v3903_v61  ;;  %5600 = vmatpush3.msra.mxu0 %v3804_v63 }
 0x608   : > { %5630 = vmatprep.subr.mxu1 %v3902_v0  ;;  %5601 = vmatprep.subr.mxu0 %v3803_v1 }
 0x609   : > { %5631 = vmatpush3.msra.mxu1 %v3902_v0  ;;  %5602 = vmatpush3.msra.mxu0 %v3803_v1 }
 0x60a   : > { %5632 = vmatprep.subr.mxu1 %v3901_v3  ;;  %5603 = vmatprep.subr.mxu0 %v3802_v4 }
 0x60b   : > { %5633 = vmatpush3.msra.mxu1 %v3901_v3  ;;  %5604 = vmatpush3.msra.mxu0 %v3802_v4 }
 0x60c   : > { %5634 = vmatprep.subr.mxu1 %v3900_v32  ;;  %5605 = vmatprep.subr.mxu0 %v3801_v5 }
 0x60d   : > { %5635 = vmatpush3.msra.mxu1 %v3900_v32  ;;  %5606 = vmatpush3.msra.mxu0 %v3801_v5 }
 0x60e   : > { %5636 = vmatprep.subr.mxu1 %v3899_v7  ;;  %5607 = vmatprep.subr.mxu0 %v3800_v8 }
 0x60f   : > { %5637 = vmatpush3.msra.mxu1 %v3899_v7  ;;  %5608 = vmatpush3.msra.mxu0 %v3800_v8 }
 0x610   : > { %5638 = vmatprep.subr.mxu1 %v3898_v9  ;;  %5609 = vmatprep.subr.mxu0 %v3799_v10 }
 0x611   : > { %5639 = vmatpush3.msra.mxu1 %v3898_v9  ;;  %5610 = vmatpush3.msra.mxu0 %v3799_v10 }
 0x612   : > { %5640 = vmatprep.subr.mxu1 %v3897_v11  ;;  %5611 = vmatprep.subr.mxu0 %v3798_v35 }
 0x613   : > { %5641 = vmatpush3.msra.mxu1 %v3897_v11  ;;  %5612 = vmatpush3.msra.mxu0 %v3798_v35 }
 0x614   : > { %5642 = vmatprep.subr.mxu1 %v3896_v12  ;;  %5614 = vmatmul.mubr.f32.vlgmr.msra.gmra.mxu0 %v3796_v14 }
 0x615   : > { %5643 = vmatpush3.msra.mxu1 %v3896_v12 }
 0x616   : > { %5644 = vmatprep.subr.mxu1 %v3895_v13 }
 0x617   : > { %5645 = vmatpush3.msra.mxu1 %v3895_v13 }
 0x618   : > { %5646 = vmatprep.subr.mxu1 %v3894_v15 }
 0x619   : > { %5647 = vmatpush3.msra.mxu1 %v3894_v15 }
 0x61a   : > { %5649 = vmatmul.mubr.f32.vlgmr.msra.gmra.mxu1 %v3892_v16 }
 0x6b2   : > { %v5545_v17 = vpop.f32.mrf.mxu0 }
 0x6b4   : > { %v3711_v19 = vpop.f32.mrf.mxu0 }
 0x6ba   : > { %v5580_v18 = vpop.f32.mrf.mxu1 }
 0x6bb   : > { %v3792_v22 = vadd.f32 %v5580_v18, %v5545_v17 }
 0x6bc   : > { %v3786_v21 = vpop.f32.mrf.mxu1 }
 0x6bd   : > { %v3787_v24 = vadd.f32 %v3786_v21, %v3711_v19 }
 0x6d4   : > { %v5615_v20 = vpop.f32.mrf.mxu0 }
 0x6d5   : > { %v3890_v25 = vadd.f32 %v5615_v20, %v3792_v22 }
 0x6d6   : > { %v3880_v23 = vpop.f32.mrf.mxu0 }
 0x6d7   : > { %v3889_v30 = vadd.f32 %v3880_v23, %v3787_v24 }
 0x6da   : > { %v5650_v26 = vpop.f32.mrf.mxu1 }
 0x6db   : > { %v3986_v29 = vadd.f32 %v5650_v26, %v3890_v25 }
 0x6dc   : > { %v3976_v28 = vpop.f32.mrf.mxu1 }
 0x6dd   : > { %v3993_v62 = vadd.f32 %v4172_v27, %v3986_v29  ;;  %v3985_v31 = vadd.f32 %v3976_v28, %v3889_v30 }
 0x6df   : > { %v3995_v33 = vmax.f32 %v3993_v62, 0.0  ;;  %v3992_v34 = vadd.f32 %v4172_v27, %v3985_v31 }
 0x6e1   : > { %3997 = vst [vmem:[#allocation2 + $0x8] sm:$0xff] %v3995_v33  ;;  %v3994_v36 = vmax.f32 %v3992_v34, 0.0 }
 0x6e3   : > { %3996 = vst [vmem:[#allocation2] sm:$0xff] %v3994_v36 }
 0x6ea   : > { %v3998_v37 = vld [vmem:[#allocation2] ss:$2 sm:$0xff]  ;;  %v3999_v2 = vld [vmem:[#allocation2 + $0x1] ss:$2 sm:$0xff] }
 0x6eb   : > { %v4000_v38 = vmax.f32 %v3998_v37, %v3999_v2 }
 0x6ed   : > { %4001 = vst [vmem:[%s6104_s18 + $0x10] sm:$0xff] %v4000_v38 }
 0x6ee PF: > { %s20_s27 = sadd.s32 1, %s5752_s27  }
 0x6ef   : > { %p17_p2 = scmp.ge.s32.totalorder %s20_s27, 4  }
 0x6f1   :  { %19 = sbr.rel (!%p17_p2) target bundleno = 2 (0x2), region = 130 }
 0x6f6   :  { %4023 = vsyncpa [#allocation6], 1 }
 0x6f7   :  { %4025 = vsyncpa [#allocation6 + $0x1], 1 }
 0x6f8   :  { %4026 = vsyncpa [#allocation8], 1 }

</bundles_post_ra>
